<compile_context>
chip_gen: v6e
topology: v6e:2x2x1
jax: 0.10.0
libtpu: 0.0.40
codegen_flags: <defaults>
</compile_context>

<pallas_src>
import jax
import jax.numpy as jnp
from jax.experimental import pallas as pl
from jax.experimental.pallas import tpu as pltpu


_LANE = 128
_SUB = 16                      # sublane multiple (bf16-friendly, also fine for f32)
_BATCH_BLOCK = 256             # 256 keeps v7x's 64 MiB VMEM happy; good on v5e/v6e too
_VMEM_LIMIT = 32 * 1024 * 1024


def _round_up(n, m):
    return ((n + m - 1) // m) * m


# ------------------------------ fused kernel -------------------------------

def _pcnet_kernel(xp_ref, xc_ref,
                  wp_ref, wc_ref, bcat_ref,
                  w1_ref, b1_ref,
                  w2_ref, b2_ref,
                  w3_ref, b3_ref,
                  w4_ref, b4_ref,
                  out_ref):
    """Whole PcNet_chemBERTa forward for one batch tile; weights VMEM-resident."""

    def mm(x, w_ref):
        # bf16 operands on the MXU, f32 accumulation.
        return jnp.dot(x.astype(jnp.bfloat16), w_ref[...],
                       preferred_element_type=jnp.float32)

    # Branch layers + concat folded into the column placement of wp/wc:
    #   lanes  0:32 -> relu(x_prot @ W_prot + b_prot)
    #   lanes 32:56 -> relu(x_comp @ W_comp + b_comp)
    #   lanes 56:   -> exactly 0
    hcat = jnp.maximum(mm(xp_ref[...], wp_ref) + mm(xc_ref[...], wc_ref)
                       + bcat_ref[...], 0.0)                       # (TB, 128)

    # fc_lin1 .. fc_lin3 (fc_drop1 / fc_drop2 are eval-mode identity)
    # TODO(synk): training-mode dropout (RNG mask) not implemented.
    h1 = jnp.maximum(mm(hcat, w1_ref) + b1_ref[...], 0.0)          # (TB, 1024)
    h2 = jnp.maximum(mm(h1, w2_ref) + b2_ref[...], 0.0)            # (TB, 1024)
    h3 = jnp.maximum(mm(h2, w3_ref) + b3_ref[...], 0.0)            # (TB, 512)

    # shared fc_lin4 head: lane 0 of y is the real pre-activation, rest are 0
    y = mm(h3, w4_ref) + b4_ref[...]                               # (TB, 128)
    y0 = y[:, 0:1]                                                 # (TB, 1)

    # single lane-dense output slab: lane 0 = relu head, lane 1 = sigmoid head
    lane = jax.lax.broadcasted_iota(jnp.int32, y.shape, 1)
    out_ref[...] = jnp.where(lane == 0,
                             jnp.maximum(y, 0.0),
                             jax.nn.sigmoid(y0)).astype(out_ref.dtype)


# --------------------------- parameter utilities ---------------------------

def _init_linear(key, in_f, out_f):
    """Mimic nn.Linear's U(-1/sqrt(in), 1/sqrt(in)); weight stored (in, out)."""
    kw, kb = jax.random.split(key)
    bound = 1.0 / jnp.sqrt(jnp.float32(in_f))
    w = jax.random.uniform(kw, (in_f, out_f), jnp.float32, -bound, bound)
    b = jax.random.uniform(kb, (out_f,), jnp.float32, -bound, bound)
    return w, b


def init_params(key, input_size_prot=1024, input_size_comp=768,
                hidden_size_prot=32, hidden_size_comp=24):
    keys = jax.random.split(key, 6)
    comb = hidden_size_prot + hidden_size_comp      # 56
    return {
        "fc_prot": _init_linear(keys[0], input_size_prot, hidden_size_prot),
        "fc_comp": _init_linear(keys[1], input_size_comp, hidden_size_comp),
        "fc_lin1": _init_linear(keys[2], comb, 1024),
        "fc_lin2": _init_linear(keys[3], 1024, 1024),
        "fc_lin3": _init_linear(keys[4], 1024, 512),
        "fc_lin4": _init_linear(keys[5], 512, 1),
    }


def pack_params(raw):
    """Fold concat into weight packing, pad to 128 lanes, cast weights to bf16."""
    wp, bp = raw["fc_prot"]     # (1024, 32), (32,)
    wc, bc = raw["fc_comp"]     # (768, 24), (24,)
    w1, b1 = raw["fc_lin1"]     # (56, 1024), (1024,)
    w2, b2 = raw["fc_lin2"]     # (1024, 1024)
    w3, b3 = raw["fc_lin3"]     # (1024, 512)
    w4, b4 = raw["fc_lin4"]     # (512, 1), (1,)

    hp, hc = wp.shape[1], wc.shape[1]
    CAT = _round_up(hp + hc, _LANE)                 # 56  -> 128
    OUT = _round_up(w4.shape[1], _LANE)             # 1   -> 128

    # fc_prot columns at lanes [0,hp), fc_comp columns at lanes [hp,hp+hc):
    # the branch matmul directly produces the concatenated hidden vector.
    wp_p = jnp.zeros((wp.shape[0], CAT), jnp.float32).at[:, :hp].set(wp)
    wc_p = jnp.zeros((wc.shape[0], CAT), jnp.float32).at[:, hp:hp + hc].set(wc)
    bcat = (jnp.zeros((1, CAT), jnp.float32)
            .at[0, :hp].set(bp).at[0, hp:hp + hc].set(bc))

    # fc_lin1 as a single (128, 1024) weight; rows >= hp+hc are zero and the
    # matching hcat lanes are zero, so the result is numerically unchanged.
    w1_p = jnp.zeros((CAT, w1.shape[1]), jnp.float32).at[:hp + hc, :].set(w1)

    w4_p = jnp.zeros((w4.shape[0], OUT), jnp.float32).at[:, :w4.shape[1]].set(w4)
    b4_p = jnp.zeros((1, OUT), jnp.float32).at[0, :b4.shape[0]].set(b4)

    bf = lambda a: a.astype(jnp.bfloat16)
    return {
        "wp": bf(wp_p), "wc": bf(wc_p), "bcat": bcat,
        "w1": bf(w1_p), "b1": b1.reshape(1, -1),
        "w2": bf(w2),   "b2": b2.reshape(1, -1),
        "w3": bf(w3),   "b3": b3.reshape(1, -1),
        "w4": bf(w4_p), "b4": b4_p,
    }


# ------------------------------ forward pass -------------------------------

def _choose_tile(batch):
    """Pick a batch tile: cap at _BATCH_BLOCK, force >=2 grid steps when possible
    so the 'parallel' grid axis actually shards across v7x's two TensorCores."""
    bpad = _round_up(max(batch, 1), _SUB)
    n_tiles = pl.cdiv(bpad, _BATCH_BLOCK)
    if n_tiles < 2 and bpad > _SUB:
        n_tiles = 2
    tb = _round_up(pl.cdiv(bpad, n_tiles), _SUB)
    return tb, _round_up(bpad, tb)


@jax.jit
def pcnet_forward(packed, protein, compound):
    B, p_in = protein.shape
    _, c_in = compound.shape

    # bf16 inputs: halves per-step input DMA and input double-buffer VMEM
    # (the kernel casts to bf16 before the MXU anyway -> no precision change).
    protein = protein.astype(jnp.bfloat16)
    compound = compound.astype(jnp.bfloat16)

    TB, Bp = _choose_tile(B)
    if Bp != B:
        protein = jnp.pad(protein, ((0, Bp - B), (0, 0)))
        compound = jnp.pad(compound, ((0, Bp - B), (0, 0)))
    grid = (Bp // TB,)

    batch_map = lambda i: (i, 0)
    const_map = lambda i: (0, 0)     # weights: same block every step -> VMEM-resident

    def full_spec(arr):
        return pl.BlockSpec(arr.shape, const_map)

    in_specs = [
        pl.BlockSpec((TB, p_in), batch_map),
        pl.BlockSpec((TB, c_in), batch_map),
        full_spec(packed["wp"]), full_spec(packed["wc"]), full_spec(packed["bcat"]),
        full_spec(packed["w1"]), full_spec(packed["b1"]),
        full_spec(packed["w2"]), full_spec(packed["b2"]),
        full_spec(packed["w3"]), full_spec(packed["b3"]),
        full_spec(packed["w4"]), full_spec(packed["b4"]),
    ]
    out_w = packed["w4"].shape[1]    # 128 (lane-dense output slab)
    out_spec = pl.BlockSpec((TB, out_w), batch_map)
    out_shape = jax.ShapeDtypeStruct((Bp, out_w), jnp.float32)

    slab = pl.pallas_call(
        _pcnet_kernel,
        grid=grid,
        in_specs=in_specs,
        out_specs=out_spec,
        out_shape=out_shape,
        compiler_params=pltpu.CompilerParams(
            dimension_semantics=("parallel",),
            vmem_limit_bytes=_VMEM_LIMIT,
        ),
    )(protein, compound,
      packed["wp"], packed["wc"], packed["bcat"],
      packed["w1"], packed["b1"],
      packed["w2"], packed["b2"],
      packed["w3"], packed["b3"],
      packed["w4"], packed["b4"])

    # lane 0 = relu(fc_lin4(h)), lane 1 = sigmoid(fc_lin4(h))
    return slab[:B, 0:1], slab[:B, 1:2]


# pure-JAX reference (same bf16 weights/activations, f32 accumulation)
def _reference(raw, protein, compound):
    def lin(x, w, b):
        return jnp.dot(x.astype(jnp.bfloat16), w.astype(jnp.bfloat16),
                       preferred_element_type=jnp.float32) + b

    hp = jnp.maximum(lin(protein, *raw["fc_prot"]), 0.0)
    hc = jnp.maximum(lin(compound, *raw["fc_comp"]), 0.0)
    h = jnp.concatenate([hp, hc], axis=1)
    h = jnp.maximum(lin(h, *raw["fc_lin1"]), 0.0)
    h = jnp.maximum(lin(h, *raw["fc_lin2"]), 0.0)
    h = jnp.maximum(lin(h, *raw["fc_lin3"]), 0.0)
    y = lin(h, *raw["fc_lin4"])
    return jnp.maximum(y, 0.0), jax.nn.sigmoid(y)


if __name__ == "__main__":
    key = jax.random.PRNGKey(0)
    kparams, kprot, kcomp = jax.random.split(key, 3)

    batch = 32    # small, but gives a 2-step batch grid (TB=16) to exercise tiling
    protein = jax.random.normal(kprot, (batch, 1024), jnp.float32)
    compound = jax.random.normal(kcomp, (batch, 768), jnp.float32)

    raw = init_params(kparams)
    packed = pack_params(raw)

    out1, out2 = pcnet_forward(packed, protein, compound)
    jax.block_until_ready((out1, out2))

    ref1, ref2 = _reference(raw, protein, compound)
    assert out1.shape == (batch, 1) and out2.shape == (batch, 1)
    assert jnp.allclose(out1, ref1, atol=1e-2, rtol=1e-2)
    assert jnp.allclose(out2, ref2, atol=1e-2, rtol=1e-2)

    print("KERNEL_OK")
</pallas_src>

<mosaic_0001>
module attributes {stable_mosaic.version = 11 : i64} {
  func.func @_pcnet_kernel(%arg0: i32, %arg1: memref<16x1024xbf16, #tpu.memory_space<vmem>>, %arg2: memref<16x768xbf16, #tpu.memory_space<vmem>>, %arg3: memref<1024x128xbf16, #tpu.memory_space<vmem>>, %arg4: memref<768x128xbf16, #tpu.memory_space<vmem>>, %arg5: memref<1x128xf32, #tpu.memory_space<vmem>>, %arg6: memref<128x1024xbf16, #tpu.memory_space<vmem>>, %arg7: memref<1x1024xf32, #tpu.memory_space<vmem>>, %arg8: memref<1024x1024xbf16, #tpu.memory_space<vmem>>, %arg9: memref<1x1024xf32, #tpu.memory_space<vmem>>, %arg10: memref<1024x512xbf16, #tpu.memory_space<vmem>>, %arg11: memref<1x512xf32, #tpu.memory_space<vmem>>, %arg12: memref<512x128xbf16, #tpu.memory_space<vmem>>, %arg13: memref<1x128xf32, #tpu.memory_space<vmem>>, %arg14: memref<16x128xf32, #tpu.memory_space<vmem>>) attributes {dimension_semantics = [#tpu.dimension_semantics<parallel>], iteration_bounds = array<i64: 2>, scalar_prefetch = 0 : i64, scratch_operands = 0 : i64, tpu.core_type = #tpu.core_type<tc>, window_params = [{transform_indices = @transform_0, window_bounds = array<i64: 16, 1024>}, {transform_indices = @transform_1, window_bounds = array<i64: 16, 768>}, {pipeline_mode = #tpu.pipeline_mode<synchronous>, transform_indices = @transform_2, window_bounds = array<i64: 1024, 128>}, {pipeline_mode = #tpu.pipeline_mode<synchronous>, transform_indices = @transform_3, window_bounds = array<i64: 768, 128>}, {pipeline_mode = #tpu.pipeline_mode<synchronous>, transform_indices = @transform_4, window_bounds = array<i64: 1, 128>}, {pipeline_mode = #tpu.pipeline_mode<synchronous>, transform_indices = @transform_5, window_bounds = array<i64: 128, 1024>}, {pipeline_mode = #tpu.pipeline_mode<synchronous>, transform_indices = @transform_6, window_bounds = array<i64: 1, 1024>}, {pipeline_mode = #tpu.pipeline_mode<synchronous>, transform_indices = @transform_7, window_bounds = array<i64: 1024, 1024>}, {pipeline_mode = #tpu.pipeline_mode<synchronous>, transform_indices = @transform_8, window_bounds = array<i64: 1, 1024>}, {pipeline_mode = #tpu.pipeline_mode<synchronous>, transform_indices = @transform_9, window_bounds = array<i64: 1024, 512>}, {pipeline_mode = #tpu.pipeline_mode<synchronous>, transform_indices = @transform_10, window_bounds = array<i64: 1, 512>}, {pipeline_mode = #tpu.pipeline_mode<synchronous>, transform_indices = @transform_11, window_bounds = array<i64: 512, 128>}, {pipeline_mode = #tpu.pipeline_mode<synchronous>, transform_indices = @transform_12, window_bounds = array<i64: 1, 128>}, {transform_indices = @transform_13, window_bounds = array<i64: 16, 128>}]} {
    %c0 = arith.constant 0 : index
    %c0_0 = arith.constant 0 : index
    %0 = vector.load %arg1[%c0, %c0_0] : memref<16x1024xbf16, #tpu.memory_space<vmem>>, vector<16x1024xbf16>
    %c0_1 = arith.constant 0 : index
    %c0_2 = arith.constant 0 : index
    %1 = vector.load %arg3[%c0_1, %c0_2] : memref<1024x128xbf16, #tpu.memory_space<vmem>>, vector<1024x128xbf16>
    %cst = arith.constant dense<0.000000e+00> : vector<16x128xf32>
    %2 = tpu.matmul %0, %1, %cst {dimension_numbers = #tpu.dot_dimension_numbers<[1], [0], [0], [1], [0, 0, 1, 1], [], []>} : vector<16x1024xbf16>, vector<1024x128xbf16>, vector<16x128xf32> -> vector<16x128xf32>
    %c0_3 = arith.constant 0 : index
    %c0_4 = arith.constant 0 : index
    %3 = vector.load %arg2[%c0_3, %c0_4] : memref<16x768xbf16, #tpu.memory_space<vmem>>, vector<16x768xbf16>
    %c0_5 = arith.constant 0 : index
    %c0_6 = arith.constant 0 : index
    %4 = vector.load %arg4[%c0_5, %c0_6] : memref<768x128xbf16, #tpu.memory_space<vmem>>, vector<768x128xbf16>
    %cst_7 = arith.constant dense<0.000000e+00> : vector<16x128xf32>
    %5 = tpu.matmul %3, %4, %cst_7 {dimension_numbers = #tpu.dot_dimension_numbers<[1], [0], [0], [1], [0, 0, 1, 1], [], []>} : vector<16x768xbf16>, vector<768x128xbf16>, vector<16x128xf32> -> vector<16x128xf32>
    %6 = arith.addf %2, %5 : vector<16x128xf32>
    %c0_8 = arith.constant 0 : index
    %c0_9 = arith.constant 0 : index
    %7 = vector.load %arg5[%c0_8, %c0_9] : memref<1x128xf32, #tpu.memory_space<vmem>>, vector<1x128xf32>
    %8 = vector.broadcast %7 : vector<1x128xf32> to vector<16x128xf32>
    %9 = arith.addf %6, %8 : vector<16x128xf32>
    %cst_10 = arith.constant 0.000000e+00 : f32
    %10 = vector.broadcast %cst_10 : f32 to vector<16x128xf32>
    %11 = arith.maximumf %9, %10 : vector<16x128xf32>
    %12 = arith.truncf %11 : vector<16x128xf32> to vector<16x128xbf16>
    %c0_11 = arith.constant 0 : index
    %c0_12 = arith.constant 0 : index
    %13 = vector.load %arg6[%c0_11, %c0_12] : memref<128x1024xbf16, #tpu.memory_space<vmem>>, vector<128x1024xbf16>
    %cst_13 = arith.constant dense<0.000000e+00> : vector<16x1024xf32>
    %14 = tpu.matmul %12, %13, %cst_13 {dimension_numbers = #tpu.dot_dimension_numbers<[1], [0], [0], [1], [0, 0, 1, 1], [], []>} : vector<16x128xbf16>, vector<128x1024xbf16>, vector<16x1024xf32> -> vector<16x1024xf32>
    %c0_14 = arith.constant 0 : index
    %c0_15 = arith.constant 0 : index
    %15 = vector.load %arg7[%c0_14, %c0_15] : memref<1x1024xf32, #tpu.memory_space<vmem>>, vector<1x1024xf32>
    %16 = vector.broadcast %15 : vector<1x1024xf32> to vector<16x1024xf32>
    %17 = arith.addf %14, %16 : vector<16x1024xf32>
    %cst_16 = arith.constant 0.000000e+00 : f32
    %18 = vector.broadcast %cst_16 : f32 to vector<16x1024xf32>
    %19 = arith.maximumf %17, %18 : vector<16x1024xf32>
    %20 = arith.truncf %19 : vector<16x1024xf32> to vector<16x1024xbf16>
    %c0_17 = arith.constant 0 : index
    %c0_18 = arith.constant 0 : index
    %21 = vector.load %arg8[%c0_17, %c0_18] : memref<1024x1024xbf16, #tpu.memory_space<vmem>>, vector<1024x1024xbf16>
    %cst_19 = arith.constant dense<0.000000e+00> : vector<16x1024xf32>
    %22 = tpu.matmul %20, %21, %cst_19 {dimension_numbers = #tpu.dot_dimension_numbers<[1], [0], [0], [1], [0, 0, 1, 1], [], []>} : vector<16x1024xbf16>, vector<1024x1024xbf16>, vector<16x1024xf32> -> vector<16x1024xf32>
    %c0_20 = arith.constant 0 : index
    %c0_21 = arith.constant 0 : index
    %23 = vector.load %arg9[%c0_20, %c0_21] : memref<1x1024xf32, #tpu.memory_space<vmem>>, vector<1x1024xf32>
    %24 = vector.broadcast %23 : vector<1x1024xf32> to vector<16x1024xf32>
    %25 = arith.addf %22, %24 : vector<16x1024xf32>
    %cst_22 = arith.constant 0.000000e+00 : f32
    %26 = vector.broadcast %cst_22 : f32 to vector<16x1024xf32>
    %27 = arith.maximumf %25, %26 : vector<16x1024xf32>
    %28 = arith.truncf %27 : vector<16x1024xf32> to vector<16x1024xbf16>
    %c0_23 = arith.constant 0 : index
    %c0_24 = arith.constant 0 : index
    %29 = vector.load %arg10[%c0_23, %c0_24] : memref<1024x512xbf16, #tpu.memory_space<vmem>>, vector<1024x512xbf16>
    %cst_25 = arith.constant dense<0.000000e+00> : vector<16x512xf32>
    %30 = tpu.matmul %28, %29, %cst_25 {dimension_numbers = #tpu.dot_dimension_numbers<[1], [0], [0], [1], [0, 0, 1, 1], [], []>} : vector<16x1024xbf16>, vector<1024x512xbf16>, vector<16x512xf32> -> vector<16x512xf32>
    %c0_26 = arith.constant 0 : index
    %c0_27 = arith.constant 0 : index
    %31 = vector.load %arg11[%c0_26, %c0_27] : memref<1x512xf32, #tpu.memory_space<vmem>>, vector<1x512xf32>
    %32 = vector.broadcast %31 : vector<1x512xf32> to vector<16x512xf32>
    %33 = arith.addf %30, %32 : vector<16x512xf32>
    %cst_28 = arith.constant 0.000000e+00 : f32
    %34 = vector.broadcast %cst_28 : f32 to vector<16x512xf32>
    %35 = arith.maximumf %33, %34 : vector<16x512xf32>
    %36 = arith.truncf %35 : vector<16x512xf32> to vector<16x512xbf16>
    %c0_29 = arith.constant 0 : index
    %c0_30 = arith.constant 0 : index
    %37 = vector.load %arg12[%c0_29, %c0_30] : memref<512x128xbf16, #tpu.memory_space<vmem>>, vector<512x128xbf16>
    %cst_31 = arith.constant dense<0.000000e+00> : vector<16x128xf32>
    %38 = tpu.matmul %36, %37, %cst_31 {dimension_numbers = #tpu.dot_dimension_numbers<[1], [0], [0], [1], [0, 0, 1, 1], [], []>} : vector<16x512xbf16>, vector<512x128xbf16>, vector<16x128xf32> -> vector<16x128xf32>
    %c0_32 = arith.constant 0 : index
    %c0_33 = arith.constant 0 : index
    %39 = vector.load %arg13[%c0_32, %c0_33] : memref<1x128xf32, #tpu.memory_space<vmem>>, vector<1x128xf32>
    %40 = vector.broadcast %39 : vector<1x128xf32> to vector<16x128xf32>
    %41 = arith.addf %38, %40 : vector<16x128xf32>
    %42 = vector.extract_strided_slice %41 {offsets = [0, 0], sizes = [16, 1], strides = [1, 1]} : vector<16x128xf32> to vector<16x1xf32>
    %43 = tpu.iota {dimensions = array<i32: 1>} : vector<16x128xi32>
    %c0_i32 = arith.constant 0 : i32
    %44 = vector.broadcast %c0_i32 : i32 to vector<16x128xi32>
    %45 = arith.cmpi eq, %43, %44 : vector<16x128xi32>
    %cst_34 = arith.constant 0.000000e+00 : f32
    %46 = vector.broadcast %cst_34 : f32 to vector<16x128xf32>
    %47 = arith.maximumf %41, %46 : vector<16x128xf32>
    %48 = arith.negf %42 : vector<16x1xf32>
    %49 = math.exp %48 : vector<16x1xf32>
    %cst_35 = arith.constant 1.000000e+00 : f32
    %50 = vector.broadcast %cst_35 : f32 to vector<16x1xf32>
    %51 = arith.addf %50, %49 : vector<16x1xf32>
    %52 = arith.divf %50, %51 : vector<16x1xf32>
    %53 = vector.shape_cast %52 : vector<16x1xf32> to vector<16x1xf32>
    %54 = vector.broadcast %53 : vector<16x1xf32> to vector<16x128xf32>
    %55 = arith.select %45, %47, %54 : vector<16x128xi1>, vector<16x128xf32>
    %c0_36 = arith.constant 0 : index
    %c0_37 = arith.constant 0 : index
    %56 = vector.load %arg14[%c0_36, %c0_37] : memref<16x128xf32, #tpu.memory_space<vmem>>, vector<16x128xf32>
    tpu.vector_store %arg14[%c0_36, %c0_37], %55 {strides = array<i32>} : memref<16x128xf32, #tpu.memory_space<vmem>>, vector<16x128xf32>,
    return
  }
  func.func @transform_0(%arg0: i32) -> (i32, i32) {
    %c0_i32 = arith.constant 0 : i32
    %c0_i32_0 = arith.constant 0 : i32
    return %arg0, %c0_i32 : i32, i32
  }
  func.func @transform_1(%arg0: i32) -> (i32, i32) {
    %c0_i32 = arith.constant 0 : i32
    %c0_i32_0 = arith.constant 0 : i32
    return %arg0, %c0_i32 : i32, i32
  }
  func.func @transform_2(%arg0: i32) -> (i32, i32) {
    %c0_i32 = arith.constant 0 : i32
    %c0_i32_0 = arith.constant 0 : i32
    %c0_i32_1 = arith.constant 0 : i32
    return %c0_i32, %c0_i32_0 : i32, i32
  }
  func.func @transform_3(%arg0: i32) -> (i32, i32) {
    %c0_i32 = arith.constant 0 : i32
    %c0_i32_0 = arith.constant 0 : i32
    %c0_i32_1 = arith.constant 0 : i32
    return %c0_i32, %c0_i32_0 : i32, i32
  }
  func.func @transform_4(%arg0: i32) -> (i32, i32) {
    %c0_i32 = arith.constant 0 : i32
    %c0_i32_0 = arith.constant 0 : i32
    %c0_i32_1 = arith.constant 0 : i32
    return %c0_i32, %c0_i32_0 : i32, i32
  }
  func.func @transform_5(%arg0: i32) -> (i32, i32) {
    %c0_i32 = arith.constant 0 : i32
    %c0_i32_0 = arith.constant 0 : i32
    %c0_i32_1 = arith.constant 0 : i32
    return %c0_i32, %c0_i32_0 : i32, i32
  }
  func.func @transform_6(%arg0: i32) -> (i32, i32) {
    %c0_i32 = arith.constant 0 : i32
    %c0_i32_0 = arith.constant 0 : i32
    %c0_i32_1 = arith.constant 0 : i32
    return %c0_i32, %c0_i32_0 : i32, i32
  }
  func.func @transform_7(%arg0: i32) -> (i32, i32) {
    %c0_i32 = arith.constant 0 : i32
    %c0_i32_0 = arith.constant 0 : i32
    %c0_i32_1 = arith.constant 0 : i32
    return %c0_i32, %c0_i32_0 : i32, i32
  }
  func.func @transform_8(%arg0: i32) -> (i32, i32) {
    %c0_i32 = arith.constant 0 : i32
    %c0_i32_0 = arith.constant 0 : i32
    %c0_i32_1 = arith.constant 0 : i32
    return %c0_i32, %c0_i32_0 : i32, i32
  }
  func.func @transform_9(%arg0: i32) -> (i32, i32) {
    %c0_i32 = arith.constant 0 : i32
    %c0_i32_0 = arith.constant 0 : i32
    %c0_i32_1 = arith.constant 0 : i32
    return %c0_i32, %c0_i32_0 : i32, i32
  }
  func.func @transform_10(%arg0: i32) -> (i32, i32) {
    %c0_i32 = arith.constant 0 : i32
    %c0_i32_0 = arith.constant 0 : i32
    %c0_i32_1 = arith.constant 0 : i32
    return %c0_i32, %c0_i32_0 : i32, i32
  }
  func.func @transform_11(%arg0: i32) -> (i32, i32) {
    %c0_i32 = arith.constant 0 : i32
    %c0_i32_0 = arith.constant 0 : i32
    %c0_i32_1 = arith.constant 0 : i32
    return %c0_i32, %c0_i32_0 : i32, i32
  }
  func.func @transform_12(%arg0: i32) -> (i32, i32) {
    %c0_i32 = arith.constant 0 : i32
    %c0_i32_0 = arith.constant 0 : i32
    %c0_i32_1 = arith.constant 0 : i32
    return %c0_i32, %c0_i32_0 : i32, i32
  }
  func.func @transform_13(%arg0: i32) -> (i32, i32) {
    %c0_i32 = arith.constant 0 : i32
    %c0_i32_0 = arith.constant 0 : i32
    return %arg0, %c0_i32 : i32, i32
  }
}

</mosaic_0001>

<bundles_post_ra>
// kernel: pcnet_forward.1
= control target key start
LH: loop header
LB: loop body
LE: loop exit
PB: predicated region body
PF: predicated region fallthrough
CT: control target
= control target key end

     0   :  { %18 = vsyncpa [#allocation3], 0  ;;  %s11610_s0 = inlined_call_operand.vmem [shape: bf16[32,1024], index: 0, kind: input, shape index: {}]   ;;  %s11611_s1 = inlined_call_operand.vmem [shape: bf16[32,768], index: 1, kind: input, shape index: {}]   ;;  %s11612_s2 = inlined_call_operand.hbm [shape: bf16[1024,128], index: 2, kind: input, shape index: {}]   ;;  %s11613_s3 = inlined_call_operand.hbm [shape: bf16[768,128], index: 3, kind: input, shape index: {}]   ;;  %s11614_s4 = inlined_call_operand.hbm [shape: f32[1,128], index: 4, kind: input, shape index: {}]   ;;  %s11615_s5 = inlined_call_operand.hbm [shape: bf16[128,1024], index: 5, kind: input, shape index: {}]   ;;  %s11616_s6 = inlined_call_operand.hbm [shape: f32[1,1024], index: 6, kind: input, shape index: {}]   ;;  %s11617_s7 = inlined_call_operand.hbm [shape: bf16[1024,1024], index: 7, kind: input, shape index: {}]   ;;  %s11618_s8 = inlined_call_operand.hbm [shape: f32[1,1024], index: 8, kind: input, shape index: {}]   ;;  %s11619_s9 = inlined_call_operand.hbm [shape: bf16[1024,512], index: 9, kind: input, shape index: {}]   ;;  %s11620_s10 = inlined_call_operand.hbm [shape: f32[1,512], index: 10, kind: input, shape index: {}]   ;;  %s11621_s11 = inlined_call_operand.hbm [shape: bf16[512,128], index: 11, kind: input, shape index: {}]   ;;  %s11622_s12 = inlined_call_operand.hbm [shape: f32[1,128], index: 12, kind: input, shape index: {}]   ;;  %s11623_s13 = inlined_call_operand.vmem [shape: f32[32,128], index: 13, kind: output, shape index: {}]  }
   0x1   :  { %19 = vsyncpa [#allocation5], 0 }
   0x2   :  { %20 = vsyncpa [#allocation8], 0 }
   0x3   :  { %21 = vsyncpa [#allocation11], 0 }
   0x4   :  { %22 = vsyncpa [#allocation14], 0 }
   0x5   :  { %23 = vsyncpa [#allocation17], 0  ;;  %s11124_s25 = smov 0  }
   0x6 LB: > { %s11624_s26 = sadd.s32 4294967295, %s11034_s25   ;;  %p8817_p0 = scmp.ge.s32.totalorder %s11034_s25, 1  ;;  %s11034_s25 = sphi %s11124_s25, %s29_s25  }
   0x7   : > { %p343_p1 = scmp.lt.s32.totalorder %s11034_s25, 3  ;;  %p11134_p2 = scmp.eq.s32.totalorder %s11624_s26, 0 }
   0x8   : > { %s11036_s29 = smov [#allocation4]   ;;  %s11037_s14 = smov [#allocation7]  }
   0x9   : > { %s11630_s27 = scalar_select %p11134_p2, 1, 0 }
   0xa   : > { %p11138_p3 = pnand %p8817_p0, %p343_p1  ;;  %s368_s30 = sshll.u32 %s11036_s29, 4  ;;  %s369_s30 = int_to_ptr.vmem [resolvable:$true] %s368_s30 }
   0xb   : > { %s392_s15 = sshll.u32 %s11037_s14, 4  ;;  %s11038_s17 = smov [#allocation10]   ;;  %s11144_s15 = int_to_ptr.vmem [resolvable:$true] %s392_s15 }
   0xc   : > { %s11631_s28 = scalar_select %p11138_p3, 1, 0 }
   0xd   : > { %p10089_p4 = pneg %p11138_p3  ;;  %s11152_s18 = sshll.u32 %s11038_s17, 4  ;;  %s417_s18 = int_to_ptr.vmem [resolvable:$true] %s11152_s18 }
   0xe   : > { %s10729_s20 = scalar_lea.vmem %s369_s30, 6144  ;;  %p10737_p10 = scmp.lt.s32.totalorder %s369_s30, %s369_s30 }
   0xf   : > { %p11148_p5 = pnand %p11134_p2, %p10089_p4  ;;  %p10730_p7 = scmp.ne.s32.totalorder %s369_s30, %s10729_s20 }
  0x10   : > { %p10738_p11 = scmp.lt.s32.totalorder %s10729_s20, %s10729_s20 }
  0x11   : > { %p11156_p6 = pneg %p11148_p5 }
  0x12   : > { %p10739_p12 = por %p10738_p11, %p10737_p10 }
  0x13   : > { %p10732_p8 = pnand %p10730_p7, %p11156_p6 }
  0x15   : > { %p10733_p9 = pneg %p10732_p8 }
  0x17   : > { %p10740_p13 = pnand %p10739_p12, %p10733_p9 }
  0x19   : > { %10743 = shalt.err (!%p10740_p13)
}
  0x1a   : > { %s11625_s21 = smov 64   ;;  %s11040_s22 = smov 4  }
  0x1b   : > { %10095 = dma.hbm_to_vmem [thread:$0]  (!%p11148_p5), %s11613_s3, 6144, %s369_s30, [#allocation5], %s11625_s21, %s11625_s21, %s11040_s22  }
  0x1c   : > { %s10755_s29 = scalar_lea.vmem %s11144_s15, 8192  ;;  %p10763_p7 = scmp.lt.s32.totalorder %s11144_s15, %s11144_s15 }
  0x1d   : > { %p10756_p0 = scmp.ne.s32.totalorder %s11144_s15, %s10755_s29  ;;  %p10764_p8 = scmp.lt.s32.totalorder %s10755_s29, %s10755_s29 }
  0x1f   : > { %p10758_p1 = pnand %p10756_p0, %p11156_p6  ;;  %p10765_p9 = por %p10764_p8, %p10763_p7 }
  0x21   : > { %p10759_p4 = pneg %p10758_p1 }
  0x23   : > { %p10766_p10 = pnand %p10765_p9, %p10759_p4 }
  0x25   : > { %10769 = shalt.err (!%p10766_p10)
}
  0x26   : > { %s11041_s14 = smov 512   ;;  %s11042_s17 = smov 32  }
  0x27   : > { %10101 = dma.hbm_to_vmem [thread:$0]  (!%p11148_p5), %s11615_s5, 8192, %s11144_s15, [#allocation8], %s11041_s14, %s11041_s14, %s11042_s17  }
  0x28   : > { %s11043_s23 = smov [#allocation13]   ;;  %s10781_s26 = scalar_lea.vmem %s417_s18, 65536 }
  0x29   : > { %s440_s24 = sshll.u32 %s11043_s23, 4  ;;  %p10782_p11 = scmp.ne.s32.totalorder %s417_s18, %s10781_s26  ;;  %s441_s24 = int_to_ptr.vmem [resolvable:$true] %s440_s24 }
  0x2a   : > { %p10789_p0 = scmp.lt.s32.totalorder %s417_s18, %s417_s18  ;;  %p10790_p1 = scmp.lt.s32.totalorder %s10781_s26, %s10781_s26 }
  0x2b   : > { %p10784_p12 = pnand %p10782_p11, %p11156_p6 }
  0x2c   : > { %p10791_p4 = por %p10790_p1, %p10789_p0 }
  0x2d   : > { %p10785_p13 = pneg %p10784_p12 }
  0x2f   : > { %p10792_p7 = pnand %p10791_p4, %p10785_p13 }
  0x31   : > { %10795 = shalt.err (!%p10792_p7)
}
  0x32   : > { %10107 = dma.hbm_to_vmem [thread:$0]  (!%p11148_p5), %s11617_s7, 65536, %s417_s18, [#allocation11], %s11041_s14, %s11041_s14, %s11042_s17  }
  0x33   : > { %s10807_s15 = scalar_lea.vmem %s441_s24, 32768  ;;  %p10815_p11 = scmp.lt.s32.totalorder %s441_s24, %s441_s24 }
  0x34   : > { %p10808_p8 = scmp.ne.s32.totalorder %s441_s24, %s10807_s15  ;;  %p10816_p12 = scmp.lt.s32.totalorder %s10807_s15, %s10807_s15 }
  0x36   : > { %p10810_p9 = pnand %p10808_p8, %p11156_p6  ;;  %p10817_p2 = por %p10816_p12, %p10815_p11 }
  0x38   : > { %p10811_p10 = pneg %p10810_p9 }
  0x3a   : > { %p10818_p3 = pnand %p10817_p2, %p10811_p10 }
  0x3c   : > { %10821 = shalt.err (!%p10818_p3)
}
  0x3d   : > { %s11044_s26 = smov 256   ;;  %s11045_s20 = smov 16  }
  0x3e   : > { %10113 = dma.hbm_to_vmem [thread:$0]  (!%p11148_p5), %s11619_s9, 32768, %s441_s24, [#allocation14], %s11044_s26, %s11044_s26, %s11045_s20  }
  0x3f   : > { %s11046_s18 = smov [#allocation16]   ;;  %s11047_s17 = smov [#allocation2]  }
  0x40   : > { %s464_s14 = sshll.u32 %s11046_s18, 4  ;;  %s355_s23 = sshll.u32 %s11047_s17, 4  ;;  %s465_s14 = int_to_ptr.vmem [resolvable:$true] %s464_s14  ;;  %s356_s23 = int_to_ptr.vmem [resolvable:$true] %s355_s23 }
  0x41   : > { %s10833_s29 = scalar_lea.vmem %s465_s14, 4096  ;;  %p10841_p3 = scmp.lt.s32.totalorder %s465_s14, %s465_s14 }
  0x42   : > { %p10834_p13 = scmp.ne.s32.totalorder %s465_s14, %s10833_s29  ;;  %p10842_p1 = scmp.lt.s32.totalorder %s10833_s29, %s10833_s29 }
  0x44   : > { %p10836_p0 = pnand %p10834_p13, %p11156_p6  ;;  %p10843_p4 = por %p10842_p1, %p10841_p3 }
  0x46   : > { %p10837_p2 = pneg %p10836_p0 }
  0x48   : > { %p10844_p7 = pnand %p10843_p4, %p10837_p2 }
  0x4a   : > { %10847 = shalt.err (!%p10844_p7)
}
  0x4b   : > { %s11634_s15 = smov 64   ;;  %s10859_s20 = scalar_lea.vmem %s356_s23, 8192 }
  0x4c   : > { %10119 = dma.hbm_to_vmem [thread:$0]  (!%p11148_p5), %s11621_s11, 4096, %s465_s14, [#allocation17], %s11634_s15, %s11634_s15, %s11040_s22  }
  0x4d   : > { %p10860_p8 = scmp.ne.s32.totalorder %s356_s23, %s10859_s20  ;;  %p10867_p11 = scmp.lt.s32.totalorder %s356_s23, %s356_s23 }
  0x4e   : > { %p10868_p12 = scmp.lt.s32.totalorder %s10859_s20, %s10859_s20 }
  0x4f   : > { %p10862_p9 = pnand %p10860_p8, %p11156_p6 }
  0x50   : > { %p10869_p13 = por %p10868_p12, %p10867_p11 }
  0x51   : > { %p10863_p10 = pneg %p10862_p9 }
  0x53   : > { %p10870_p0 = pnand %p10869_p13, %p10863_p10 }
  0x55   : > { %10873 = shalt.err (!%p10870_p0)
}
  0x56   : > { %10092 = dma.hbm_to_vmem [thread:$0]  (!%p11148_p5), %s11612_s2, 8192, %s356_s23, [#allocation3], %s11634_s15, %s11634_s15, %s11040_s22  }
  0x57   : > { %s11048_s18 = smov [#allocation6]   ;;  %s11049_s17 = smov [#allocation9]  }
  0x58   : > { %s382_s14 = sshll.u32 %s11048_s18, 4  ;;  %s406_s29 = sshll.u32 %s11049_s17, 4  ;;  %s383_s14 = int_to_ptr.vmem [resolvable:$true] %s382_s14  ;;  %s407_s29 = int_to_ptr.vmem [resolvable:$true] %s406_s29 }
  0x59   : > { %s10885_s24 = scalar_lea.vmem %s383_s14, 16  ;;  %s10892_s26 = scalar_lea.vmem %s383_s14, 32 }
  0x5a   : > { %p10886_p2 = scmp.ne.s32.totalorder %s383_s14, %s10885_s24  ;;  %p10893_p4 = scmp.lt.s32.totalorder %s383_s14, %s383_s14 }
  0x5b   : > { %p10894_p7 = scmp.lt.s32.totalorder %s10892_s26, %s10885_s24 }
  0x5c   : > { %p10888_p3 = pnand %p10886_p2, %p11156_p6 }
  0x5d   : > { %p10895_p8 = por %p10894_p7, %p10893_p4 }
  0x5e   : > { %p10889_p1 = pneg %p10888_p3 }
  0x60   : > { %p10896_p9 = pnand %p10895_p8, %p10889_p1 }
  0x62   : > { %10899 = shalt.err (!%p10896_p9)
}
  0x63   : > { %10098 = dma.hbm_to_vmem [thread:$0]  (!%p11148_p5), %s11614_s4, 16, %s383_s14, [#allocation5]  }
  0x64   : > { %s10911_s23 = scalar_lea.vmem %s407_s29, 128  ;;  %p10919_p13 = scmp.lt.s32.totalorder %s407_s29, %s407_s29 }
  0x65   : > { %p10912_p10 = scmp.ne.s32.totalorder %s407_s29, %s10911_s23  ;;  %p10920_p0 = scmp.lt.s32.totalorder %s10911_s23, %s10911_s23 }
  0x67   : > { %p10914_p11 = pnand %p10912_p10, %p11156_p6  ;;  %p10921_p2 = por %p10920_p0, %p10919_p13 }
  0x69   : > { %p10915_p12 = pneg %p10914_p11 }
  0x6b   : > { %p10922_p3 = pnand %p10921_p2, %p10915_p12 }
  0x6d   : > { %10925 = shalt.err (!%p10922_p3)
}
  0x6e   : > { %10104 = dma.hbm_to_vmem [thread:$0]  (!%p11148_p5), %s11616_s6, 128, %s407_s29, [#allocation8]  }
  0x6f   : > { %s11050_s21 = smov [#allocation12]   ;;  %s11051_s14 = smov [#allocation15]  }
  0x70   : > { %s430_s18 = sshll.u32 %s11050_s21, 4  ;;  %s454_s17 = sshll.u32 %s11051_s14, 4  ;;  %s431_s18 = int_to_ptr.vmem [resolvable:$true] %s430_s18  ;;  %s455_s17 = int_to_ptr.vmem [resolvable:$true] %s454_s17 }
  0x71   : > { %s10937_s24 = scalar_lea.vmem %s431_s18, 128  ;;  %p10945_p8 = scmp.lt.s32.totalorder %s431_s18, %s431_s18 }
  0x72   : > { %p10938_p1 = scmp.ne.s32.totalorder %s431_s18, %s10937_s24  ;;  %p10946_p9 = scmp.lt.s32.totalorder %s10937_s24, %s10937_s24 }
  0x74   : > { %p10940_p4 = pnand %p10938_p1, %p11156_p6  ;;  %p10947_p10 = por %p10946_p9, %p10945_p8 }
  0x76   : > { %p10941_p7 = pneg %p10940_p4 }
  0x78   : > { %p10948_p11 = pnand %p10947_p10, %p10941_p7 }
  0x7a   : > { %10951 = shalt.err (!%p10948_p11)
}
  0x7b   : > { %10110 = dma.hbm_to_vmem [thread:$0]  (!%p11148_p5), %s11618_s8, 128, %s431_s18, [#allocation11]  }
  0x7c   : > { %s10963_s29 = scalar_lea.vmem %s455_s17, 64  ;;  %p10971_p2 = scmp.lt.s32.totalorder %s455_s17, %s455_s17 }
  0x7d   : > { %p10964_p12 = scmp.ne.s32.totalorder %s455_s17, %s10963_s29  ;;  %p10972_p3 = scmp.lt.s32.totalorder %s10963_s29, %s10963_s29 }
  0x7f   : > { %p10966_p13 = pnand %p10964_p12, %p11156_p6  ;;  %p10973_p1 = por %p10972_p3, %p10971_p2 }
  0x81   : > { %p10967_p0 = pneg %p10966_p13 }
  0x83   : > { %p10974_p4 = pnand %p10973_p1, %p10967_p0 }
  0x85   : > { %10977 = shalt.err (!%p10974_p4)
}
  0x86   : > { %10116 = dma.hbm_to_vmem [thread:$0]  (!%p11148_p5), %s11620_s10, 64, %s455_s17, [#allocation14]  }
  0x87   : > { %s11052_s15 = smov [#allocation18]  }
  0x88   : > { %s478_s30 = sshll.u32 %s11052_s15, 4  ;;  %s479_s30 = int_to_ptr.vmem [resolvable:$true] %s478_s30 }
  0x89   : > { %s10989_s21 = scalar_lea.vmem %s479_s30, 16  ;;  %s10996_s18 = scalar_lea.vmem %s479_s30, 32 }
  0x8a   : > { %p10990_p7 = scmp.ne.s32.totalorder %s479_s30, %s10989_s21  ;;  %p10997_p10 = scmp.lt.s32.totalorder %s479_s30, %s479_s30 }
  0x8b   : > { %p10998_p11 = scmp.lt.s32.totalorder %s10996_s18, %s10989_s21 }
  0x8c   : > { %p10992_p8 = pnand %p10990_p7, %p11156_p6 }
  0x8d   : > { %p10999_p12 = por %p10998_p11, %p10997_p10 }
  0x8e   : > { %p10993_p9 = pneg %p10992_p8 }
  0x90   : > { %p11000_p13 = pnand %p10999_p12, %p10993_p9 }
  0x92   : > { %11003 = shalt.err (!%p11000_p13)
}
  0x93   : > { %10122 = dma.hbm_to_vmem [thread:$0]  (!%p11148_p5), %s11622_s12, 16, %s479_s30, [#allocation17]  }
  0x94   : > { %p11635_p0 = scmp.ne.s32.totalorder %s11631_s28, 0 }
  0x95   : > { %p11636_p2 = scmp.ne.s32.totalorder (!%p11635_p0), %s11630_s27, 0 }
  0x96   : > { %511 = sbr.rel (%p11635_p0) target bundleno = 2062 (0x80e), region = 72 }
  0x9b   : > { %11009 = dma.done.wait (%p11636_p2), [#allocation3], 8192  }
  0x9c   : > { %11011 = vsyncadd (%p11636_p2), [#allocation3], 4294959104 }
  0x9d   : > { %11013 = dma.done.wait (%p11636_p2), [#allocation5], 6160  }
  0x9e   : > { %11015 = vsyncadd (%p11636_p2), [#allocation5], 4294961136 }
  0x9f   : > { %11017 = dma.done.wait (%p11636_p2), [#allocation8], 8320  }
  0xa0   : > { %11019 = vsyncadd (%p11636_p2), [#allocation8], 4294958976 }
  0xa1   : > { %11021 = dma.done.wait (%p11636_p2), [#allocation11], 65664  }
  0xa2   : > { %11023 = vsyncadd (%p11636_p2), [#allocation11], 4294901632 }
  0xa3   : > { %11025 = dma.done.wait (%p11636_p2), [#allocation14], 32832  }
  0xa4   : > { %11027 = vsyncadd (%p11636_p2), [#allocation14], 4294934464 }
  0xa5   : > { %11029 = dma.done.wait (%p11636_p2), [#allocation17], 4112  }
  0xa6   : > { %11031 = vsyncadd (%p11636_p2), [#allocation17], 4294963184  ;;  %v10172_v0 = vld [vmem:[#allocation4 + $0x78] sm:$0xff]   ;;  %v10176_v4 = vld [vmem:[#allocation4 + $0x70] sm:$0xff]   ;;  %s11637_s27 = sadd.s32 4294967295, %s11034_s25  }
  0xa7   : > { %v10173_v1 = vld [vmem:[#allocation4 + $0xf8] sm:$0xff]   ;;  %9846 = vmatprep.subr.bf16.mxu0 %v10172_v0  ;;  %v10177_v5 = vld [vmem:[#allocation4 + $0xf0] sm:$0xff]   ;;  %v10180_v8 = vld [vmem:[#allocation4 + $0x68] sm:$0xff]   ;;  %s8842_s28 = sshll.u32 %s11637_s27, 1 }
  0xa8   : > { %v10174_v2 = vld [vmem:[#allocation4 + $0x38] sm:$0xff]   ;;  %9868 = vmatprep.subr.bf16.mxu1 %v10173_v1  ;;  %v10178_v6 = vld [vmem:[#allocation4 + $0x30] sm:$0xff]   ;;  %v10181_v9 = vld [vmem:[#allocation4 + $0xe8] sm:$0xff]   ;;  %p603_p5 = scmp.lt.s32.totalorder %s8842_s28, 3 }
  0xa9   : > { %v10175_v3 = vld [vmem:[#allocation4 + $0xb8] sm:$0xff]   ;;  %9847 = vmatpush3.bf16.msra.mxu0 %v10174_v2  ;;  %v10179_v7 = vld [vmem:[#allocation4 + $0xb0] sm:$0xff]   ;;  %v10182_v10 = vld [vmem:[#allocation4 + $0x28] sm:$0xff]  }
  0xaa   : > { %9869 = vmatpush3.bf16.msra.mxu1 %v10175_v3  ;;  %9848 = vmatprep.subr.bf16.mxu0 %v10176_v4  ;;  %v10183_v11 = vld [vmem:[#allocation4 + $0xa8] sm:$0xff]   ;;  %v10184_v12 = vld [vmem:[#allocation4 + $0x60] sm:$0xff]   ;;  %v10188_v16 = vld [vmem:[#allocation4 + $0x58] sm:$0xff]   ;;  %s11639_s28 = smov (!%p603_p5, %s8842_s28), 3 }
  0xab   : > { %9870 = vmatprep.subr.bf16.mxu1 %v10177_v5  ;;  %v10185_v13 = vld [vmem:[#allocation4 + $0xe0] sm:$0xff]   ;;  %v10189_v17 = vld [vmem:[#allocation4 + $0xd8] sm:$0xff]   ;;  %v10192_v20 = vld [vmem:[#allocation4 + $0x50] sm:$0xff]   ;;  %s10044_s16 = smul.u32 24, %s11639_s28  ;;  %s9845_s20 = sshll.u32 %s11639_s28, 5 }
  0xac   : > { %v10186_v14 = vld [vmem:[#allocation4 + $0x20] sm:$0xff]   ;;  %v10190_v18 = vld [vmem:[#allocation4 + $0x18] sm:$0xff]   ;;  %v10193_v21 = vld [vmem:[#allocation4 + $0xd0] sm:$0xff]   ;;  %s11296_s23 = scalar_lea.vmem %s11610_s0, %s9845_s20  ;;  %s8848_s15 = sshll.u32 %s11639_s28, 3 }
  0xad   : > { %9849 = vmatpush3.bf16.msra.mxu0 %v10178_v6  ;;  %v10187_v15 = vld [vmem:[#allocation4 + $0xa0] sm:$0xff]   ;;  %v10191_v19 = vld [vmem:[#allocation4 + $0x98] sm:$0xff]   ;;  %v10194_v22 = vld [vmem:[#allocation4 + $0x10] sm:$0xff]   ;;  %s11286_s26 = scalar_lea.vmem %s11611_s1, %s10044_s16  ;;  %s620_s18 = scalar_lea.vmem %s11623_s13, %s8848_s15 }
  0xae   : > { %9871 = vmatpush3.bf16.msra.mxu1 %v10179_v7  ;;  %9850 = vmatprep.subr.bf16.mxu0 %v10180_v8  ;;  %v10195_v23 = vld [vmem:[#allocation4 + $0x90] sm:$0xff]   ;;  %v10196_v24 = vld [vmem:[#allocation4 + $0x48] sm:$0xff]   ;;  %v10200_v28 = vld [vmem:[#allocation4 + $0x40] sm:$0xff]  }
  0xaf   : > { %9872 = vmatprep.subr.bf16.mxu1 %v10181_v9  ;;  %v10197_v25 = vld [vmem:[#allocation4 + $0xc8] sm:$0xff]   ;;  %v10201_v29 = vld [vmem:[#allocation4 + $0xc0] sm:$0xff]   ;;  %v10210_v36 = vld [vmem:[#allocation4 + $0x178] sm:$0xff]  }
  0xb0   : > { %v10198_v26 = vld [vmem:[#allocation4 + $0x8] sm:$0xff]   ;;  %v10202_v30 = vld [vmem:[#allocation4] sm:$0xff]   ;;  %v10211_v37 = vld [vmem:[#allocation4 + $0x138] sm:$0xff]  }
  0xb1   : > { %9851 = vmatpush3.bf16.msra.mxu0 %v10182_v10  ;;  %v10199_v27 = vld [vmem:[#allocation4 + $0x88] sm:$0xff]   ;;  %v10203_v31 = vld [vmem:[#allocation4 + $0x80] sm:$0xff]   ;;  %v10212_v38 = vld [vmem:[#allocation2 + $0x78] sm:$0xff]  }
  0xb2   : > { %9873 = vmatpush3.bf16.msra.mxu1 %v10183_v11  ;;  %9852 = vmatprep.subr.bf16.mxu0 %v10184_v12  ;;  %v10204_v32 = vld [vmem:[%s11286_s26] ss:$24 sps:$4 sm:$0xff]   ;;  %v10206_v33 = vld [vmem:[%s11286_s26 + $0x4] ss:$24 sps:$4 sm:$0xff]   ;;  %v10214_v40 = vld [vmem:[#allocation4 + $0x170] sm:$0xff]  }
  0xb3   : > { %9874 = vmatprep.subr.bf16.mxu1 %v10185_v13  ;;  %v10207_v34 = vld [vmem:[%s11286_s26 + $0x8] ss:$24 sps:$4 sm:$0xff]   ;;  %v10209_v35 = vld [vmem:[%s11286_s26 + $0xc] ss:$24 sps:$4 sm:$0xff]   ;;  %1211 = vmatprep.mubr.bf16.mxu0 %v10206_v33  ;;  %v10213_v39 = vld [vmem:[#allocation2 + $0x38] sm:$0xff]  }
  0xb4   : > { %1252 = vmatprep.mubr.bf16.mxu1 %v10209_v35  ;;  %v10215_v41 = vld [vmem:[#allocation4 + $0x130] sm:$0xff]   ;;  %v10218_v44 = vld [vmem:[#allocation4 + $0x168] sm:$0xff]   ;;  %v10222_v48 = vld [vmem:[#allocation4 + $0x160] sm:$0xff]  }
  0xb5   : > { %9853 = vmatpush3.bf16.msra.mxu0 %v10186_v14  ;;  %v10216_v42 = vld [vmem:[#allocation2 + $0x70] sm:$0xff]   ;;  %v10219_v45 = vld [vmem:[#allocation4 + $0x128] sm:$0xff]   ;;  %v10223_v49 = vld [vmem:[#allocation4 + $0x120] sm:$0xff]  }
  0xb6   : > { %9875 = vmatpush3.bf16.msra.mxu1 %v10187_v15  ;;  %9854 = vmatprep.subr.bf16.mxu0 %v10188_v16  ;;  %v10217_v43 = vld [vmem:[#allocation2 + $0x30] sm:$0xff]   ;;  %v10220_v46 = vld [vmem:[#allocation2 + $0x68] sm:$0xff]   ;;  %v10224_v50 = vld [vmem:[#allocation2 + $0x60] sm:$0xff]  }
  0xb7   : > { %9876 = vmatprep.subr.bf16.mxu1 %v10189_v17  ;;  %v10221_v47 = vld [vmem:[#allocation2 + $0x28] sm:$0xff]   ;;  %v10225_v51 = vld [vmem:[#allocation2 + $0x20] sm:$0xff]   ;;  %v10226_v52 = vld [vmem:[#allocation4 + $0x158] sm:$0xff]  }
  0xb8   : > { %v10227_v53 = vld [vmem:[#allocation4 + $0x118] sm:$0xff]   ;;  %v10230_v56 = vld [vmem:[#allocation4 + $0x150] sm:$0xff]   ;;  %v10234_v60 = vld [vmem:[#allocation4 + $0x148] sm:$0xff]  }
  0xb9   : > { %9855 = vmatpush3.bf16.msra.mxu0 %v10190_v18  ;;  %v10228_v54 = vld [vmem:[#allocation2 + $0x58] sm:$0xff]   ;;  %v10231_v57 = vld [vmem:[#allocation4 + $0x110] sm:$0xff]   ;;  %v10235_v61 = vld [vmem:[#allocation4 + $0x108] sm:$0xff]  }
  0xba   : > { %9877 = vmatpush3.bf16.msra.mxu1 %v10191_v19  ;;  %9856 = vmatprep.subr.bf16.mxu0 %v10192_v20  ;;  %v10229_v55 = vld [vmem:[#allocation2 + $0x18] sm:$0xff]   ;;  %v10232_v58 = vld [vmem:[#allocation2 + $0x50] sm:$0xff]   ;;  %v10236_v62 = vld [vmem:[#allocation2 + $0x48] sm:$0xff]  }
  0xbb   : > { %9878 = vmatprep.subr.bf16.mxu1 %v10193_v21  ;;  %v10233_v59 = vld [vmem:[#allocation2 + $0x10] sm:$0xff]   ;;  %v10237_v63 = vld [vmem:[#allocation2 + $0x8] sm:$0xff]   ;;  %v10238_v0 = vld [vmem:[#allocation4 + $0x140] sm:$0xff]  }
  0xbc   : > { %v10239_v1 = vld [vmem:[#allocation4 + $0x100] sm:$0xff]   ;;  %v10241_v3 = vld [vmem:[%s11286_s26 + $0x10] ss:$24 sps:$4 sm:$0xff]   ;;  %v10243_v4 = vld [vmem:[%s11286_s26 + $0x14] ss:$24 sps:$4 sm:$0xff]  }
  0xbd   : > { %9857 = vmatpush3.bf16.msra.mxu0 %v10194_v22  ;;  %v10240_v2 = vld [vmem:[#allocation2 + $0x40] sm:$0xff]   ;;  %v10245_v6 = vld [vmem:[#allocation2 + $0xf8] sm:$0xff]   ;;  %v10249_v14 = vld [vmem:[#allocation2 + $0xf0] sm:$0xff]  }
  0xbe   : > { %9879 = vmatpush3.bf16.msra.mxu1 %v10195_v23  ;;  %9858 = vmatprep.subr.bf16.mxu0 %v10196_v24  ;;  %v10244_v5 = vld [vmem:[#allocation2] sm:$0xff]   ;;  %v10246_v11 = vld [vmem:[#allocation2 + $0xb8] sm:$0xff]   ;;  %v10250_v15 = vld [vmem:[#allocation2 + $0xb0] sm:$0xff]  }
  0xbf   : > { %9880 = vmatprep.subr.bf16.mxu1 %v10197_v25  ;;  %v623_v7 = vld [vmem:[%s11296_s23] sm:$0xff]  ;;  %v10247_v12 = vld [vmem:[#allocation2 + $0x178] sm:$0xff]   ;;  %v10251_v16 = vld [vmem:[#allocation2 + $0x170] sm:$0xff]  }
  0xc0   : > { %v627_v8 = vld [vmem:[%s11296_s23 + $0x20] sm:$0xff]  ;;  %v10248_v13 = vld [vmem:[#allocation2 + $0x138] sm:$0xff]   ;;  %v10252_v17 = vld [vmem:[#allocation2 + $0x130] sm:$0xff]  }
  0xc1   : > { %9859 = vmatpush3.bf16.msra.mxu0 %v10198_v26  ;;  %v8903_v9 = vcombine.low %v623_v7, %v627_v8  ;;  %v8904_v10 = vcombine.high %v623_v7, %v627_v8  ;;  %v10253_v18 = vld [vmem:[#allocation2 + $0xe8] sm:$0xff]   ;;  %v10257_v22 = vld [vmem:[#allocation2 + $0xe0] sm:$0xff]   ;;  %v10261_v26 = vld [vmem:[#allocation2 + $0xd8] sm:$0xff]  }
  0xc2   : > { %9881 = vmatpush3.bf16.msra.mxu1 %v10199_v27  ;;  %9860 = vmatprep.subr.bf16.mxu0 %v10200_v28  ;;  %v10254_v19 = vld [vmem:[#allocation2 + $0xa8] sm:$0xff]   ;;  %v10258_v23 = vld [vmem:[#allocation2 + $0xa0] sm:$0xff]   ;;  %v10262_v27 = vld [vmem:[#allocation2 + $0x98] sm:$0xff]  }
  0xc3   : > { %9882 = vmatprep.subr.bf16.mxu1 %v10201_v29  ;;  %v10255_v20 = vld [vmem:[#allocation2 + $0x168] sm:$0xff]   ;;  %v10259_v24 = vld [vmem:[#allocation2 + $0x160] sm:$0xff]   ;;  %v10263_v28 = vld [vmem:[#allocation2 + $0x158] sm:$0xff]  }
  0xc4   : > { %v10256_v21 = vld [vmem:[#allocation2 + $0x128] sm:$0xff]   ;;  %v10260_v25 = vld [vmem:[#allocation2 + $0x120] sm:$0xff]   ;;  %v10264_v29 = vld [vmem:[#allocation2 + $0x118] sm:$0xff]  }
  0xc5   : > { %9861 = vmatpush3.bf16.msra.mxu0 %v10202_v30  ;;  %v10265_v30 = vld [vmem:[#allocation2 + $0xd0] sm:$0xff]   ;;  %v10270_v35 = vld [vmem:[#allocation2 + $0x88] sm:$0xff]  }
  0xc6   : > { %9883 = vmatpush3.bf16.msra.mxu1 %v10203_v31  ;;  %9890 = vmatprep.subr.bf16.mxu0 %v10210_v36  ;;  %v10266_v31 = vld [vmem:[#allocation2 + $0x90] sm:$0xff]   ;;  %v10271_v36 = vld [vmem:[#allocation2 + $0x148] sm:$0xff]  }
  0xc7   : > { %9912 = vmatprep.subr.bf16.mxu1 %v10212_v38  ;;  %v10268_v33 = vld [vmem:[#allocation2 + $0x110] sm:$0xff]   ;;  %v10273_v38 = vld [vmem:[#allocation2 + $0xc0] sm:$0xff]  }
  0xc8   : > { %1212 = vmatmul.mubr.bf16.vlgmr.msra.gmra.mxu0 %v10204_v32  ;;  %v10267_v32 = vld [vmem:[#allocation2 + $0x150] sm:$0xff]   ;;  %v1962_v7 = vld [vmem:[#allocation7 + $0x1e0] sm:$0xff] }
  0xc9   : > { %1253 = vmatmul.mubr.bf16.vlgmr.msra.gmra.mxu1 %v10207_v34  ;;  %9891 = vmatpush3.bf16.msra.mxu0 %v10211_v37  ;;  %v10269_v34 = vld [vmem:[#allocation2 + $0xc8] sm:$0xff]  }
  0xca   : > { %9913 = vmatpush3.bf16.msra.mxu1 %v10213_v39  ;;  %9892 = vmatprep.subr.bf16.mxu0 %v10214_v40  ;;  %v10272_v37 = vld [vmem:[#allocation2 + $0x108] sm:$0xff]   ;;  %v10274_v39 = vld [vmem:[#allocation2 + $0x80] sm:$0xff]  }
  0xcb   : > { %9914 = vmatprep.subr.bf16.mxu1 %v10216_v42  ;;  %1293 = vmatprep.mubr.bf16.mxu0 %v10243_v4  ;;  %v10275_v40 = vld [vmem:[#allocation2 + $0x140] sm:$0xff]   ;;  %v628_v42 = vld [vmem:[%s11296_s23 + $0x28] sm:$0xff] }
  0xcc   : > { %1758 = vmatprep.mubr.bf16.mxu1 %v8904_v10  ;;  %v10292_v4 = vld [vmem:[#allocation2 + $0x180] sm:$0xff]   ;;  %v1959_v8 = vld [vmem:[#allocation7 + $0x1c8] sm:$0xff] }
  0xcd   : > { %9893 = vmatpush3.bf16.msra.mxu0 %v10215_v41  ;;  %v624_v41 = vld [vmem:[%s11296_s23 + $0x8] sm:$0xff] }
  0xce   : > { %9915 = vmatpush3.bf16.msra.mxu1 %v10217_v43  ;;  %9894 = vmatprep.subr.bf16.mxu0 %v10218_v44  ;;  %v8905_v43 = vcombine.low %v624_v41, %v628_v42  ;;  %v8906_v44 = vcombine.high %v624_v41, %v628_v42  ;;  %v1931_v42 = vld [vmem:[#allocation7 + $0xe8] sm:$0xff] }
  0xcf   : > { %9916 = vmatprep.subr.bf16.mxu1 %v10220_v46  ;;  %v10277_v46 = vld [vmem:[#allocation2 + $0x1f8] sm:$0xff]  }
  0xd1   : > { %9895 = vmatpush3.bf16.msra.mxu0 %v10219_v45  ;;  %v10276_v45 = vld [vmem:[#allocation2 + $0x100] sm:$0xff]  }
  0xd2   : > { %9917 = vmatpush3.bf16.msra.mxu1 %v10221_v47  ;;  %9896 = vmatprep.subr.bf16.mxu0 %v10222_v48  ;;  %v625_v47 = vld [vmem:[%s11296_s23 + $0x10] sm:$0xff] }
  0xd3   : > { %9918 = vmatprep.subr.bf16.mxu1 %v10224_v50  ;;  %v629_v48 = vld [vmem:[%s11296_s23 + $0x30] sm:$0xff] }
  0xd4   : > { %v8908_v50 = vcombine.high %v625_v47, %v629_v48 }
  0xd5   : > { %9897 = vmatpush3.bf16.msra.mxu0 %v10223_v49  ;;  %v8907_v49 = vcombine.low %v625_v47, %v629_v48  ;;  %v1922_v47 = vld [vmem:[#allocation7 + $0xa0] sm:$0xff]  ;;  %v1919_v48 = vld [vmem:[#allocation7 + $0x88] sm:$0xff] }
  0xd6   : > { %9919 = vmatpush3.bf16.msra.mxu1 %v10225_v51  ;;  %9898 = vmatprep.subr.bf16.mxu0 %v10226_v52  ;;  %v10278_v51 = vld [vmem:[#allocation2 + $0x1b8] sm:$0xff]   ;;  %v10279_v52 = vld [vmem:[#allocation2 + $0x1f0] sm:$0xff]  }
  0xd7   : > { %9920 = vmatprep.subr.bf16.mxu1 %v10228_v54  ;;  %v10281_v54 = vld [vmem:[#allocation2 + $0x1e8] sm:$0xff]  }
  0xd9   : > { %9899 = vmatpush3.bf16.msra.mxu0 %v10227_v53  ;;  %v10280_v53 = vld [vmem:[#allocation2 + $0x1b0] sm:$0xff]  }
  0xda   : > { %9921 = vmatpush3.bf16.msra.mxu1 %v10229_v55  ;;  %9900 = vmatprep.subr.bf16.mxu0 %v10230_v56  ;;  %v10282_v55 = vld [vmem:[#allocation2 + $0x1a8] sm:$0xff]   ;;  %v10283_v56 = vld [vmem:[#allocation2 + $0x1e0] sm:$0xff]  }
  0xdb   : > { %9922 = vmatprep.subr.bf16.mxu1 %v10232_v58  ;;  %v10285_v58 = vld [vmem:[#allocation2 + $0x1d8] sm:$0xff]  }
  0xdd   : > { %9901 = vmatpush3.bf16.msra.mxu0 %v10231_v57  ;;  %v10284_v57 = vld [vmem:[#allocation2 + $0x1a0] sm:$0xff]  }
  0xde   : > { %9923 = vmatpush3.bf16.msra.mxu1 %v10233_v59  ;;  %9902 = vmatprep.subr.bf16.mxu0 %v10234_v60  ;;  %v10286_v59 = vld [vmem:[#allocation2 + $0x198] sm:$0xff]   ;;  %v10287_v60 = vld [vmem:[#allocation2 + $0x1d0] sm:$0xff]  }
  0xdf   : > { %9924 = vmatprep.subr.bf16.mxu1 %v10236_v62  ;;  %v630_v62 = vld [vmem:[%s11296_s23 + $0x38] sm:$0xff] }
  0xe1   : > { %9903 = vmatpush3.bf16.msra.mxu0 %v10235_v61  ;;  %v626_v61 = vld [vmem:[%s11296_s23 + $0x18] sm:$0xff] }
  0xe2   : > { %9925 = vmatpush3.bf16.msra.mxu1 %v10237_v63  ;;  %9904 = vmatprep.subr.bf16.mxu0 %v10238_v0  ;;  %v10288_v63 = vld [vmem:[#allocation2 + $0x190] sm:$0xff]   ;;  %v8910_v0 = vcombine.high %v626_v61, %v630_v62 }
  0xe3   : > { %9926 = vmatprep.subr.bf16.mxu1 %v10240_v2  ;;  %v10290_v2 = vld [vmem:[#allocation2 + $0x188] sm:$0xff]  }
  0xe5   : > { %9905 = vmatpush3.bf16.msra.mxu0 %v10239_v1  ;;  %v10289_v1 = vld [vmem:[#allocation2 + $0x1c8] sm:$0xff]  }
  0xe6   : > { %9927 = vmatpush3.bf16.msra.mxu1 %v10244_v5  ;;  %9934 = vmatprep.subr.bf16.mxu0 %v10245_v6  ;;  %v8909_v5 = vcombine.low %v626_v61, %v630_v62  ;;  %v1958_v6 = vld [vmem:[#allocation7 + $0x1c0] sm:$0xff] }
  0xe7   : > { %9956 = vmatprep.subr.bf16.mxu1 %v10247_v12  ;;  %v9033_v10 = vcombine.high %v1958_v6, %v1962_v7  ;;  %v1950_v12 = vld [vmem:[#allocation7 + $0x180] sm:$0xff] }
  0xe8   : > { %1294 = vmatmul.mubr.bf16.vlgmr.msra.gmra.mxu0 %v10241_v3  ;;  %v10291_v3 = vld [vmem:[#allocation2 + $0x1c0] sm:$0xff]  }
  0xe9   : > { %9935 = vmatpush3.bf16.msra.mxu0 %v10246_v11  ;;  %1759 = vmatmul.mubr.bf16.vlgmr.msra.gmra.mxu1 %v8903_v9  ;;  %v9032_v9 = vcombine.low %v1958_v6, %v1962_v7  ;;  %v1963_v11 = vld [vmem:[#allocation7 + $0x1e8] sm:$0xff]  ;;  %v1902_v62 = vld [vmem:[#allocation7] sm:$0xff]  ;;  %v11308_v6 = vld [vmem:[#allocation7 + $0x1d0] sm:$0xff] }
  0xea   : > { %9957 = vmatpush3.bf16.msra.mxu1 %v10248_v13  ;;  %9936 = vmatprep.subr.bf16.mxu0 %v10249_v14  ;;  %v1954_v13 = vld [vmem:[#allocation7 + $0x1a0] sm:$0xff]  ;;  %v9034_v14 = vcombine.low %v1959_v8, %v1963_v11  ;;  %v11310_v7 = vld [vmem:[#allocation7 + $0x1f0] sm:$0xff] }
  0xeb   : > { %9958 = vmatprep.subr.bf16.mxu1 %v10251_v16  ;;  %1799 = vmatprep.mubr.bf16.mxu0 %v8906_v44  ;;  %v9025_v16 = vcombine.high %v1950_v12, %v1954_v13 }
  0xec   : > { %1840 = vmatprep.mubr.bf16.mxu1 %v8908_v50  ;;  %v1923_v50 = vld [vmem:[#allocation7 + $0xa8] sm:$0xff] }
  0xed   : > { %9937 = vmatpush3.bf16.msra.mxu0 %v10250_v15  ;;  %v9035_v15 = vcombine.high %v1959_v8, %v1963_v11  ;;  %v11312_v8 = vld [vmem:[#allocation7 + $0x1d8] sm:$0xff]  ;;  %v9036_v11 = vcombine.low %v11308_v6, %v11310_v7 }
  0xee   : > { %9959 = vmatpush3.bf16.msra.mxu1 %v10252_v17  ;;  %9938 = vmatprep.subr.bf16.mxu0 %v10253_v18  ;;  %v1951_v17 = vld [vmem:[#allocation7 + $0x188] sm:$0xff] }
  0xef   : > { %9960 = vmatprep.subr.bf16.mxu1 %v10255_v20  ;;  %v1955_v18 = vld [vmem:[#allocation7 + $0x1a8] sm:$0xff] }
  0xf0   : > { %v9027_v20 = vcombine.high %v1951_v17, %v1955_v18 }
  0xf1   : > { %9939 = vmatpush3.bf16.msra.mxu0 %v10254_v19  ;;  %v1942_v19 = vld [vmem:[#allocation7 + $0x140] sm:$0xff] }
  0xf2   : > { %9961 = vmatpush3.bf16.msra.mxu1 %v10256_v21  ;;  %9940 = vmatprep.subr.bf16.mxu0 %v10257_v22  ;;  %v1946_v21 = vld [vmem:[#allocation7 + $0x160] sm:$0xff]  ;;  %v1943_v22 = vld [vmem:[#allocation7 + $0x148] sm:$0xff] }
  0xf3   : > { %9962 = vmatprep.subr.bf16.mxu1 %v10259_v24  ;;  %v9024_v24 = vcombine.low %v1950_v12, %v1954_v13 }
  0xf5   : > { %9941 = vmatpush3.bf16.msra.mxu0 %v10258_v23  ;;  %v1947_v23 = vld [vmem:[#allocation7 + $0x168] sm:$0xff] }
  0xf6   : > { %9963 = vmatpush3.bf16.msra.mxu1 %v10260_v25  ;;  %9942 = vmatprep.subr.bf16.mxu0 %v10261_v26  ;;  %v1934_v25 = vld [vmem:[#allocation7 + $0x100] sm:$0xff] }
  0xf7   : > { %9964 = vmatprep.subr.bf16.mxu1 %v10263_v28  ;;  %v1938_v26 = vld [vmem:[#allocation7 + $0x120] sm:$0xff]  ;;  %v9017_v28 = vcombine.high %v1942_v19, %v1946_v21 }
  0xf9   : > { %9943 = vmatpush3.bf16.msra.mxu0 %v10262_v27  ;;  %v9026_v27 = vcombine.low %v1951_v17, %v1955_v18 }
  0xfa   : > { %9965 = vmatpush3.bf16.msra.mxu1 %v10264_v29  ;;  %9944 = vmatprep.subr.bf16.mxu0 %v10265_v30  ;;  %v1935_v29 = vld [vmem:[#allocation7 + $0x108] sm:$0xff] }
  0xfb   : > { %9966 = vmatprep.subr.bf16.mxu1 %v10267_v32  ;;  %v1939_v30 = vld [vmem:[#allocation7 + $0x128] sm:$0xff]  ;;  %v9016_v32 = vcombine.low %v1942_v19, %v1946_v21 }
  0xfd   : > { %9945 = vmatpush3.bf16.msra.mxu0 %v10266_v31  ;;  %v9019_v31 = vcombine.high %v1943_v22, %v1947_v23 }
  0xfe   : > { %9967 = vmatpush3.bf16.msra.mxu1 %v10268_v33  ;;  %9946 = vmatprep.subr.bf16.mxu0 %v10269_v34  ;;  %v9018_v33 = vcombine.low %v1943_v22, %v1947_v23  ;;  %v9009_v34 = vcombine.high %v1934_v25, %v1938_v26 }
  0xff   : > { %9968 = vmatprep.subr.bf16.mxu1 %v10271_v36  ;;  %v9008_v36 = vcombine.low %v1934_v25, %v1938_v26 }
 0x101   : > { %9947 = vmatpush3.bf16.msra.mxu0 %v10270_v35  ;;  %v9011_v35 = vcombine.high %v1935_v29, %v1939_v30 }
 0x102   : > { %9969 = vmatpush3.bf16.msra.mxu1 %v10272_v37  ;;  %9948 = vmatprep.subr.bf16.mxu0 %v10273_v38  ;;  %v9010_v37 = vcombine.low %v1935_v29, %v1939_v30  ;;  %v1926_v38 = vld [vmem:[#allocation7 + $0xc0] sm:$0xff] }
 0x103   : > { %9970 = vmatprep.subr.bf16.mxu1 %v10275_v40  ;;  %v1927_v40 = vld [vmem:[#allocation7 + $0xc8] sm:$0xff] }
 0x104   : > { %v9002_v44 = vcombine.low %v1927_v40, %v1931_v42 }
 0x105   : > { %9949 = vmatpush3.bf16.msra.mxu0 %v10274_v39  ;;  %v1930_v39 = vld [vmem:[#allocation7 + $0xe0] sm:$0xff] }
 0x106   : > { %9971 = vmatpush3.bf16.msra.mxu1 %v10276_v45  ;;  %9978 = vmatprep.subr.bf16.mxu0 %v10277_v46  ;;  %v9001_v41 = vcombine.high %v1926_v38, %v1930_v39  ;;  %v9003_v45 = vcombine.high %v1927_v40, %v1931_v42  ;;  %v1918_v46 = vld [vmem:[#allocation7 + $0x80] sm:$0xff] }
 0x107   : > { %2328 = vmatprep.subr.bf16.mxu1 %v9033_v10  ;;  %v11316_v10 = vld [vmem:[#allocation7 + $0x1f8] sm:$0xff] }
 0x108   : > { %1800 = vmatmul.mubr.bf16.vlgmr.msra.gmra.mxu0 %v8905_v43  ;;  %v9000_v43 = vcombine.low %v1926_v38, %v1930_v39  ;;  %v9038_v12 = vcombine.low %v11312_v8, %v11316_v10  ;;  %v9039_v13 = vcombine.high %v11312_v8, %v11316_v10 }
 0x109   : > { %9979 = vmatpush3.bf16.msra.mxu0 %v10278_v51  ;;  %1841 = vmatmul.mubr.bf16.vlgmr.msra.gmra.mxu1 %v8907_v49  ;;  %v8993_v49 = vcombine.high %v1918_v46, %v1922_v47  ;;  %v8992_v51 = vcombine.low %v1918_v46, %v1922_v47 }
 0x10a   : > { %9980 = vmatprep.subr.bf16.mxu0 %v10279_v52  ;;  %1881 = vmatprep.mubr.bf16.mxu0 %v8910_v0  ;;  %v8994_v52 = vcombine.low %v1919_v48, %v1923_v50  ;;  %v1903_v0 = vld [vmem:[#allocation7 + $0x8] sm:$0xff] }
 0x10b   : > { %2329 = vmatpush1.bf16.msra.mxu1 %v9032_v9  ;;  %v9037_v9 = vcombine.high %v11308_v6, %v11310_v7 }
 0x10c   : > { %2330 = vmatprep.subr.bf16.mxu1 %v9025_v16 }
 0x10d   : > { %9981 = vmatpush3.bf16.msra.mxu0 %v10280_v53  ;;  %v8995_v53 = vcombine.high %v1919_v48, %v1923_v50 }
 0x10e   : > { %9982 = vmatprep.subr.bf16.mxu0 %v10281_v54  ;;  %v1910_v54 = vld [vmem:[#allocation7 + $0x40] sm:$0xff] }
 0x10f   : > { %2331 = vmatpush1.bf16.msra.mxu1 %v9024_v24 }
 0x110   : > { %2332 = vmatprep.subr.bf16.mxu1 %v9017_v28 }
 0x111   : > { %9983 = vmatpush3.bf16.msra.mxu0 %v10282_v55  ;;  %v1914_v55 = vld [vmem:[#allocation7 + $0x60] sm:$0xff] }
 0x112   : > { %9984 = vmatprep.subr.bf16.mxu0 %v10283_v56  ;;  %v8985_v56 = vcombine.high %v1910_v54, %v1914_v55 }
 0x113   : > { %2333 = vmatpush1.bf16.msra.mxu1 %v9016_v32 }
 0x114   : > { %2334 = vmatprep.subr.bf16.mxu1 %v9009_v34 }
 0x115   : > { %9985 = vmatpush3.bf16.msra.mxu0 %v10284_v57  ;;  %v1911_v57 = vld [vmem:[#allocation7 + $0x48] sm:$0xff] }
 0x116   : > { %9986 = vmatprep.subr.bf16.mxu0 %v10285_v58  ;;  %v1915_v58 = vld [vmem:[#allocation7 + $0x68] sm:$0xff] }
 0x117   : > { %2335 = vmatpush1.bf16.msra.mxu1 %v9008_v36  ;;  %v8987_v61 = vcombine.high %v1911_v57, %v1915_v58 }
 0x118   : > { %2336 = vmatprep.subr.bf16.mxu1 %v9001_v41 }
 0x119   : > { %9987 = vmatpush3.bf16.msra.mxu0 %v10286_v59  ;;  %v8984_v59 = vcombine.low %v1910_v54, %v1914_v55 }
 0x11a   : > { %9988 = vmatprep.subr.bf16.mxu0 %v10287_v60  ;;  %v8986_v60 = vcombine.low %v1911_v57, %v1915_v58 }
 0x11b   : > { %2337 = vmatpush1.bf16.msra.mxu1 %v9000_v43 }
 0x11c   : > { %2338 = vmatprep.subr.bf16.mxu1 %v8993_v49 }
 0x11d   : > { %9989 = vmatpush3.bf16.msra.mxu0 %v10288_v63  ;;  %v1906_v63 = vld [vmem:[#allocation7 + $0x20] sm:$0xff] }
 0x11e   : > { %9990 = vmatprep.subr.bf16.mxu0 %v10289_v1  ;;  %v8977_v1 = vcombine.high %v1902_v62, %v1906_v63 }
 0x11f   : > { %2339 = vmatpush1.bf16.msra.mxu1 %v8992_v51 }
 0x120   : > { %2340 = vmatprep.subr.bf16.mxu1 %v8985_v56 }
 0x121   : > { %9991 = vmatpush3.bf16.msra.mxu0 %v10290_v2  ;;  %v1907_v2 = vld [vmem:[#allocation7 + $0x28] sm:$0xff] }
 0x122   : > { %9992 = vmatprep.subr.bf16.mxu0 %v10291_v3  ;;  %v8976_v3 = vcombine.low %v1902_v62, %v1906_v63 }
 0x123   : > { %2341 = vmatpush1.bf16.msra.mxu1 %v8984_v59 }
 0x124   : > { %2342 = vmatprep.subr.bf16.mxu1 %v8977_v1  ;;  %v8975_v1 = vld [vmem:[#allocation6] ss:$0 sm:$0xff] }
 0x125   : > { %9993 = vmatpush3.bf16.msra.mxu0 %v10292_v4  ;;  %v8978_v4 = vcombine.low %v1903_v0, %v1907_v2 }
 0x126   : > { %2371 = vmatprep.subr.bf16.mxu0 %v9035_v15 }
 0x127   : > { %2343 = vmatpush1.bf16.msra.mxu1 %v8976_v3 }
 0x128   : > { %1882 = vmatmul.mubr.bf16.vlgmr.msra.gmra.mxu0 %v8909_v5  ;;  %v8979_v5 = vcombine.high %v1903_v0, %v1907_v2  ;;  %2414 = vmatprep.subr.bf16.mxu1 %v9037_v9 }
 0x129   : > { %2372 = vmatpush1.bf16.msra.mxu0 %v9034_v14  ;;  %v11053_v14 = vmov 0  }
 0x12a   : > { %2373 = vmatprep.subr.bf16.mxu0 %v9027_v20  ;;  %2360 = vmatprep.mubr.bf16.mxu1 %v11053_v14 }
 0x12b   : > { %2403 = vmatprep.mubr.bf16.mxu0 %v11053_v14  ;;  %10171 = vset.pattern.permute.xlu0 %v11053_v14 }
 0x12d   : > { %2374 = vmatpush1.bf16.msra.mxu0 %v9026_v27 }
 0x12e   : > { %2375 = vmatprep.subr.bf16.mxu0 %v9019_v31 }
 0x131   : > { %2376 = vmatpush1.bf16.msra.mxu0 %v9018_v33 }
 0x132   : > { %2377 = vmatprep.subr.bf16.mxu0 %v9011_v35 }
 0x135   : > { %2378 = vmatpush1.bf16.msra.mxu0 %v9010_v37 }
 0x136   : > { %2379 = vmatprep.subr.bf16.mxu0 %v9003_v45 }
 0x139   : > { %2380 = vmatpush1.bf16.msra.mxu0 %v9002_v44 }
 0x13a   : > { %2381 = vmatprep.subr.bf16.mxu0 %v8995_v53 }
 0x13d   : > { %2382 = vmatpush1.bf16.msra.mxu0 %v8994_v52 }
 0x13e   : > { %2383 = vmatprep.subr.bf16.mxu0 %v8987_v61 }
 0x141   : > { %2384 = vmatpush1.bf16.msra.mxu0 %v8986_v60 }
 0x142   : > { %2385 = vmatprep.subr.bf16.mxu0 %v8979_v5 }
 0x145   : > { %2386 = vmatpush1.bf16.msra.mxu0 %v8978_v4 }
 0x146   : > { %2457 = vmatprep.subr.bf16.mxu0 %v9039_v13 }
 0x188   : > { %v9862_v15 = vpop.f32.mrf.mxu0 }
 0x189   : > { %v9884_v16 = vpop.f32.mrf.mxu1 }
 0x18a   : > { %v9863_v17 = vpop.f32.mrf.mxu0 }
 0x18b   : > { %v9885_v18 = vpop.f32.mrf.mxu1  ;;  %v9864_v32 = vadd.f32 %v9863_v17, %v9862_v15  ;;  %v1952_v15 = vld [vmem:[#allocation7 + $0x190] sm:$0xff]  ;;  %v1953_v17 = vld [vmem:[#allocation7 + $0x198] sm:$0xff] }
 0x18c   : > { %v9865_v19 = vpop.f32.mrf.mxu0  ;;  %v9886_v33 = vadd.f32 %v9885_v18, %v9884_v16  ;;  %v1956_v16 = vld [vmem:[#allocation7 + $0x1b0] sm:$0xff]  ;;  %v1957_v18 = vld [vmem:[#allocation7 + $0x1b8] sm:$0xff] }
 0x18d   : > { %v9887_v20 = vpop.f32.mrf.mxu1 }
 0x18e   : > { %v9866_v21 = vpop.f32.mrf.mxu0  ;;  %v1255_v37 = vadd.f32 %v9886_v33, %v9864_v32  ;;  %v1936_v32 = vld [vmem:[#allocation7 + $0x110] sm:$0xff] }
 0x18f   : > { %v9888_v23 = vpop.f32.mrf.mxu1  ;;  %v9867_v38 = vadd.f32 %v9866_v21, %v9865_v19  ;;  %v1940_v33 = vld [vmem:[#allocation7 + $0x130] sm:$0xff] }
 0x190   : > { %v9889_v39 = vadd.f32 %v9888_v23, %v9887_v20  ;;  %v9031_v23 = vcombine.high %v1953_v17, %v1957_v18  ;;  %v9013_v8 = vcombine.high %v1936_v32, %v1940_v33 }
 0x192   : > { %v1258_v45 = vadd.f32 %v9889_v39, %v9867_v38  ;;  %v9012_v38 = vcombine.low %v1936_v32, %v1940_v33  ;;  %v2556_v33 = vld [vmem:[#allocation10 + $0x100] sm:$0xff] }
 0x1a8   : > { %v9906_v22 = vpop.f32.mrf.mxu0 }
 0x1a9   : > { %v9928_v25 = vpop.f32.mrf.mxu1 }
 0x1aa   : > { %v9907_v24 = vpop.f32.mrf.mxu0 }
 0x1ab   : > { %v9929_v27 = vpop.f32.mrf.mxu1  ;;  %v9908_v36 = vadd.f32 %v9907_v24, %v9906_v22  ;;  %v9029_v22 = vcombine.high %v1952_v15, %v1956_v16  ;;  %v1944_v24 = vld [vmem:[#allocation7 + $0x150] sm:$0xff] }
 0x1ac   : > { %v9909_v26 = vpop.f32.mrf.mxu0  ;;  %v9930_v43 = vadd.f32 %v9929_v27, %v9928_v25  ;;  %v1948_v25 = vld [vmem:[#allocation7 + $0x170] sm:$0xff]  ;;  %v1949_v27 = vld [vmem:[#allocation7 + $0x178] sm:$0xff] }
 0x1ad   : > { %v9931_v29 = vpop.f32.mrf.mxu1  ;;  %v1296_v42 = vadd.f32 %v9908_v36, %v1255_v37  ;;  %v9020_v6 = vcombine.low %v1944_v24, %v1948_v25  ;;  %v1929_v36 = vld [vmem:[#allocation7 + $0xd8] sm:$0xff] }
 0x1ae   : > { %v9910_v28 = vpop.f32.mrf.mxu0  ;;  %v1933_v37 = vld [vmem:[#allocation7 + $0xf8] sm:$0xff] }
 0x1af   : > { %v9932_v31 = vpop.f32.mrf.mxu1  ;;  %v9911_v44 = vadd.f32 %v9910_v28, %v9909_v26  ;;  %v1761_v49 = vadd.f32 %v9930_v43, %v1296_v42  ;;  %v1945_v26 = vld [vmem:[#allocation7 + $0x158] sm:$0xff]  ;;  %v9028_v28 = vcombine.low %v1952_v15, %v1956_v16  ;;  %v1924_v42 = vld [vmem:[#allocation7 + $0xb0] sm:$0xff]  ;;  %v2572_v16 = vld [vmem:[#allocation10 + $0x180] sm:$0xff] }
 0x1b0   : > { %v9933_v51 = vadd.f32 %v9932_v31, %v9931_v29  ;;  %v9030_v29 = vcombine.low %v1953_v17, %v1957_v18  ;;  %v9023_v31 = vcombine.high %v1945_v26, %v1949_v27  ;;  %v9022_v7 = vcombine.low %v1945_v26, %v1949_v27  ;;  %v1921_v43 = vld [vmem:[#allocation7 + $0x98] sm:$0xff]  ;;  %v2576_v17 = vld [vmem:[#allocation10 + $0x1a0] sm:$0xff] }
 0x1b1   : > { %v1299_v50 = vadd.f32 %v9911_v44, %v1258_v45  ;;  %v1925_v44 = vld [vmem:[#allocation7 + $0xb8] sm:$0xff]  ;;  %v2700_v18 = vld [vmem:[#allocation10 + $0x580] sm:$0xff] }
 0x1b2   : > { %v2568_v26 = vld [vmem:[#allocation10 + $0x160] sm:$0xff] }
 0x1b3   : > { %v1764_v57 = vadd.f32 %v9933_v51, %v1299_v50  ;;  %v1916_v50 = vld [vmem:[#allocation7 + $0x70] sm:$0xff]  ;;  %v1913_v51 = vld [vmem:[#allocation7 + $0x58] sm:$0xff]  ;;  %v2692_v27 = vld [vmem:[#allocation10 + $0x540] sm:$0xff] }
 0x1c8   : > { %v9950_v30 = vpop.f32.mrf.mxu0 }
 0x1c9   : > { %v9972_v35 = vpop.f32.mrf.mxu1 }
 0x1ca   : > { %v9951_v34 = vpop.f32.mrf.mxu0 }
 0x1cb   : > { %v9973_v41 = vpop.f32.mrf.mxu1  ;;  %v9952_v46 = vadd.f32 %v9951_v34, %v9950_v30  ;;  %v9021_v30 = vcombine.high %v1944_v24, %v1948_v25  ;;  %v1937_v34 = vld [vmem:[#allocation7 + $0x118] sm:$0xff]  ;;  %v2564_v25 = vld [vmem:[#allocation10 + $0x140] sm:$0xff] }
 0x1cc   : > { %v9953_v40 = vpop.f32.mrf.mxu0  ;;  %v9974_v53 = vadd.f32 %v9973_v41, %v9972_v35  ;;  %v1941_v35 = vld [vmem:[#allocation7 + $0x138] sm:$0xff]  ;;  %v1920_v41 = vld [vmem:[#allocation7 + $0x90] sm:$0xff] }
 0x1cd   : > { %v9975_v48 = vpop.f32.mrf.mxu1  ;;  %v1802_v52 = vadd.f32 %v9952_v46, %v1761_v49  ;;  %v9015_v10 = vcombine.high %v1937_v34, %v1941_v35  ;;  %v9014_v39 = vcombine.low %v1937_v34, %v1941_v35  ;;  %v9006_v46 = vcombine.low %v1929_v36, %v1933_v37  ;;  %v1912_v49 = vld [vmem:[#allocation7 + $0x50] sm:$0xff]  ;;  %v2560_v34 = vld [vmem:[#allocation10 + $0x120] sm:$0xff] }
 0x1ce   : > { %v9954_v47 = vpop.f32.mrf.mxu0  ;;  %v2684_v35 = vld [vmem:[#allocation10 + $0x500] sm:$0xff] }
 0x1cf   : > { %v9955_v54 = vadd.f32 %v9954_v47, %v9953_v40  ;;  %v9976_v55 = vpop.f32.mrf.mxu1  ;;  %v1843_v59 = vadd.f32 %v9974_v53, %v1802_v52  ;;  %v8997_v47 = vcombine.high %v1920_v41, %v1924_v42  ;;  %v1917_v52 = vld [vmem:[#allocation7 + $0x78] sm:$0xff]  ;;  %v8996_v53 = vcombine.low %v1920_v41, %v1924_v42  ;;  %v2540_v41 = vld [vmem:[#allocation10 + $0x80] sm:$0xff] }
 0x1d0   : > { %v9977_v61 = vadd.f32 %v9976_v55, %v9975_v48  ;;  %v8999_v48 = vcombine.high %v1921_v43, %v1925_v44  ;;  %v8989_v55 = vcombine.high %v1912_v49, %v1916_v50  ;;  %v2544_v42 = vld [vmem:[#allocation10 + $0xa0] sm:$0xff] }
 0x1d1   : > { %v1805_v60 = vadd.f32 %v9955_v54, %v1764_v57  ;;  %v8998_v54 = vcombine.low %v1921_v43, %v1925_v44  ;;  %v1904_v57 = vld [vmem:[#allocation7 + $0x10] sm:$0xff]  ;;  %v2668_v43 = vld [vmem:[#allocation10 + $0x480] sm:$0xff] }
 0x1d2   : > { %v2672_v44 = vld [vmem:[#allocation10 + $0x4a0] sm:$0xff] }
 0x1d3   : > { %v1846_v3 = vadd.f32 %v9977_v61, %v1805_v60  ;;  %v1909_v60 = vld [vmem:[#allocation7 + $0x38] sm:$0xff]  ;;  %v8988_v61 = vcombine.low %v1912_v49, %v1916_v50  ;;  %v2532_v49 = vld [vmem:[#allocation10 + $0x40] sm:$0xff] }
 0x1d4   : > { %v2536_v50 = vld [vmem:[#allocation10 + $0x60] sm:$0xff] }
 0x1e8   : > { %v9994_v56 = vpop.f32.mrf.mxu0 }
 0x1ea   : > { %v9995_v58 = vpop.f32.mrf.mxu0 }
 0x1eb   : > { %v9996_v62 = vadd.f32 %v9995_v58, %v9994_v56  ;;  %v8991_v56 = vcombine.high %v1913_v51, %v1917_v52  ;;  %v1908_v58 = vld [vmem:[#allocation7 + $0x30] sm:$0xff] }
 0x1ec   : > { %v9997_v63 = vpop.f32.mrf.mxu0 }
 0x1ed   : > { %v1884_v0 = vadd.f32 %v9996_v62, %v1843_v59  ;;  %v1905_v59 = vld [vmem:[#allocation7 + $0x18] sm:$0xff]  ;;  %v8990_v62 = vcombine.low %v1913_v51, %v1917_v52  ;;  %v2660_v51 = vld [vmem:[#allocation10 + $0x440] sm:$0xff] }
 0x1ee   : > { %v9998_v2 = vpop.f32.mrf.mxu0  ;;  %v2664_v52 = vld [vmem:[#allocation10 + $0x460] sm:$0xff] }
 0x1ef   : > { %v9999_v4 = vadd.f32 %v9998_v2, %v9997_v63  ;;  %v1897_v5 = vadd.f32 %v8975_v1, %v1884_v0  ;;  %v8981_v63 = vcombine.high %v1904_v57, %v1908_v58  ;;  %v8983_v0 = vcombine.high %v1905_v59, %v1909_v60  ;;  %v2584_v2 = vld [vmem:[#allocation10 + $0x1e0] sm:$0xff] }
 0x1f1   : > { %v1887_v9 = vadd.f32 %v9999_v4, %v1846_v3  ;;  %v1899_v19 = vmax.f32 %v1897_v5, 0.0  ;;  %v2708_v3 = vld [vmem:[#allocation10 + $0x5c0] sm:$0xff]  ;;  %v8980_v5 = vcombine.low %v1904_v57, %v1908_v58 }
 0x1f2   : > { %v2712_v4 = vld [vmem:[#allocation10 + $0x5e0] sm:$0xff] }
 0x1f3   : > { %v1898_v13 = vadd.f32 %v8975_v1, %v1887_v9  ;;  %v2580_v1 = vld [vmem:[#allocation10 + $0x1c0] sm:$0xff]  ;;  %v8982_v9 = vcombine.low %v1905_v59, %v1909_v60  ;;  %v9225_v15 = vcombine.high %v2708_v3, %v2712_v4 }
 0x1f4   : > { %v2524_v57 = vld [vmem:[#allocation10] sm:$0xff] }
 0x1f5   : > { %v1900_v20 = vmax.f32 %v1898_v13, 0.0  ;;  %v9097_v13 = vcombine.high %v2580_v1, %v2584_v2  ;;  %v2528_v58 = vld [vmem:[#allocation10 + $0x20] sm:$0xff] }
 0x1f6   : > { %v2652_v59 = vld [vmem:[#allocation10 + $0x400] sm:$0xff] }
 0x1f7   : > { %v11327_v21 = vpack.c.bf16 %v1900_v20, %v1899_v19  ;;  %v2704_v19 = vld [vmem:[#allocation10 + $0x5a0] sm:$0xff]  ;;  %v9096_v20 = vcombine.low %v2580_v1, %v2584_v2 }
 0x1f8   : > { %v9217_v24 = vcombine.high %v2700_v18, %v2704_v19  ;;  %v2656_v60 = vld [vmem:[#allocation10 + $0x420] sm:$0xff] }
 0x1f9   : > { %2361 = vmatmul.mubr.bf16.vlgmr.msra.gmra.mxu1 %v11327_v21  ;;  %2404 = vmatmul.mubr.bf16.vlgmr.msra.gmra.mxu0 %v11327_v21  ;;  %v2644_v1 = vld [vmem:[#allocation10 + $0x3c0] sm:$0xff] }
 0x1fa   : > { %2415 = vmatpush1.bf16.msra.mxu1 %v9036_v11  ;;  %2458 = vmatpush1.bf16.msra.mxu0 %v9038_v12  ;;  %v1928_v11 = vld [vmem:[#allocation7 + $0xd0] sm:$0xff]  ;;  %v2648_v2 = vld [vmem:[#allocation10 + $0x3e0] sm:$0xff] }
 0x1fb   : > { %2416 = vmatprep.subr.bf16.mxu1 %v9029_v22  ;;  %2459 = vmatprep.subr.bf16.mxu0 %v9031_v23  ;;  %v1932_v12 = vld [vmem:[#allocation7 + $0xf0] sm:$0xff]  ;;  %v9224_v22 = vcombine.low %v2708_v3, %v2712_v4  ;;  %v9089_v23 = vcombine.high %v2572_v16, %v2576_v17  ;;  %v2772_v3 = vld [vmem:[#allocation10 + $0x7c0] sm:$0xff] }
 0x1fc   : > { %2446 = vmatprep.mubr.bf16.mxu1 %v11053_v14  ;;  %2489 = vmatprep.mubr.bf16.mxu0 %v11053_v14  ;;  %v9005_v40 = vcombine.high %v1928_v11, %v1932_v12  ;;  %v9007_v14 = vcombine.high %v1929_v36, %v1933_v37  ;;  %v9004_v45 = vcombine.low %v1928_v11, %v1932_v12  ;;  %v2548_v11 = vld [vmem:[#allocation10 + $0xc0] sm:$0xff] }
 0x1fd   : > { %v2552_v12 = vld [vmem:[#allocation10 + $0xe0] sm:$0xff] }
 0x1fe   : > { %2417 = vmatpush1.bf16.msra.mxu1 %v9028_v28  ;;  %2460 = vmatpush1.bf16.msra.mxu0 %v9030_v29  ;;  %v2696_v28 = vld [vmem:[#allocation10 + $0x560] sm:$0xff]  ;;  %v9088_v29 = vcombine.low %v2572_v16, %v2576_v17 }
 0x1ff   : > { %2418 = vmatprep.subr.bf16.mxu1 %v9021_v30  ;;  %2461 = vmatprep.subr.bf16.mxu0 %v9023_v31  ;;  %v9216_v30 = vcombine.low %v2700_v18, %v2704_v19  ;;  %v9081_v31 = vcombine.high %v2564_v25, %v2568_v26  ;;  %v9209_v32 = vcombine.high %v2692_v27, %v2696_v28  ;;  %v2676_v36 = vld [vmem:[#allocation10 + $0x4c0] sm:$0xff] }
 0x200   : > { %v2680_v37 = vld [vmem:[#allocation10 + $0x4e0] sm:$0xff] }
 0x201   : > { %v2776_v4 = vld [vmem:[#allocation10 + $0x7e0] sm:$0xff] }
 0x202   : > { %2419 = vmatpush1.bf16.msra.mxu1 %v9020_v6  ;;  %2462 = vmatpush1.bf16.msra.mxu0 %v9022_v7  ;;  %v2688_v6 = vld [vmem:[#allocation10 + $0x520] sm:$0xff]  ;;  %v9080_v7 = vcombine.low %v2564_v25, %v2568_v26 }
 0x203   : > { %2420 = vmatprep.subr.bf16.mxu1 %v9013_v8  ;;  %2463 = vmatprep.subr.bf16.mxu0 %v9015_v10  ;;  %v9208_v8 = vcombine.low %v2692_v27, %v2696_v28  ;;  %v9073_v10 = vcombine.high %v2556_v33, %v2560_v34  ;;  %v2636_v16 = vld [vmem:[#allocation10 + $0x380] sm:$0xff] }
 0x204   : > { %v2640_v17 = vld [vmem:[#allocation10 + $0x3a0] sm:$0xff] }
 0x205   : > { %v2764_v18 = vld [vmem:[#allocation10 + $0x780] sm:$0xff] }
 0x206   : > { %2421 = vmatpush1.bf16.msra.mxu1 %v9012_v38  ;;  %2464 = vmatpush1.bf16.msra.mxu0 %v9014_v39  ;;  %v9072_v38 = vcombine.low %v2556_v33, %v2560_v34  ;;  %v9200_v39 = vcombine.low %v2684_v35, %v2688_v6  ;;  %v2768_v19 = vld [vmem:[#allocation10 + $0x7a0] sm:$0xff] }
 0x207   : > { %2422 = vmatprep.subr.bf16.mxu1 %v9005_v40  ;;  %2465 = vmatprep.subr.bf16.mxu0 %v9007_v14  ;;  %v9065_v40 = vcombine.high %v2548_v11, %v2552_v12  ;;  %v9193_v14 = vcombine.high %v2676_v36, %v2680_v37  ;;  %v2628_v25 = vld [vmem:[#allocation10 + $0x340] sm:$0xff] }
 0x208   : > { %v2632_v26 = vld [vmem:[#allocation10 + $0x360] sm:$0xff] }
 0x209   : > { %v2756_v27 = vld [vmem:[#allocation10 + $0x740] sm:$0xff] }
 0x20a   : > { %2423 = vmatpush1.bf16.msra.mxu1 %v9004_v45  ;;  %2466 = vmatpush1.bf16.msra.mxu0 %v9006_v46  ;;  %v9064_v45 = vcombine.low %v2548_v11, %v2552_v12  ;;  %v9192_v46 = vcombine.low %v2676_v36, %v2680_v37  ;;  %v2760_v28 = vld [vmem:[#allocation10 + $0x760] sm:$0xff] }
 0x20b   : > { %2424 = vmatprep.subr.bf16.mxu1 %v8997_v47  ;;  %2467 = vmatprep.subr.bf16.mxu0 %v8999_v48  ;;  %v9057_v47 = vcombine.high %v2540_v41, %v2544_v42  ;;  %v9185_v48 = vcombine.high %v2668_v43, %v2672_v44  ;;  %v2620_v33 = vld [vmem:[#allocation10 + $0x300] sm:$0xff] }
 0x20c   : > { %v2624_v34 = vld [vmem:[#allocation10 + $0x320] sm:$0xff] }
 0x20d   : > { %v2612_v11 = vld [vmem:[#allocation10 + $0x2c0] sm:$0xff] }
 0x20e   : > { %2425 = vmatpush1.bf16.msra.mxu1 %v8996_v53  ;;  %2468 = vmatpush1.bf16.msra.mxu0 %v8998_v54  ;;  %v9056_v53 = vcombine.low %v2540_v41, %v2544_v42  ;;  %v9184_v54 = vcombine.low %v2668_v43, %v2672_v44  ;;  %v2616_v12 = vld [vmem:[#allocation10 + $0x2e0] sm:$0xff] }
 0x20f   : > { %2426 = vmatprep.subr.bf16.mxu1 %v8989_v55  ;;  %2469 = vmatprep.subr.bf16.mxu0 %v8991_v56  ;;  %v9049_v55 = vcombine.high %v2532_v49, %v2536_v50  ;;  %v9177_v56 = vcombine.high %v2660_v51, %v2664_v52  ;;  %v2740_v36 = vld [vmem:[#allocation10 + $0x6c0] sm:$0xff] }
 0x210   : > { %v2744_v37 = vld [vmem:[#allocation10 + $0x6e0] sm:$0xff] }
 0x211   : > { %v9257_v41 = vcombine.high %v2740_v36, %v2744_v37  ;;  %v2608_v42 = vld [vmem:[#allocation10 + $0x2a0] sm:$0xff] }
 0x212   : > { %2427 = vmatpush1.bf16.msra.mxu1 %v8988_v61  ;;  %2470 = vmatpush1.bf16.msra.mxu0 %v8990_v62  ;;  %v9048_v61 = vcombine.low %v2532_v49, %v2536_v50  ;;  %v9176_v62 = vcombine.low %v2660_v51, %v2664_v52  ;;  %v2732_v43 = vld [vmem:[#allocation10 + $0x680] sm:$0xff]  ;;  %v9256_v50 = vcombine.low %v2740_v36, %v2744_v37 }
 0x213   : > { %2428 = vmatprep.subr.bf16.mxu1 %v8981_v63  ;;  %2471 = vmatprep.subr.bf16.mxu0 %v8983_v0  ;;  %v9041_v63 = vcombine.high %v2524_v57, %v2528_v58  ;;  %v9169_v0 = vcombine.high %v2652_v59, %v2656_v60  ;;  %v2736_v44 = vld [vmem:[#allocation10 + $0x6a0] sm:$0xff] }
 0x214   : > { %v11347_v49 = vld [vmem:[#allocation10 + $0xde0] sm:$0xff] }
 0x216   : > { %2429 = vmatpush1.bf16.msra.mxu1 %v8980_v5  ;;  %2472 = vmatpush1.bf16.msra.mxu0 %v8982_v9  ;;  %v9040_v5 = vcombine.low %v2524_v57, %v2528_v58  ;;  %v9168_v9 = vcombine.low %v2652_v59, %v2656_v60  ;;  %v2724_v57 = vld [vmem:[#allocation10 + $0x640] sm:$0xff]  ;;  %v9248_v60 = vcombine.low %v2732_v43, %v2736_v44 }
 0x217   : > { %5638 = vmatprep.subr.bf16.mxu1 %v9097_v13  ;;  %5681 = vmatprep.subr.bf16.mxu0 %v9225_v15  ;;  %v9161_v13 = vcombine.high %v2644_v1, %v2648_v2  ;;  %v9289_v15 = vcombine.high %v2772_v3, %v2776_v4  ;;  %v2728_v58 = vld [vmem:[#allocation10 + $0x660] sm:$0xff] }
 0x219   : > { %2447 = vmatmul.mubr.bf16.vlgmr.msra.gmra.mxu1 %v11327_v21  ;;  %2490 = vmatmul.mubr.bf16.vlgmr.msra.gmra.mxu0 %v11327_v21  ;;  %v9201_v21 = vcombine.high %v2684_v35, %v2688_v6  ;;  %v2748_v35 = vld [vmem:[#allocation10 + $0x700] sm:$0xff] }
 0x21a   : > { %5639 = vmatpush1.bf16.msra.mxu1 %v9096_v20  ;;  %5682 = vmatpush1.bf16.msra.mxu0 %v9224_v22  ;;  %v9160_v20 = vcombine.low %v2644_v1, %v2648_v2  ;;  %v9288_v22 = vcombine.low %v2772_v3, %v2776_v4  ;;  %v2752_v6 = vld [vmem:[#allocation10 + $0x720] sm:$0xff]  ;;  %v9240_v4 = vcombine.low %v2724_v57, %v2728_v58 }
 0x21b   : > { %5640 = vmatprep.subr.bf16.mxu1 %v9089_v23  ;;  %5683 = vmatprep.subr.bf16.mxu0 %v9217_v24  ;;  %v9153_v23 = vcombine.high %v2636_v16, %v2640_v17  ;;  %v9281_v24 = vcombine.high %v2764_v18, %v2768_v19  ;;  %v2716_v1 = vld [vmem:[#allocation10 + $0x600] sm:$0xff] }
 0x21c   : > { %v2720_v2 = vld [vmem:[#allocation10 + $0x620] sm:$0xff] }
 0x21e   : > { %5641 = vmatpush1.bf16.msra.mxu1 %v9088_v29  ;;  %5684 = vmatpush1.bf16.msra.mxu0 %v9216_v30  ;;  %v9152_v29 = vcombine.low %v2636_v16, %v2640_v17  ;;  %v9280_v30 = vcombine.low %v2764_v18, %v2768_v19  ;;  %v1968_v18 = vlaneseq }
 0x21f   : > { %5642 = vmatprep.subr.bf16.mxu1 %v9081_v31  ;;  %5685 = vmatprep.subr.bf16.mxu0 %v9209_v32  ;;  %v9145_v31 = vcombine.high %v2628_v25, %v2632_v26  ;;  %v9273_v32 = vcombine.high %v2756_v27, %v2760_v28 }
 0x220   : > { %v11358_v19 = vshrl.u32 %v1968_v18, 7 }
 0x222   : > { %5643 = vmatpush1.bf16.msra.mxu1 %v9080_v7  ;;  %5686 = vmatpush1.bf16.msra.mxu0 %v9208_v8  ;;  %v9144_v7 = vcombine.low %v2628_v25, %v2632_v26  ;;  %v9272_v8 = vcombine.low %v2756_v27, %v2760_v28  ;;  %v11372_v25 = vld [vmem:[#allocation9] sm:$0xff] }
 0x223   : > { %5644 = vmatprep.subr.bf16.mxu1 %v9073_v10  ;;  %5687 = vmatprep.subr.bf16.mxu0 %v9201_v21  ;;  %v9137_v10 = vcombine.high %v2620_v33, %v2624_v34  ;;  %v9265_v21 = vcombine.high %v2748_v35, %v2752_v6 }
 0x226   : > { %5645 = vmatpush1.bf16.msra.mxu1 %v9072_v38  ;;  %5688 = vmatpush1.bf16.msra.mxu0 %v9200_v39  ;;  %v9136_v38 = vcombine.low %v2620_v33, %v2624_v34  ;;  %v9264_v39 = vcombine.low %v2748_v35, %v2752_v6 }
 0x227   : > { %5646 = vmatprep.subr.bf16.mxu1 %v9065_v40  ;;  %5689 = vmatprep.subr.bf16.mxu0 %v9193_v14  ;;  %v2604_v40 = vld [vmem:[#allocation10 + $0x280] sm:$0xff]  ;;  %v9129_v14 = vcombine.high %v2612_v11, %v2616_v12 }
 0x228   : > { %v9120_v59 = vcombine.low %v2604_v40, %v2608_v42 }
 0x22a   : > { %5647 = vmatpush1.bf16.msra.mxu1 %v9064_v45  ;;  %5690 = vmatpush1.bf16.msra.mxu0 %v9192_v46  ;;  %v11341_v45 = vld [vmem:[#allocation10 + $0x9c0] sm:$0xff] }
 0x22b   : > { %5648 = vmatprep.subr.bf16.mxu1 %v9057_v47  ;;  %5691 = vmatprep.subr.bf16.mxu0 %v9185_v48  ;;  %v11343_v46 = vld [vmem:[#allocation10 + $0x9e0] sm:$0xff]  ;;  %v9128_v48 = vcombine.low %v2612_v11, %v2616_v12 }
 0x22c   : > { %v11345_v47 = vld [vmem:[#allocation10 + $0xdc0] sm:$0xff]  ;;  %v9352_v51 = vcombine.low %v11341_v45, %v11343_v46  ;;  %v9353_v16 = vcombine.high %v11341_v45, %v11343_v46 }
 0x22d   : > { %v9480_v52 = vcombine.low %v11345_v47, %v11347_v49  ;;  %v9481_v17 = vcombine.high %v11345_v47, %v11347_v49  ;;  %v2804_v47 = vld [vmem:[#allocation10 + $0x8c0] sm:$0xff] }
 0x22e   : > { %5649 = vmatpush1.bf16.msra.mxu1 %v9056_v53  ;;  %5692 = vmatpush1.bf16.msra.mxu0 %v9184_v54  ;;  %v9121_v53 = vcombine.high %v2604_v40, %v2608_v42  ;;  %v9249_v54 = vcombine.high %v2732_v43, %v2736_v44  ;;  %v2808_v49 = vld [vmem:[#allocation10 + $0x8e0] sm:$0xff] }
 0x22f   : > { %5650 = vmatprep.subr.bf16.mxu1 %v9049_v55  ;;  %5693 = vmatprep.subr.bf16.mxu0 %v9177_v56  ;;  %v2596_v55 = vld [vmem:[#allocation10 + $0x240] sm:$0xff] }
 0x230   : > { %v2600_v56 = vld [vmem:[#allocation10 + $0x260] sm:$0xff] }
 0x231   : > { %v9112_v3 = vcombine.low %v2596_v55, %v2600_v56 }
 0x232   : > { %5651 = vmatpush1.bf16.msra.mxu1 %v9048_v61  ;;  %5694 = vmatpush1.bf16.msra.mxu0 %v9176_v62  ;;  %v9113_v61 = vcombine.high %v2596_v55, %v2600_v56  ;;  %v9241_v62 = vcombine.high %v2724_v57, %v2728_v58 }
 0x233   : > { %5652 = vmatprep.subr.bf16.mxu1 %v9041_v63  ;;  %5695 = vmatprep.subr.bf16.mxu0 %v9169_v0  ;;  %v2588_v63 = vld [vmem:[#allocation10 + $0x200] sm:$0xff] }
 0x234   : > { %v2592_v0 = vld [vmem:[#allocation10 + $0x220] sm:$0xff] }
 0x236   : > { %5653 = vmatpush1.bf16.msra.mxu1 %v9040_v5  ;;  %5696 = vmatpush1.bf16.msra.mxu0 %v9168_v9  ;;  %v9105_v5 = vcombine.high %v2588_v63, %v2592_v0  ;;  %v9233_v9 = vcombine.high %v2716_v1, %v2720_v2 }
 0x237   : > { %5654 = vmatprep.subr.bf16.mxu1 %v9161_v13  ;;  %5697 = vmatprep.subr.bf16.mxu0 %v9289_v15  ;;  %v9104_v13 = vcombine.low %v2588_v63, %v2592_v0  ;;  %v9232_v15 = vcombine.low %v2716_v1, %v2720_v2  ;;  %v2824_v63 = vld [vmem:[#allocation10 + $0x960] sm:$0xff] }
 0x238   : > { %v2948_v0 = vld [vmem:[#allocation10 + $0xd40] sm:$0xff] }
 0x239   : > { %v2952_v1 = vld [vmem:[#allocation10 + $0xd60] sm:$0xff] }
 0x23a   : > { %5655 = vmatpush2.bf16.msra.mxu1 %v9160_v20  ;;  %5698 = vmatpush2.bf16.msra.mxu0 %v9288_v22  ;;  %v11361_v20 = vsub.s32 1, %v11358_v19  ;;  %v11364_v22 = vsub.s32 3, %v11358_v19 }
 0x23b   : > { %5656 = vmatprep.subr.bf16.mxu1 %v9153_v23  ;;  %5699 = vmatprep.subr.bf16.mxu0 %v9281_v24  ;;  %v11367_v23 = vsub.s32 0, %v11358_v19  ;;  %v11370_v24 = vsub.s32 2, %v11358_v19 }
 0x23c   : > { %v1975_v28 = vrot.slane %v11372_v25, %v11361_v20 }
 0x23e   : > { %5657 = vmatpush2.bf16.msra.mxu1 %v9152_v29  ;;  %5700 = vmatpush2.bf16.msra.mxu0 %v9280_v30  ;;  %v1983_v29 = vrot.slane %v11372_v25, %v11364_v22  ;;  %v1971_v30 = vrot.slane %v11372_v25, %v11367_v23 }
 0x23f   : > { %5658 = vmatprep.subr.bf16.mxu1 %v9145_v31  ;;  %5701 = vmatprep.subr.bf16.mxu0 %v9273_v32  ;;  %v1979_v31 = vrot.slane %v11372_v25, %v11370_v24 }
 0x242   : > { %5659 = vmatpush2.bf16.msra.mxu1 %v9144_v7  ;;  %5702 = vmatpush2.bf16.msra.mxu0 %v9272_v8 }
 0x243   : > { %5660 = vmatprep.subr.bf16.mxu1 %v9137_v10  ;;  %5703 = vmatprep.subr.bf16.mxu0 %v9265_v21 }
 0x246   : > { %5661 = vmatpush2.bf16.msra.mxu1 %v9136_v38  ;;  %5704 = vmatpush2.bf16.msra.mxu0 %v9264_v39 }
 0x247   : > { %5662 = vmatprep.subr.bf16.mxu1 %v9129_v14  ;;  %5705 = vmatprep.subr.bf16.mxu0 %v9257_v41  ;;  %v2828_v14 = vld [vmem:[#allocation10 + $0x980] sm:$0xff] }
 0x248   : > { %v2832_v41 = vld [vmem:[#allocation10 + $0x9a0] sm:$0xff] }
 0x249   : > { %v9344_v2 = vcombine.low %v2828_v14, %v2832_v41 }
 0x24a   : > { %5663 = vmatpush2.bf16.msra.mxu1 %v9128_v48  ;;  %5706 = vmatpush2.bf16.msra.mxu0 %v9256_v50  ;;  %v2956_v50 = vld [vmem:[#allocation10 + $0xd80] sm:$0xff] }
 0x24b   : > { %5664 = vmatprep.subr.bf16.mxu1 %v9121_v53  ;;  %5707 = vmatprep.subr.bf16.mxu0 %v9249_v54  ;;  %v2960_v53 = vld [vmem:[#allocation10 + $0xda0] sm:$0xff] }
 0x24e   : > { %5665 = vmatpush2.bf16.msra.mxu1 %v9120_v59  ;;  %5708 = vmatpush2.bf16.msra.mxu0 %v9248_v60  ;;  %v9345_v60 = vcombine.high %v2828_v14, %v2832_v41 }
 0x24f   : > { %5666 = vmatprep.subr.bf16.mxu1 %v9113_v61  ;;  %5709 = vmatprep.subr.bf16.mxu0 %v9241_v62  ;;  %v9473_v61 = vcombine.high %v2956_v50, %v2960_v53  ;;  %v2820_v62 = vld [vmem:[#allocation10 + $0x940] sm:$0xff] }
 0x252   : > { %5667 = vmatpush2.bf16.msra.mxu1 %v9112_v3  ;;  %5710 = vmatpush2.bf16.msra.mxu0 %v9240_v4  ;;  %v9472_v3 = vcombine.low %v2956_v50, %v2960_v53  ;;  %v9337_v4 = vcombine.high %v2820_v62, %v2824_v63  ;;  %v2784_v50 = vld [vmem:[#allocation10 + $0x820] sm:$0xff] }
 0x253   : > { %5668 = vmatprep.subr.bf16.mxu1 %v9105_v5  ;;  %5711 = vmatprep.subr.bf16.mxu0 %v9233_v9  ;;  %v9465_v5 = vcombine.high %v2948_v0, %v2952_v1  ;;  %v2812_v9 = vld [vmem:[#allocation10 + $0x900] sm:$0xff] }
 0x254   : > { %v2908_v53 = vld [vmem:[#allocation10 + $0xc00] sm:$0xff] }
 0x256   : > { %5669 = vmatpush2.bf16.msra.mxu1 %v9104_v13  ;;  %5712 = vmatpush2.bf16.msra.mxu0 %v9232_v15  ;;  %v2816_v13 = vld [vmem:[#allocation10 + $0x920] sm:$0xff] }
 0x257   : > { %5724 = vmatprep.subr.bf16.mxu1 %v9353_v16  ;;  %5767 = vmatprep.subr.bf16.mxu0 %v9481_v17  ;;  %v2940_v15 = vld [vmem:[#allocation10 + $0xd00] sm:$0xff]  ;;  %v9336_v17 = vcombine.low %v2820_v62, %v2824_v63  ;;  %v9329_v45 = vcombine.high %v2812_v9, %v2816_v13 }
 0x258   : > { %v2944_v16 = vld [vmem:[#allocation10 + $0xd20] sm:$0xff] }
 0x259   : > { %v9457_v46 = vcombine.high %v2940_v15, %v2944_v16 }
 0x2b9   : > { %v2362_v26 = vpop.f32.mrf.mxu1  ;;  %v2405_v27 = vpop.f32.mrf.mxu0 }
 0x2ba   : > { %v2363_v21 = vadd.f32 %v2362_v26, %v1971_v30  ;;  %v2406_v11 = vadd.f32 %v2405_v27, %v1979_v31  ;;  %v9464_v26 = vcombine.low %v2948_v0, %v2952_v1  ;;  %v9328_v27 = vcombine.low %v2812_v9, %v2816_v13  ;;  %v2904_v9 = vld [vmem:[#allocation10 + $0xbe0] sm:$0xff] }
 0x2bb   : > { %v2364_v32 = vpop.f32.mrf.mxu1  ;;  %v2407_v33 = vpop.f32.mrf.mxu0  ;;  %v3028_v13 = vld [vmem:[#allocation10 + $0xfc0] sm:$0xff] }
 0x2bc   : > { %v2365_v6 = vadd.f32 %v2364_v32, %v1975_v28  ;;  %v2408_v7 = vadd.f32 %v2407_v33, %v1983_v29  ;;  %v2500_v54 = vmax.f32 %v2363_v21, 0.0  ;;  %v2502_v55 = vmax.f32 %v2406_v11, 0.0  ;;  %v2800_v32 = vld [vmem:[#allocation10 + $0x8a0] sm:$0xff] }
 0x2bd   : > { %v2366_v34 = vpop.f32.mrf.mxu1  ;;  %v2409_v35 = vpop.f32.mrf.mxu0  ;;  %v2924_v33 = vld [vmem:[#allocation10 + $0xc80] sm:$0xff]  ;;  %v1990_v21 = vsub.s32 5, %v11358_v19  ;;  %v1998_v11 = vsub.s32 7, %v11358_v19 }
 0x2be   : > { %v2367_v8 = vadd.f32 %v2366_v34, %v1971_v30  ;;  %v2410_v10 = vadd.f32 %v2409_v35, %v1979_v31  ;;  %v2501_v42 = vmax.f32 %v2365_v6, 0.0  ;;  %v2503_v43 = vmax.f32 %v2408_v7, 0.0  ;;  %v2796_v31 = vld [vmem:[#allocation10 + $0x880] sm:$0xff] }
 0x2bf   : > { %v2368_v12 = vpop.f32.mrf.mxu1  ;;  %v2411_v36 = vpop.f32.mrf.mxu0  ;;  %v2928_v34 = vld [vmem:[#allocation10 + $0xca0] sm:$0xff]  ;;  %v9320_v35 = vcombine.low %v2804_v47, %v2808_v49  ;;  %v9313_v7 = vcombine.high %v2796_v31, %v2800_v32 }
 0x2c0   : > { %v2369_v37 = vadd.f32 %v2368_v12, %v1975_v28  ;;  %v2412_v38 = vadd.f32 %v2411_v36, %v1983_v29  ;;  %v2508_v39 = vmax.f32 %v2367_v8, 0.0  ;;  %v2510_v40 = vmax.f32 %v2410_v10, 0.0  ;;  %v2788_v10 = vld [vmem:[#allocation10 + $0x840] sm:$0xff] }
 0x2c1   : > { %v9456_v28 = vcombine.low %v2940_v15, %v2944_v16  ;;  %v9321_v29 = vcombine.high %v2804_v47, %v2808_v49  ;;  %v9441_v8 = vcombine.high %v2924_v33, %v2928_v34  ;;  %v2792_v12 = vld [vmem:[#allocation10 + $0x860] sm:$0xff] }
 0x2c2   : > { %v2509_v44 = vmax.f32 %v2369_v37, 0.0  ;;  %v2511_v48 = vmax.f32 %v2412_v38, 0.0  ;;  %v11386_v58 = vpack.c.bf16 %v2508_v39, %v2500_v54  ;;  %v11388_v59 = vpack.c.bf16 %v2510_v40, %v2502_v55  ;;  %v2916_v36 = vld [vmem:[#allocation10 + $0xc40] sm:$0xff] }
 0x2c3   : > { %v2920_v37 = vld [vmem:[#allocation10 + $0xc60] sm:$0xff]  ;;  %v9312_v38 = vcombine.low %v2796_v31, %v2800_v32  ;;  %v9440_v39 = vcombine.low %v2924_v33, %v2928_v34  ;;  %v9305_v41 = vcombine.high %v2788_v10, %v2792_v12 }
 0x2c4   : > { %v11382_v56 = vpack.c.bf16 %v2509_v44, %v2501_v42  ;;  %v11384_v57 = vpack.c.bf16 %v2511_v48, %v2503_v43  ;;  %v9433_v42 = vcombine.high %v2916_v36, %v2920_v37  ;;  %v2780_v43 = vld [vmem:[#allocation10 + $0x800] sm:$0xff]  ;;  %v1991_v44 = vrot.slane %v11372_v25, %v1990_v21 }
 0x2c5   : > { %v1999_v48 = vrot.slane %v11372_v25, %v1998_v11  ;;  %v2912_v54 = vld [vmem:[#allocation10 + $0xc20] sm:$0xff]  ;;  %v9432_v62 = vcombine.low %v2916_v36, %v2920_v37  ;;  %v9297_v1 = vcombine.high %v2780_v43, %v2784_v50 }
 0x2c6   : > { %5670 = vmatprep.mubr.bf16.mxu1 %v11382_v56  ;;  %5713 = vmatprep.mubr.bf16.mxu0 %v11384_v57  ;;  %v3032_v15 = vld [vmem:[#allocation10 + $0xfe0] sm:$0xff]  ;;  %v9424_v47 = vcombine.low %v2908_v53, %v2912_v54 }
 0x2c7   : > { %5671 = vmatmul.mubr.bf16.vlgmr.msra.gmra.mxu1 %v11386_v58  ;;  %5714 = vmatmul.mubr.bf16.vlgmr.msra.gmra.mxu0 %v11388_v59  ;;  %v3020_v32 = vld [vmem:[#allocation10 + $0xf80] sm:$0xff] }
 0x2c8   : > { %5725 = vmatpush1.bf16.msra.mxu1 %v9352_v51  ;;  %5768 = vmatpush1.bf16.msra.mxu0 %v9480_v52  ;;  %v2932_v51 = vld [vmem:[#allocation10 + $0xcc0] sm:$0xff] }
 0x2c9   : > { %5726 = vmatprep.subr.bf16.mxu1 %v9345_v60  ;;  %5769 = vmatprep.subr.bf16.mxu0 %v9473_v61  ;;  %v2936_v52 = vld [vmem:[#allocation10 + $0xce0] sm:$0xff]  ;;  %v9304_v61 = vcombine.low %v2788_v10, %v2792_v12 }
 0x2ca   : > { %v9449_v30 = vcombine.high %v2932_v51, %v2936_v52  ;;  %v9448_v6 = vcombine.low %v2932_v51, %v2936_v52  ;;  %v9545_v51 = vcombine.high %v3028_v13, %v3032_v15  ;;  %v2892_v52 = vld [vmem:[#allocation10 + $0xb80] sm:$0xff] }
 0x2cb   : > { %v3024_v33 = vld [vmem:[#allocation10 + $0xfa0] sm:$0xff] }
 0x2cc   : > { %5727 = vmatpush1.bf16.msra.mxu1 %v9344_v2  ;;  %5770 = vmatpush1.bf16.msra.mxu0 %v9472_v3  ;;  %v9425_v2 = vcombine.high %v2908_v53, %v2912_v54  ;;  %v2900_v3 = vld [vmem:[#allocation10 + $0xbc0] sm:$0xff]  ;;  %v9537_v10 = vcombine.high %v3020_v32, %v3024_v33 }
 0x2cd   : > { %5728 = vmatprep.subr.bf16.mxu1 %v9337_v4  ;;  %5771 = vmatprep.subr.bf16.mxu0 %v9465_v5  ;;  %v9417_v49 = vcombine.high %v2900_v3, %v2904_v9  ;;  %v9416_v34 = vcombine.low %v2900_v3, %v2904_v9  ;;  %v2884_v12 = vld [vmem:[#allocation10 + $0xb40] sm:$0xff] }
 0x2ce   : > { %v2888_v36 = vld [vmem:[#allocation10 + $0xb60] sm:$0xff] }
 0x2cf   : > { %v3012_v37 = vld [vmem:[#allocation10 + $0xf40] sm:$0xff]  ;;  %v9400_v54 = vcombine.low %v2884_v12, %v2888_v36 }
 0x2d0   : > { %5729 = vmatpush1.bf16.msra.mxu1 %v9336_v17  ;;  %5772 = vmatpush1.bf16.msra.mxu0 %v9464_v26  ;;  %v9296_v26 = vcombine.low %v2780_v43, %v2784_v50  ;;  %v3004_v50 = vld [vmem:[#allocation10 + $0xf00] sm:$0xff] }
 0x2d1   : > { %5730 = vmatprep.subr.bf16.mxu1 %v9329_v45  ;;  %5773 = vmatprep.subr.bf16.mxu0 %v9457_v46  ;;  %v3008_v53 = vld [vmem:[#allocation10 + $0xf20] sm:$0xff] }
 0x2d2   : > { %v3000_v3 = vld [vmem:[#allocation10 + $0xee0] sm:$0xff] }
 0x2d4   : > { %5731 = vmatpush1.bf16.msra.mxu1 %v9328_v27  ;;  %5774 = vmatpush1.bf16.msra.mxu0 %v9456_v28  ;;  %v2896_v27 = vld [vmem:[#allocation10 + $0xba0] sm:$0xff] }
 0x2d5   : > { %5732 = vmatprep.subr.bf16.mxu1 %v9321_v29  ;;  %5775 = vmatprep.subr.bf16.mxu0 %v9449_v30 }
 0x2d8   : > { %5733 = vmatpush1.bf16.msra.mxu1 %v9320_v35  ;;  %5776 = vmatpush1.bf16.msra.mxu0 %v9448_v6 }
 0x2d9   : > { %v11402_v40 = vpop.f32.mrf.mxu1  ;;  %v11404_v14 = vpop.f32.mrf.mxu0  ;;  %5734 = vmatprep.subr.bf16.mxu1 %v9313_v7  ;;  %5777 = vmatprep.subr.bf16.mxu0 %v9441_v8  ;;  %v9544_v7 = vcombine.low %v3028_v13, %v3032_v15  ;;  %v9409_v8 = vcombine.high %v2892_v52, %v2896_v27  ;;  %v2860_v15 = vld [vmem:[#allocation10 + $0xa80] sm:$0xff] }
 0x2db   : > { %v2450_v55 = vpop.f32.mrf.mxu1  ;;  %v2493_v60 = vpop.f32.mrf.mxu0 }
 0x2dc   : > { %5735 = vmatpush1.bf16.msra.mxu1 %v9312_v38  ;;  %5778 = vmatpush1.bf16.msra.mxu0 %v9440_v39  ;;  %v2451_v4 = vadd.f32 %v2450_v55, %v1991_v44  ;;  %v2494_v5 = vadd.f32 %v2493_v60, %v1999_v48  ;;  %v3016_v38 = vld [vmem:[#allocation10 + $0xf60] sm:$0xff]  ;;  %v9408_v39 = vcombine.low %v2892_v52, %v2896_v27 }
 0x2dd   : > { %v11412_v63 = vpop.f32.mrf.mxu1  ;;  %v11414_v0 = vpop.f32.mrf.mxu0  ;;  %5736 = vmatprep.subr.bf16.mxu1 %v9305_v41  ;;  %5779 = vmatprep.subr.bf16.mxu0 %v9433_v42  ;;  %v9536_v41 = vcombine.low %v3020_v32, %v3024_v33  ;;  %v9401_v42 = vcombine.high %v2884_v12, %v2888_v36  ;;  %v9529_v43 = vcombine.high %v3012_v37, %v3016_v38  ;;  %v2856_v52 = vld [vmem:[#allocation10 + $0xa60] sm:$0xff] }
 0x2de   : > { %v2505_v28 = vmax.f32 %v2451_v4, 0.0  ;;  %v2507_v29 = vmax.f32 %v2494_v5, 0.0  ;;  %v9528_v55 = vcombine.low %v3012_v37, %v3016_v38  ;;  %v9520_v5 = vcombine.low %v3004_v50, %v3008_v53  ;;  %v2980_v27 = vld [vmem:[#allocation10 + $0xe40] sm:$0xff] }
 0x2df   : > { %v2454_v16 = vpop.f32.mrf.mxu1  ;;  %v2497_v17 = vpop.f32.mrf.mxu0  ;;  %v2976_v12 = vld [vmem:[#allocation10 + $0xe20] sm:$0xff] }
 0x2e0   : > { %v2455_v45 = vadd.f32 %v2454_v16, %v1991_v44  ;;  %v2498_v46 = vadd.f32 %v2497_v17, %v1999_v48  ;;  %5737 = vmatpush1.bf16.msra.mxu1 %v9304_v61  ;;  %5780 = vmatpush1.bf16.msra.mxu0 %v9432_v62  ;;  %v2876_v44 = vld [vmem:[#allocation10 + $0xb00] sm:$0xff]  ;;  %v9521_v61 = vcombine.high %v3004_v50, %v3008_v53  ;;  %v2585_v50 = vld [vmem:[#allocation10 + $0x1e8] sm:$0xff] }
 0x2e1   : > { %5738 = vmatprep.subr.bf16.mxu1 %v9297_v1  ;;  %5781 = vmatprep.subr.bf16.mxu0 %v9425_v2  ;;  %v2880_v48 = vld [vmem:[#allocation10 + $0xb20] sm:$0xff]  ;;  %v2709_v53 = vld [vmem:[#allocation10 + $0x5c8] sm:$0xff] }
 0x2e2   : > { %v2513_v30 = vmax.f32 %v2455_v45, 0.0  ;;  %v2515_v31 = vmax.f32 %v2498_v46, 0.0  ;;  %v9393_v60 = vcombine.high %v2876_v44, %v2880_v48  ;;  %v2868_v62 = vld [vmem:[#allocation10 + $0xac0] sm:$0xff]  ;;  %v9392_v4 = vcombine.low %v2876_v44, %v2880_v48  ;;  %v2581_v48 = vld [vmem:[#allocation10 + $0x1c8] sm:$0xff] }
 0x2e3   : > { %v2872_v1 = vld [vmem:[#allocation10 + $0xae0] sm:$0xff] }
 0x2e4   : > { %v11416_v35 = vpack.c.bf16 %v2513_v30, %v2505_v28  ;;  %v11418_v6 = vpack.c.bf16 %v2515_v31, %v2507_v29  ;;  %5739 = vmatpush1.bf16.msra.mxu1 %v9296_v26  ;;  %5782 = vmatpush1.bf16.msra.mxu0 %v9424_v47  ;;  %v2996_v2 = vld [vmem:[#allocation10 + $0xec0] sm:$0xff]  ;;  %v9385_v9 = vcombine.high %v2868_v62, %v2872_v1  ;;  %v1986_v29 = vsub.s32 4, %v11358_v19 }
 0x2e5   : > { %5740 = vmatprep.subr.bf16.mxu1 %v9417_v49  ;;  %5783 = vmatprep.subr.bf16.mxu0 %v9545_v51  ;;  %v9513_v13 = vcombine.high %v2996_v2, %v3000_v3  ;;  %v2864_v16 = vld [vmem:[#allocation10 + $0xaa0] sm:$0xff]  ;;  %v9384_v45 = vcombine.low %v2868_v62, %v2872_v1  ;;  %v9512_v46 = vcombine.low %v2996_v2, %v3000_v3  ;;  %v1994_v30 = vsub.s32 6, %v11358_v19  ;;  %v2573_v2 = vld [vmem:[#allocation10 + $0x188] sm:$0xff] }
 0x2e6   : > { %5756 = vmatprep.mubr.bf16.mxu1 %v11416_v35  ;;  %5799 = vmatprep.mubr.bf16.mxu0 %v11418_v6  ;;  %v2988_v17 = vld [vmem:[#allocation10 + $0xe80] sm:$0xff]  ;;  %v9377_v47 = vcombine.high %v2860_v15, %v2864_v16  ;;  %v9376_v31 = vcombine.low %v2860_v15, %v2864_v16  ;;  %v1987_v36 = vrot.slane %v11372_v25, %v1986_v29 }
 0x2e7   : > { %v2992_v26 = vld [vmem:[#allocation10 + $0xea0] sm:$0xff]  ;;  %v1995_v37 = vrot.slane %v11372_v25, %v1994_v30 }
 0x2e8   : > { %5741 = vmatpush2.bf16.msra.mxu1 %v9416_v34  ;;  %5784 = vmatpush2.bf16.msra.mxu0 %v9544_v7  ;;  %v9505_v49 = vcombine.high %v2988_v17, %v2992_v26  ;;  %v2852_v51 = vld [vmem:[#allocation10 + $0xa40] sm:$0xff]  ;;  %v9504_v32 = vcombine.low %v2988_v17, %v2992_v26 }
 0x2e9   : > { %5742 = vmatprep.subr.bf16.mxu1 %v9409_v8  ;;  %5785 = vmatprep.subr.bf16.mxu0 %v9537_v10  ;;  %v2984_v28 = vld [vmem:[#allocation10 + $0xe60] sm:$0xff]  ;;  %v9369_v33 = vcombine.high %v2852_v51, %v2856_v52  ;;  %v9368_v38 = vcombine.low %v2852_v51, %v2856_v52  ;;  %v2492_v25 = vadd.f32 %v11404_v14, %v1995_v37 }
 0x2ea   : > { %v9497_v34 = vcombine.high %v2980_v27, %v2984_v28  ;;  %v2844_v7 = vld [vmem:[#allocation10 + $0xa00] sm:$0xff] }
 0x2eb   : > { %v2848_v8 = vld [vmem:[#allocation10 + $0xa20] sm:$0xff] }
 0x2ec   : > { %5743 = vmatpush2.bf16.msra.mxu1 %v9408_v39  ;;  %5786 = vmatpush2.bf16.msra.mxu0 %v9536_v41  ;;  %v2972_v10 = vld [vmem:[#allocation10 + $0xe00] sm:$0xff]  ;;  %v9496_v39 = vcombine.low %v2980_v27, %v2984_v28  ;;  %v9361_v41 = vcombine.high %v2844_v7, %v2848_v8 }
 0x2ed   : > { %5744 = vmatprep.subr.bf16.mxu1 %v9401_v42  ;;  %5787 = vmatprep.subr.bf16.mxu0 %v9529_v43  ;;  %v2453_v42 = vadd.f32 %v11412_v63, %v1987_v36  ;;  %v2496_v43 = vadd.f32 %v11414_v0, %v1995_v37  ;;  %v9489_v44 = vcombine.high %v2972_v10, %v2976_v12  ;;  %v2553_v37 = vld [vmem:[#allocation10 + $0xe8] sm:$0xff] }
 0x2ee   : > { %v9099_v63 = vcombine.high %v2581_v48, %v2585_v50 }
 0x2ef   : > { %v2512_v62 = vmax.f32 %v2453_v42, 0.0  ;;  %v2514_v1 = vmax.f32 %v2496_v43, 0.0 }
 0x2f0   : > { %5745 = vmatpush2.bf16.msra.mxu1 %v9400_v54  ;;  %5788 = vmatpush2.bf16.msra.mxu0 %v9528_v55  ;;  %v2713_v54 = vld [vmem:[#allocation10 + $0x5e8] sm:$0xff]  ;;  %v2449_v55 = vadd.f32 %v11402_v40, %v1987_v36  ;;  %v9098_v40 = vcombine.low %v2581_v48, %v2585_v50 }
 0x2f1   : > { %5746 = vmatprep.subr.bf16.mxu1 %v9393_v60  ;;  %5789 = vmatprep.subr.bf16.mxu0 %v9521_v61  ;;  %v9360_v60 = vcombine.low %v2844_v7, %v2848_v8  ;;  %v9488_v61 = vcombine.low %v2972_v10, %v2976_v12  ;;  %v9227_v0 = vcombine.high %v2709_v53, %v2713_v54  ;;  %v2549_v36 = vld [vmem:[#allocation10 + $0xc8] sm:$0xff] }
 0x2f2   : > { %v2504_v3 = vmax.f32 %v2449_v55, 0.0  ;;  %v9226_v16 = vcombine.low %v2709_v53, %v2713_v54  ;;  %v9067_v43 = vcombine.high %v2549_v36, %v2553_v37  ;;  %v2541_v48 = vld [vmem:[#allocation10 + $0x88] sm:$0xff]  ;;  %v9066_v55 = vcombine.low %v2549_v36, %v2553_v37 }
 0x2f3   : > { %v2545_v50 = vld [vmem:[#allocation10 + $0xa8] sm:$0xff] }
 0x2f4   : > { %5747 = vmatpush2.bf16.msra.mxu1 %v9392_v4  ;;  %5790 = vmatpush2.bf16.msra.mxu0 %v9520_v5  ;;  %v2506_v4 = vmax.f32 %v2492_v25, 0.0  ;;  %v2577_v5 = vld [vmem:[#allocation10 + $0x1a8] sm:$0xff]  ;;  %v11434_v14 = vpack.c.bf16 %v2512_v62, %v2504_v3 }
 0x2f5   : > { %5748 = vmatprep.subr.bf16.mxu1 %v9385_v9  ;;  %5791 = vmatprep.subr.bf16.mxu0 %v9513_v13  ;;  %v2701_v9 = vld [vmem:[#allocation10 + $0x588] sm:$0xff]  ;;  %v9091_v17 = vcombine.high %v2573_v2, %v2577_v5  ;;  %v9090_v51 = vcombine.low %v2573_v2, %v2577_v5  ;;  %v9058_v2 = vcombine.low %v2541_v48, %v2545_v50 }
 0x2f6   : > { %v2705_v13 = vld [vmem:[#allocation10 + $0x5a8] sm:$0xff]  ;;  %v11436_v15 = vpack.c.bf16 %v2514_v1, %v2506_v4 }
 0x2f7   : > { %v9219_v26 = vcombine.high %v2701_v9, %v2705_v13  ;;  %v9218_v52 = vcombine.low %v2701_v9, %v2705_v13  ;;  %v2669_v53 = vld [vmem:[#allocation10 + $0x488] sm:$0xff] }
 0x2f8   : > { %5749 = vmatpush2.bf16.msra.mxu1 %v9384_v45  ;;  %5792 = vmatpush2.bf16.msra.mxu0 %v9512_v46  ;;  %v2565_v45 = vld [vmem:[#allocation10 + $0x148] sm:$0xff] }
 0x2f9   : > { %5750 = vmatprep.subr.bf16.mxu1 %v9377_v47  ;;  %5793 = vmatprep.subr.bf16.mxu0 %v9505_v49  ;;  %v2569_v46 = vld [vmem:[#allocation10 + $0x168] sm:$0xff] }
 0x2fa   : > { %v2693_v47 = vld [vmem:[#allocation10 + $0x548] sm:$0xff]  ;;  %v9083_v27 = vcombine.high %v2565_v45, %v2569_v46  ;;  %v9082_v7 = vcombine.low %v2565_v45, %v2569_v46 }
 0x2fb   : > { %v2697_v49 = vld [vmem:[#allocation10 + $0x568] sm:$0xff] }
 0x2fc   : > { %5751 = vmatpush2.bf16.msra.mxu1 %v9376_v31  ;;  %5794 = vmatpush2.bf16.msra.mxu0 %v9504_v32  ;;  %v9211_v28 = vcombine.high %v2693_v47, %v2697_v49  ;;  %v2557_v31 = vld [vmem:[#allocation10 + $0x108] sm:$0xff]  ;;  %v9210_v8 = vcombine.low %v2693_v47, %v2697_v49 }
 0x2fd   : > { %5752 = vmatprep.subr.bf16.mxu1 %v9369_v33  ;;  %5795 = vmatprep.subr.bf16.mxu0 %v9497_v34  ;;  %v2561_v32 = vld [vmem:[#allocation10 + $0x128] sm:$0xff] }
 0x2fe   : > { %v2685_v33 = vld [vmem:[#allocation10 + $0x508] sm:$0xff]  ;;  %v9075_v10 = vcombine.high %v2557_v31, %v2561_v32 }
 0x2ff   : > { %v2689_v34 = vld [vmem:[#allocation10 + $0x528] sm:$0xff] }
 0x300   : > { %5753 = vmatpush2.bf16.msra.mxu1 %v9368_v38  ;;  %5796 = vmatpush2.bf16.msra.mxu0 %v9496_v39  ;;  %v9203_v12 = vcombine.high %v2685_v33, %v2689_v34  ;;  %v2677_v38 = vld [vmem:[#allocation10 + $0x4c8] sm:$0xff]  ;;  %v9202_v42 = vcombine.low %v2685_v33, %v2689_v34 }
 0x301   : > { %5754 = vmatprep.subr.bf16.mxu1 %v9361_v41  ;;  %5797 = vmatprep.subr.bf16.mxu0 %v9489_v44  ;;  %v2681_v39 = vld [vmem:[#allocation10 + $0x4e8] sm:$0xff]  ;;  %v9074_v41 = vcombine.low %v2557_v31, %v2561_v32 }
 0x302   : > { %v9195_v44 = vcombine.high %v2677_v38, %v2681_v39  ;;  %v2673_v54 = vld [vmem:[#allocation10 + $0x4a8] sm:$0xff]  ;;  %v9194_v25 = vcombine.low %v2677_v38, %v2681_v39 }
 0x303   : > { %v2533_v62 = vld [vmem:[#allocation10 + $0x48] sm:$0xff]  ;;  %v9186_v3 = vcombine.low %v2669_v53, %v2673_v54 }
 0x304   : > { %5755 = vmatpush2.bf16.msra.mxu1 %v9360_v60  ;;  %5798 = vmatpush2.bf16.msra.mxu0 %v9488_v61  ;;  %v9059_v60 = vcombine.high %v2541_v48, %v2545_v50  ;;  %v9187_v61 = vcombine.high %v2669_v53, %v2673_v54  ;;  %v2537_v1 = vld [vmem:[#allocation10 + $0x68] sm:$0xff] }
 0x305   : > { %5810 = vmatprep.subr.bf16.mxu1 %v9099_v63  ;;  %5853 = vmatprep.subr.bf16.mxu0 %v9227_v0  ;;  %v2661_v63 = vld [vmem:[#allocation10 + $0x448] sm:$0xff]  ;;  %v9051_v4 = vcombine.high %v2533_v62, %v2537_v1 }
 0x306   : > { %v2665_v0 = vld [vmem:[#allocation10 + $0x468] sm:$0xff] }
 0x307   : > { %5757 = vmatmul.mubr.bf16.vlgmr.msra.gmra.mxu1 %v11434_v14  ;;  %5800 = vmatmul.mubr.bf16.vlgmr.msra.gmra.mxu0 %v11436_v15  ;;  %v9179_v5 = vcombine.high %v2661_v63, %v2665_v0  ;;  %v2525_v9 = vld [vmem:[#allocation10 + $0x8] sm:$0xff] }
 0x308   : > { %5811 = vmatpush1.bf16.msra.mxu1 %v9098_v40  ;;  %5842 = vmatprep.mubr.bf16.mxu1 %v11382_v56  ;;  %v2529_v13 = vld [vmem:[#allocation10 + $0x28] sm:$0xff] }
 0x309   : > { %5854 = vmatpush1.bf16.msra.mxu0 %v9226_v16  ;;  %5885 = vmatprep.mubr.bf16.mxu0 %v11384_v57  ;;  %v2653_v40 = vld [vmem:[#allocation10 + $0x408] sm:$0xff]  ;;  %v9043_v45 = vcombine.high %v2525_v9, %v2529_v13 }
 0x30a   : > { %5812 = vmatprep.subr.bf16.mxu1 %v9091_v17  ;;  %5855 = vmatprep.subr.bf16.mxu0 %v9219_v26  ;;  %v2657_v16 = vld [vmem:[#allocation10 + $0x428] sm:$0xff]  ;;  %v9050_v17 = vcombine.low %v2533_v62, %v2537_v1  ;;  %v9178_v26 = vcombine.low %v2661_v63, %v2665_v0 }
 0x30b   : > { %v9171_v46 = vcombine.high %v2653_v40, %v2657_v16  ;;  %v2645_v47 = vld [vmem:[#allocation10 + $0x3c8] sm:$0xff] }
 0x30c   : > { %5813 = vmatpush1.bf16.msra.mxu1 %v9090_v51  ;;  %v2649_v49 = vld [vmem:[#allocation10 + $0x3e8] sm:$0xff] }
 0x30d   : > { %5856 = vmatpush1.bf16.msra.mxu0 %v9218_v52  ;;  %5814 = vmatprep.subr.bf16.mxu1 %v9083_v27  ;;  %v2773_v51 = vld [vmem:[#allocation10 + $0x7c8] sm:$0xff]  ;;  %v9042_v27 = vcombine.low %v2525_v9, %v2529_v13  ;;  %v9163_v31 = vcombine.high %v2645_v47, %v2649_v49 }
 0x30e   : > { %5857 = vmatprep.subr.bf16.mxu0 %v9211_v28  ;;  %v2777_v52 = vld [vmem:[#allocation10 + $0x7e8] sm:$0xff]  ;;  %v9170_v28 = vcombine.low %v2653_v40, %v2657_v16 }
 0x30f   : > { %v9291_v32 = vcombine.high %v2773_v51, %v2777_v52  ;;  %v2637_v33 = vld [vmem:[#allocation10 + $0x388] sm:$0xff] }
 0x310   : > { %5815 = vmatpush1.bf16.msra.mxu1 %v9082_v7  ;;  %v2641_v34 = vld [vmem:[#allocation10 + $0x3a8] sm:$0xff] }
 0x311   : > { %5858 = vmatpush1.bf16.msra.mxu0 %v9210_v8  ;;  %5816 = vmatprep.subr.bf16.mxu1 %v9075_v10  ;;  %v2765_v7 = vld [vmem:[#allocation10 + $0x788] sm:$0xff]  ;;  %v9162_v10 = vcombine.low %v2645_v47, %v2649_v49  ;;  %v9155_v36 = vcombine.high %v2637_v33, %v2641_v34 }
 0x312   : > { %5859 = vmatprep.subr.bf16.mxu0 %v9203_v12  ;;  %v2769_v8 = vld [vmem:[#allocation10 + $0x7a8] sm:$0xff]  ;;  %v9290_v12 = vcombine.low %v2773_v51, %v2777_v52 }
 0x313   : > { %v9283_v37 = vcombine.high %v2765_v7, %v2769_v8  ;;  %v2629_v38 = vld [vmem:[#allocation10 + $0x348] sm:$0xff] }
 0x314   : > { %5817 = vmatpush1.bf16.msra.mxu1 %v9074_v41  ;;  %v2633_v39 = vld [vmem:[#allocation10 + $0x368] sm:$0xff] }
 0x315   : > { %5860 = vmatpush1.bf16.msra.mxu0 %v9202_v42  ;;  %5818 = vmatprep.subr.bf16.mxu1 %v9067_v43  ;;  %v2757_v41 = vld [vmem:[#allocation10 + $0x748] sm:$0xff]  ;;  %v9154_v43 = vcombine.low %v2637_v33, %v2641_v34  ;;  %v9147_v48 = vcombine.high %v2629_v38, %v2633_v39 }
 0x316   : > { %5861 = vmatprep.subr.bf16.mxu0 %v9195_v44  ;;  %v2761_v42 = vld [vmem:[#allocation10 + $0x768] sm:$0xff]  ;;  %v9282_v44 = vcombine.low %v2765_v7, %v2769_v8 }
 0x317   : > { %v9275_v50 = vcombine.high %v2757_v41, %v2761_v42  ;;  %v2621_v53 = vld [vmem:[#allocation10 + $0x308] sm:$0xff] }
 0x318   : > { %5819 = vmatpush1.bf16.msra.mxu1 %v9066_v55  ;;  %v2625_v54 = vld [vmem:[#allocation10 + $0x328] sm:$0xff] }
 0x319   : > { %5862 = vmatpush1.bf16.msra.mxu0 %v9194_v25  ;;  %5820 = vmatprep.subr.bf16.mxu1 %v9059_v60  ;;  %v2749_v55 = vld [vmem:[#allocation10 + $0x708] sm:$0xff]  ;;  %v9146_v60 = vcombine.low %v2629_v38, %v2633_v39  ;;  %v9139_v62 = vcombine.high %v2621_v53, %v2625_v54 }
 0x31a   : > { %5863 = vmatprep.subr.bf16.mxu0 %v9187_v61  ;;  %v2753_v25 = vld [vmem:[#allocation10 + $0x728] sm:$0xff]  ;;  %v9274_v61 = vcombine.low %v2757_v41, %v2761_v42 }
 0x31b   : > { %v9267_v1 = vcombine.high %v2749_v55, %v2753_v25  ;;  %v2613_v63 = vld [vmem:[#allocation10 + $0x2c8] sm:$0xff] }
 0x31c   : > { %5821 = vmatpush1.bf16.msra.mxu1 %v9058_v2  ;;  %v2617_v0 = vld [vmem:[#allocation10 + $0x2e8] sm:$0xff] }
 0x31d   : > { %5864 = vmatpush1.bf16.msra.mxu0 %v9186_v3  ;;  %5822 = vmatprep.subr.bf16.mxu1 %v9051_v4  ;;  %v2741_v2 = vld [vmem:[#allocation10 + $0x6c8] sm:$0xff]  ;;  %v9138_v4 = vcombine.low %v2621_v53, %v2625_v54  ;;  %v9131_v9 = vcombine.high %v2613_v63, %v2617_v0 }
 0x31e   : > { %5865 = vmatprep.subr.bf16.mxu0 %v9179_v5  ;;  %v2745_v3 = vld [vmem:[#allocation10 + $0x6e8] sm:$0xff]  ;;  %v9266_v5 = vcombine.low %v2749_v55, %v2753_v25 }
 0x31f   : > { %v9259_v13 = vcombine.high %v2741_v2, %v2745_v3  ;;  %v2605_v40 = vld [vmem:[#allocation10 + $0x288] sm:$0xff] }
 0x320   : > { %5823 = vmatpush1.bf16.msra.mxu1 %v9050_v17  ;;  %v2609_v16 = vld [vmem:[#allocation10 + $0x2a8] sm:$0xff] }
 0x321   : > { %5866 = vmatpush1.bf16.msra.mxu0 %v9178_v26  ;;  %5824 = vmatprep.subr.bf16.mxu1 %v9043_v45  ;;  %v2733_v17 = vld [vmem:[#allocation10 + $0x688] sm:$0xff]  ;;  %v9130_v45 = vcombine.low %v2613_v63, %v2617_v0  ;;  %v9123_v47 = vcombine.high %v2605_v40, %v2609_v16 }
 0x322   : > { %5867 = vmatprep.subr.bf16.mxu0 %v9171_v46  ;;  %v2737_v26 = vld [vmem:[#allocation10 + $0x6a8] sm:$0xff]  ;;  %v9258_v46 = vcombine.low %v2741_v2, %v2745_v3 }
 0x323   : > { %v9251_v49 = vcombine.high %v2733_v17, %v2737_v26  ;;  %v2597_v51 = vld [vmem:[#allocation10 + $0x248] sm:$0xff] }
 0x324   : > { %5825 = vmatpush1.bf16.msra.mxu1 %v9042_v27  ;;  %v2601_v52 = vld [vmem:[#allocation10 + $0x268] sm:$0xff] }
 0x325   : > { %5868 = vmatpush1.bf16.msra.mxu0 %v9170_v28  ;;  %5826 = vmatprep.subr.bf16.mxu1 %v9163_v31  ;;  %v2725_v27 = vld [vmem:[#allocation10 + $0x648] sm:$0xff]  ;;  %v9122_v31 = vcombine.low %v2605_v40, %v2609_v16  ;;  %v9115_v33 = vcombine.high %v2597_v51, %v2601_v52 }
 0x326   : > { %5869 = vmatprep.subr.bf16.mxu0 %v9291_v32  ;;  %v2729_v28 = vld [vmem:[#allocation10 + $0x668] sm:$0xff]  ;;  %v9250_v32 = vcombine.low %v2733_v17, %v2737_v26 }
 0x327   : > { %v9243_v34 = vcombine.high %v2725_v27, %v2729_v28  ;;  %v2589_v7 = vld [vmem:[#allocation10 + $0x208] sm:$0xff] }
 0x328   : > { %5827 = vmatpush2.bf16.msra.mxu1 %v9162_v10  ;;  %v2593_v8 = vld [vmem:[#allocation10 + $0x228] sm:$0xff] }
 0x329   : > { %5870 = vmatpush2.bf16.msra.mxu0 %v9290_v12  ;;  %5828 = vmatprep.subr.bf16.mxu1 %v9155_v36  ;;  %v2717_v10 = vld [vmem:[#allocation10 + $0x608] sm:$0xff]  ;;  %v9114_v36 = vcombine.low %v2597_v51, %v2601_v52  ;;  %v9107_v38 = vcombine.high %v2589_v7, %v2593_v8 }
 0x32a   : > { %5871 = vmatprep.subr.bf16.mxu0 %v9283_v37  ;;  %v2721_v12 = vld [vmem:[#allocation10 + $0x628] sm:$0xff]  ;;  %v9242_v37 = vcombine.low %v2725_v27, %v2729_v28 }
 0x32b   : > { %v9235_v39 = vcombine.high %v2717_v10, %v2721_v12  ;;  %v2837_v41 = vld [vmem:[#allocation10 + $0x9c8] sm:$0xff] }
 0x32c   : > { %5829 = vmatpush2.bf16.msra.mxu1 %v9154_v43  ;;  %v2841_v42 = vld [vmem:[#allocation10 + $0x9e8] sm:$0xff] }
 0x32d   : > { %5872 = vmatpush2.bf16.msra.mxu0 %v9282_v44  ;;  %5830 = vmatprep.subr.bf16.mxu1 %v9147_v48  ;;  %v2965_v43 = vld [vmem:[#allocation10 + $0xdc8] sm:$0xff]  ;;  %v9106_v48 = vcombine.low %v2589_v7, %v2593_v8  ;;  %v9355_v53 = vcombine.high %v2837_v41, %v2841_v42 }
 0x32e   : > { %5873 = vmatprep.subr.bf16.mxu0 %v9275_v50  ;;  %v2969_v44 = vld [vmem:[#allocation10 + $0xde8] sm:$0xff]  ;;  %v9234_v50 = vcombine.low %v2717_v10, %v2721_v12 }
 0x32f   : > { %v9483_v54 = vcombine.high %v2965_v43, %v2969_v44  ;;  %v2829_v55 = vld [vmem:[#allocation10 + $0x988] sm:$0xff] }
 0x330   : > { %5831 = vmatpush2.bf16.msra.mxu1 %v9146_v60  ;;  %v2833_v25 = vld [vmem:[#allocation10 + $0x9a8] sm:$0xff]  ;;  %v9354_v60 = vcombine.low %v2837_v41, %v2841_v42 }
 0x331   : > { %5874 = vmatpush2.bf16.msra.mxu0 %v9274_v61  ;;  %5832 = vmatprep.subr.bf16.mxu1 %v9139_v62  ;;  %v2957_v61 = vld [vmem:[#allocation10 + $0xd88] sm:$0xff]  ;;  %v9347_v63 = vcombine.high %v2829_v55, %v2833_v25 }
 0x332   : > { %5875 = vmatprep.subr.bf16.mxu0 %v9267_v1  ;;  %v2961_v62 = vld [vmem:[#allocation10 + $0xda8] sm:$0xff]  ;;  %v9482_v1 = vcombine.low %v2965_v43, %v2969_v44 }
 0x333   : > { %v2821_v0 = vld [vmem:[#allocation10 + $0x948] sm:$0xff]  ;;  %v9475_v3 = vcombine.high %v2957_v61, %v2961_v62 }
 0x334   : > { %5833 = vmatpush2.bf16.msra.mxu1 %v9138_v4  ;;  %v2825_v2 = vld [vmem:[#allocation10 + $0x968] sm:$0xff] }
 0x335   : > { %5876 = vmatpush2.bf16.msra.mxu0 %v9266_v5  ;;  %5834 = vmatprep.subr.bf16.mxu1 %v9131_v9  ;;  %v2949_v4 = vld [vmem:[#allocation10 + $0xd48] sm:$0xff]  ;;  %v9346_v9 = vcombine.low %v2829_v55, %v2833_v25  ;;  %v9339_v40 = vcombine.high %v2821_v0, %v2825_v2 }
 0x336   : > { %5877 = vmatprep.subr.bf16.mxu0 %v9259_v13  ;;  %v2953_v5 = vld [vmem:[#allocation10 + $0xd68] sm:$0xff]  ;;  %v9474_v13 = vcombine.low %v2957_v61, %v2961_v62 }
 0x337   : > { %v9467_v16 = vcombine.high %v2949_v4, %v2953_v5  ;;  %v2813_v17 = vld [vmem:[#allocation10 + $0x908] sm:$0xff] }
 0x338   : > { %5835 = vmatpush2.bf16.msra.mxu1 %v9130_v45  ;;  %v2817_v26 = vld [vmem:[#allocation10 + $0x928] sm:$0xff] }
 0x339   : > { %5878 = vmatpush2.bf16.msra.mxu0 %v9258_v46  ;;  %5836 = vmatprep.subr.bf16.mxu1 %v9123_v47  ;;  %v2941_v45 = vld [vmem:[#allocation10 + $0xd08] sm:$0xff]  ;;  %v9338_v47 = vcombine.low %v2821_v0, %v2825_v2  ;;  %v9331_v51 = vcombine.high %v2813_v17, %v2817_v26 }
 0x33a   : > { %5879 = vmatprep.subr.bf16.mxu0 %v9251_v49  ;;  %v2945_v46 = vld [vmem:[#allocation10 + $0xd28] sm:$0xff]  ;;  %v9466_v49 = vcombine.low %v2949_v4, %v2953_v5 }
 0x33b   : > { %v9459_v52 = vcombine.high %v2941_v45, %v2945_v46  ;;  %v2805_v27 = vld [vmem:[#allocation10 + $0x8c8] sm:$0xff] }
 0x33c   : > { %5837 = vmatpush2.bf16.msra.mxu1 %v9122_v31  ;;  %v2809_v28 = vld [vmem:[#allocation10 + $0x8e8] sm:$0xff] }
 0x33d   : > { %5880 = vmatpush2.bf16.msra.mxu0 %v9250_v32  ;;  %5838 = vmatprep.subr.bf16.mxu1 %v9115_v33  ;;  %v2933_v31 = vld [vmem:[#allocation10 + $0xcc8] sm:$0xff]  ;;  %v9330_v33 = vcombine.low %v2813_v17, %v2817_v26  ;;  %v9323_v7 = vcombine.high %v2805_v27, %v2809_v28 }
 0x33e   : > { %5881 = vmatprep.subr.bf16.mxu0 %v9243_v34  ;;  %v2937_v32 = vld [vmem:[#allocation10 + $0xce8] sm:$0xff]  ;;  %v9458_v34 = vcombine.low %v2941_v45, %v2945_v46 }
 0x33f   : > { %v9451_v8 = vcombine.high %v2933_v31, %v2937_v32  ;;  %v2797_v10 = vld [vmem:[#allocation10 + $0x888] sm:$0xff] }
 0x340   : > { %5839 = vmatpush2.bf16.msra.mxu1 %v9114_v36  ;;  %v2801_v12 = vld [vmem:[#allocation10 + $0x8a8] sm:$0xff] }
 0x341   : > { %5882 = vmatpush2.bf16.msra.mxu0 %v9242_v37  ;;  %5840 = vmatprep.subr.bf16.mxu1 %v9107_v38  ;;  %v2925_v36 = vld [vmem:[#allocation10 + $0xc88] sm:$0xff]  ;;  %v9322_v38 = vcombine.low %v2805_v27, %v2809_v28  ;;  %v9315_v41 = vcombine.high %v2797_v10, %v2801_v12 }
 0x342   : > { %5883 = vmatprep.subr.bf16.mxu0 %v9235_v39  ;;  %v2929_v37 = vld [vmem:[#allocation10 + $0xca8] sm:$0xff]  ;;  %v9450_v39 = vcombine.low %v2933_v31, %v2937_v32 }
 0x343   : > { %v9443_v42 = vcombine.high %v2925_v36, %v2929_v37  ;;  %v2789_v43 = vld [vmem:[#allocation10 + $0x848] sm:$0xff] }
 0x344   : > { %5841 = vmatpush2.bf16.msra.mxu1 %v9106_v48  ;;  %v2793_v44 = vld [vmem:[#allocation10 + $0x868] sm:$0xff] }
 0x345   : > { %5884 = vmatpush2.bf16.msra.mxu0 %v9234_v50  ;;  %5896 = vmatprep.subr.bf16.mxu1 %v9355_v53  ;;  %v2917_v48 = vld [vmem:[#allocation10 + $0xc48] sm:$0xff]  ;;  %v9314_v53 = vcombine.low %v2797_v10, %v2801_v12  ;;  %v9307_v55 = vcombine.high %v2789_v43, %v2793_v44 }
 0x346   : > { %5939 = vmatprep.subr.bf16.mxu0 %v9483_v54  ;;  %v2921_v50 = vld [vmem:[#allocation10 + $0xc68] sm:$0xff]  ;;  %v9442_v54 = vcombine.low %v2925_v36, %v2929_v37 }
 0x347   : > { %5843 = vmatmul.mubr.bf16.vlgmr.msra.gmra.mxu1 %v11386_v58  ;;  %v9435_v25 = vcombine.high %v2917_v48, %v2921_v50  ;;  %v2785_v61 = vld [vmem:[#allocation10 + $0x828] sm:$0xff]  ;;  %v9434_v0 = vcombine.low %v2917_v48, %v2921_v50 }
 0x348   : > { %5886 = vmatmul.mubr.bf16.vlgmr.msra.gmra.mxu0 %v11388_v59  ;;  %5897 = vmatpush1.bf16.msra.mxu1 %v9354_v60  ;;  %v2781_v60 = vld [vmem:[#allocation10 + $0x808] sm:$0xff] }
 0x349   : > { %5928 = vmatprep.mubr.bf16.mxu1 %v11416_v35  ;;  %5940 = vmatpush1.bf16.msra.mxu0 %v9482_v1  ;;  %v2909_v62 = vld [vmem:[#allocation10 + $0xc08] sm:$0xff]  ;;  %v9299_v2 = vcombine.high %v2781_v60, %v2785_v61 }
 0x34a   : > { %5971 = vmatprep.mubr.bf16.mxu0 %v11418_v6  ;;  %5898 = vmatprep.subr.bf16.mxu1 %v9347_v63  ;;  %v2913_v1 = vld [vmem:[#allocation10 + $0xc28] sm:$0xff]  ;;  %v9306_v63 = vcombine.low %v2789_v43, %v2793_v44 }
 0x34b   : > { %5941 = vmatprep.subr.bf16.mxu0 %v9475_v3  ;;  %v9427_v3 = vcombine.high %v2909_v62, %v2913_v1  ;;  %v2901_v4 = vld [vmem:[#allocation10 + $0xbc8] sm:$0xff] }
 0x34c   : > { %5899 = vmatpush1.bf16.msra.mxu1 %v9346_v9  ;;  %v2905_v5 = vld [vmem:[#allocation10 + $0xbe8] sm:$0xff] }
 0x34d   : > { %5942 = vmatpush1.bf16.msra.mxu0 %v9474_v13  ;;  %5900 = vmatprep.subr.bf16.mxu1 %v9339_v40  ;;  %v3029_v9 = vld [vmem:[#allocation10 + $0xfc8] sm:$0xff]  ;;  %v9298_v40 = vcombine.low %v2781_v60, %v2785_v61  ;;  %v9419_v17 = vcombine.high %v2901_v4, %v2905_v5 }
 0x34e   : > { %5943 = vmatprep.subr.bf16.mxu0 %v9467_v16  ;;  %v3033_v13 = vld [vmem:[#allocation10 + $0xfe8] sm:$0xff]  ;;  %v9426_v16 = vcombine.low %v2909_v62, %v2913_v1 }
 0x34f   : > { %v9547_v26 = vcombine.high %v3029_v9, %v3033_v13  ;;  %v2893_v45 = vld [vmem:[#allocation10 + $0xb88] sm:$0xff] }
 0x350   : > { %5901 = vmatpush1.bf16.msra.mxu1 %v9338_v47  ;;  %v2897_v46 = vld [vmem:[#allocation10 + $0xba8] sm:$0xff] }
 0x351   : > { %5944 = vmatpush1.bf16.msra.mxu0 %v9466_v49  ;;  %5902 = vmatprep.subr.bf16.mxu1 %v9331_v51  ;;  %v3021_v47 = vld [vmem:[#allocation10 + $0xf88] sm:$0xff]  ;;  %v9418_v51 = vcombine.low %v2901_v4, %v2905_v5  ;;  %v9411_v27 = vcombine.high %v2893_v45, %v2897_v46 }
 0x352   : > { %5945 = vmatprep.subr.bf16.mxu0 %v9459_v52  ;;  %v3025_v49 = vld [vmem:[#allocation10 + $0xfa8] sm:$0xff]  ;;  %v9546_v52 = vcombine.low %v3029_v9, %v3033_v13 }
 0x353   : > { %v9539_v28 = vcombine.high %v3021_v47, %v3025_v49  ;;  %v2885_v31 = vld [vmem:[#allocation10 + $0xb48] sm:$0xff] }
 0x354   : > { %5903 = vmatpush1.bf16.msra.mxu1 %v9330_v33  ;;  %v2889_v32 = vld [vmem:[#allocation10 + $0xb68] sm:$0xff] }
 0x355   : > { %5946 = vmatpush1.bf16.msra.mxu0 %v9458_v34  ;;  %5904 = vmatprep.subr.bf16.mxu1 %v9323_v7  ;;  %v3013_v33 = vld [vmem:[#allocation10 + $0xf48] sm:$0xff]  ;;  %v9410_v7 = vcombine.low %v2893_v45, %v2897_v46  ;;  %v9403_v10 = vcombine.high %v2885_v31, %v2889_v32 }
 0x356   : > { %5947 = vmatprep.subr.bf16.mxu0 %v9451_v8  ;;  %v3017_v34 = vld [vmem:[#allocation10 + $0xf68] sm:$0xff]  ;;  %v9538_v8 = vcombine.low %v3021_v47, %v3025_v49 }
 0x357   : > { %v9531_v12 = vcombine.high %v3013_v33, %v3017_v34  ;;  %v2877_v36 = vld [vmem:[#allocation10 + $0xb08] sm:$0xff] }
 0x358   : > { %5905 = vmatpush1.bf16.msra.mxu1 %v9322_v38  ;;  %v2881_v37 = vld [vmem:[#allocation10 + $0xb28] sm:$0xff] }
 0x359   : > { %5948 = vmatpush1.bf16.msra.mxu0 %v9450_v39  ;;  %5906 = vmatprep.subr.bf16.mxu1 %v9315_v41  ;;  %v3005_v38 = vld [vmem:[#allocation10 + $0xf08] sm:$0xff]  ;;  %v9402_v41 = vcombine.low %v2885_v31, %v2889_v32  ;;  %v9395_v43 = vcombine.high %v2877_v36, %v2881_v37 }
 0x35a   : > { %5949 = vmatprep.subr.bf16.mxu0 %v9443_v42  ;;  %v3009_v39 = vld [vmem:[#allocation10 + $0xf28] sm:$0xff]  ;;  %v9530_v42 = vcombine.low %v3013_v33, %v3017_v34  ;;  %v2582_v33 = vld [vmem:[#allocation10 + $0x1d0] sm:$0xff] }
 0x35b   : > { %v9523_v44 = vcombine.high %v3005_v38, %v3009_v39  ;;  %v2869_v48 = vld [vmem:[#allocation10 + $0xac8] sm:$0xff]  ;;  %v2586_v34 = vld [vmem:[#allocation10 + $0x1f0] sm:$0xff] }
 0x35c   : > { %5907 = vmatpush1.bf16.msra.mxu1 %v9314_v53  ;;  %v2873_v50 = vld [vmem:[#allocation10 + $0xae8] sm:$0xff] }
 0x35d   : > { %5950 = vmatpush1.bf16.msra.mxu0 %v9442_v54  ;;  %5908 = vmatprep.subr.bf16.mxu1 %v9307_v55  ;;  %v2997_v53 = vld [vmem:[#allocation10 + $0xec8] sm:$0xff]  ;;  %v9394_v55 = vcombine.low %v2877_v36, %v2881_v37  ;;  %v9387_v60 = vcombine.high %v2869_v48, %v2873_v50  ;;  %v9101_v36 = vcombine.high %v2582_v33, %v2586_v34  ;;  %v11446_v37 = vld [vmem:[#allocation12] sm:$0xff] }
 0x35e   : > { %5951 = vmatprep.subr.bf16.mxu0 %v9435_v25  ;;  %v3001_v54 = vld [vmem:[#allocation10 + $0xee8] sm:$0xff]  ;;  %v9522_v25 = vcombine.low %v3005_v38, %v3009_v39  ;;  %v2574_v39 = vld [vmem:[#allocation10 + $0x190] sm:$0xff] }
 0x35f   : > { %v9515_v61 = vcombine.high %v2997_v53, %v3001_v54  ;;  %v2861_v62 = vld [vmem:[#allocation10 + $0xa88] sm:$0xff] }
 0x360   : > { %5909 = vmatpush1.bf16.msra.mxu1 %v9306_v63  ;;  %v2865_v1 = vld [vmem:[#allocation10 + $0xaa8] sm:$0xff] }
 0x361   : > { %5952 = vmatpush1.bf16.msra.mxu0 %v9434_v0  ;;  %5910 = vmatprep.subr.bf16.mxu1 %v9299_v2  ;;  %v2989_v63 = vld [vmem:[#allocation10 + $0xe88] sm:$0xff]  ;;  %v9386_v2 = vcombine.low %v2869_v48, %v2873_v50  ;;  %v9379_v4 = vcombine.high %v2861_v62, %v2865_v1  ;;  %v2706_v48 = vld [vmem:[#allocation10 + $0x5b0] sm:$0xff] }
 0x362   : > { %5953 = vmatprep.subr.bf16.mxu0 %v9427_v3  ;;  %v2993_v0 = vld [vmem:[#allocation10 + $0xea8] sm:$0xff]  ;;  %v9514_v3 = vcombine.low %v2997_v53, %v3001_v54  ;;  %v2566_v54 = vld [vmem:[#allocation10 + $0x150] sm:$0xff] }
 0x363   : > { %v9507_v5 = vcombine.high %v2989_v63, %v2993_v0  ;;  %v2853_v9 = vld [vmem:[#allocation10 + $0xa48] sm:$0xff] }
 0x364   : > { %5911 = vmatpush1.bf16.msra.mxu1 %v9298_v40  ;;  %v2857_v13 = vld [vmem:[#allocation10 + $0xa68] sm:$0xff] }
 0x365   : > { %5954 = vmatpush1.bf16.msra.mxu0 %v9426_v16  ;;  %5912 = vmatprep.subr.bf16.mxu1 %v9419_v17  ;;  %v2981_v40 = vld [vmem:[#allocation10 + $0xe48] sm:$0xff]  ;;  %v9378_v17 = vcombine.low %v2861_v62, %v2865_v1  ;;  %v9371_v45 = vcombine.high %v2853_v9, %v2857_v13  ;;  %v2694_v62 = vld [vmem:[#allocation10 + $0x550] sm:$0xff] }
 0x366   : > { %5955 = vmatprep.subr.bf16.mxu0 %v9547_v26  ;;  %v2985_v16 = vld [vmem:[#allocation10 + $0xe68] sm:$0xff]  ;;  %v9506_v26 = vcombine.low %v2989_v63, %v2993_v0  ;;  %v2698_v1 = vld [vmem:[#allocation10 + $0x570] sm:$0xff] }
 0x367   : > { %v9499_v46 = vcombine.high %v2981_v40, %v2985_v16  ;;  %v2845_v47 = vld [vmem:[#allocation10 + $0xa08] sm:$0xff] }
 0x368   : > { %5913 = vmatpush2.bf16.msra.mxu1 %v9418_v51  ;;  %v2849_v49 = vld [vmem:[#allocation10 + $0xa28] sm:$0xff] }
 0x369   : > { %5956 = vmatpush2.bf16.msra.mxu0 %v9546_v52  ;;  %5914 = vmatprep.subr.bf16.mxu1 %v9411_v27  ;;  %v2973_v51 = vld [vmem:[#allocation10 + $0xe08] sm:$0xff]  ;;  %v9370_v27 = vcombine.low %v2853_v9, %v2857_v13  ;;  %v9363_v31 = vcombine.high %v2845_v47, %v2849_v49  ;;  %v9213_v13 = vcombine.high %v2694_v62, %v2698_v1 }
 0x36a   : > { %5957 = vmatprep.subr.bf16.mxu0 %v9539_v28  ;;  %v2977_v52 = vld [vmem:[#allocation10 + $0xe28] sm:$0xff]  ;;  %v9498_v28 = vcombine.low %v2981_v40, %v2985_v16  ;;  %v2558_v40 = vld [vmem:[#allocation10 + $0x110] sm:$0xff] }
 0x36b   : > { %v9491_v32 = vcombine.high %v2973_v51, %v2977_v52  ;;  %v2562_v16 = vld [vmem:[#allocation10 + $0x130] sm:$0xff] }
 0x36c   : > { %5915 = vmatpush2.bf16.msra.mxu1 %v9410_v7  ;;  %v2710_v7 = vld [vmem:[#allocation10 + $0x5d0] sm:$0xff] }
 0x36d   : > { %5958 = vmatpush2.bf16.msra.mxu0 %v9538_v8  ;;  %5916 = vmatprep.subr.bf16.mxu1 %v9403_v10  ;;  %v2714_v8 = vld [vmem:[#allocation10 + $0x5f0] sm:$0xff]  ;;  %v9362_v10 = vcombine.low %v2845_v47, %v2849_v49 }
 0x36e   : > { %5959 = vmatprep.subr.bf16.mxu0 %v9531_v12  ;;  %v9490_v12 = vcombine.low %v2973_v51, %v2977_v52  ;;  %v9229_v38 = vcombine.high %v2710_v7, %v2714_v8  ;;  %v9228_v50 = vcombine.low %v2710_v7, %v2714_v8  ;;  %v9212_v51 = vcombine.low %v2694_v62, %v2698_v1  ;;  %v2526_v1 = vld [vmem:[#allocation10 + $0x10] sm:$0xff] }
 0x36f   : > { %v9077_v52 = vcombine.high %v2558_v40, %v2562_v16  ;;  %v9076_v7 = vcombine.low %v2558_v40, %v2562_v16 }
 0x370   : > { %5917 = vmatpush2.bf16.msra.mxu1 %v9402_v41  ;;  %v2578_v41 = vld [vmem:[#allocation10 + $0x1b0] sm:$0xff] }
 0x371   : > { %5960 = vmatpush2.bf16.msra.mxu0 %v9530_v42  ;;  %5918 = vmatprep.subr.bf16.mxu1 %v9395_v43  ;;  %v9100_v42 = vcombine.low %v2582_v33, %v2586_v34  ;;  %v3041_v43 = vrot.slane %v11446_v37, %v11367_v23  ;;  %v9093_v53 = vcombine.high %v2574_v39, %v2578_v41  ;;  %v2678_v33 = vld [vmem:[#allocation10 + $0x4d0] sm:$0xff] }
 0x372   : > { %5961 = vmatprep.subr.bf16.mxu0 %v9523_v44  ;;  %v2702_v44 = vld [vmem:[#allocation10 + $0x590] sm:$0xff]  ;;  %v9092_v0 = vcombine.low %v2574_v39, %v2578_v41 }
 0x373   : > { %v2682_v34 = vld [vmem:[#allocation10 + $0x4f0] sm:$0xff] }
 0x374   : > { %5919 = vmatpush2.bf16.msra.mxu1 %v9394_v55  ;;  %v2570_v55 = vld [vmem:[#allocation10 + $0x170] sm:$0xff] }
 0x375   : > { %5962 = vmatpush2.bf16.msra.mxu0 %v9522_v25  ;;  %5920 = vmatprep.subr.bf16.mxu1 %v9387_v60  ;;  %v9084_v47 = vcombine.low %v2566_v54, %v2570_v55  ;;  %v2670_v39 = vld [vmem:[#allocation10 + $0x490] sm:$0xff] }
 0x376   : > { %5963 = vmatprep.subr.bf16.mxu0 %v9515_v61  ;;  %v9221_v61 = vcombine.high %v2702_v44, %v2706_v48  ;;  %v2674_v41 = vld [vmem:[#allocation10 + $0x4b0] sm:$0xff] }
 0x378   : > { %5921 = vmatpush2.bf16.msra.mxu1 %v9386_v2 }
 0x379   : > { %5964 = vmatpush2.bf16.msra.mxu0 %v9514_v3  ;;  %5922 = vmatprep.subr.bf16.mxu1 %v9379_v4  ;;  %v9220_v4 = vcombine.low %v2702_v44, %v2706_v48  ;;  %v9189_v48 = vcombine.high %v2670_v39, %v2674_v41 }
 0x37a   : > { %5965 = vmatprep.subr.bf16.mxu0 %v9507_v5  ;;  %v9085_v5 = vcombine.high %v2566_v54, %v2570_v55  ;;  %v2662_v54 = vld [vmem:[#allocation10 + $0x450] sm:$0xff] }
 0x37b   : > { %v2666_v55 = vld [vmem:[#allocation10 + $0x470] sm:$0xff] }
 0x37c   : > { %5923 = vmatpush2.bf16.msra.mxu1 %v9378_v17  ;;  %v9181_v62 = vcombine.high %v2662_v54, %v2666_v55 }
 0x37d   : > { %5966 = vmatpush2.bf16.msra.mxu0 %v9506_v26  ;;  %5924 = vmatprep.subr.bf16.mxu1 %v9371_v45  ;;  %v2686_v26 = vld [vmem:[#allocation10 + $0x510] sm:$0xff] }
 0x37e   : > { %5967 = vmatprep.subr.bf16.mxu0 %v9499_v46  ;;  %v2690_v45 = vld [vmem:[#allocation10 + $0x530] sm:$0xff] }
 0x37f   : > { %v9204_v8 = vcombine.low %v2686_v26, %v2690_v45 }
 0x380   : > { %5925 = vmatpush2.bf16.msra.mxu1 %v9370_v27 }
 0x381   : > { %5968 = vmatpush2.bf16.msra.mxu0 %v9498_v28  ;;  %5926 = vmatprep.subr.bf16.mxu1 %v9363_v31  ;;  %v9205_v28 = vcombine.high %v2686_v26, %v2690_v45  ;;  %v2550_v31 = vld [vmem:[#allocation10 + $0xd0] sm:$0xff] }
 0x382   : > { %5969 = vmatprep.subr.bf16.mxu0 %v9491_v32  ;;  %v2554_v32 = vld [vmem:[#allocation10 + $0xf0] sm:$0xff] }
 0x383   : > { %v2650_v26 = vld [vmem:[#allocation10 + $0x3f0] sm:$0xff] }
 0x384   : > { %5927 = vmatpush2.bf16.msra.mxu1 %v9362_v10  ;;  %v9069_v10 = vcombine.high %v2550_v31, %v2554_v32  ;;  %v2774_v45 = vld [vmem:[#allocation10 + $0x7d0] sm:$0xff] }
 0x385   : > { %5970 = vmatpush2.bf16.msra.mxu0 %v9490_v12  ;;  %5982 = vmatprep.subr.bf16.mxu1 %v9101_v36  ;;  %v9197_v12 = vcombine.high %v2678_v33, %v2682_v34  ;;  %v2542_v36 = vld [vmem:[#allocation10 + $0x90] sm:$0xff] }
 0x386   : > { %6025 = vmatprep.subr.bf16.mxu0 %v9229_v38  ;;  %v2546_v38 = vld [vmem:[#allocation10 + $0xb0] sm:$0xff] }
 0x387   : > { %5929 = vmatmul.mubr.bf16.vlgmr.msra.gmra.mxu1 %v11434_v14  ;;  %v5672_v25 = vpop.f32.mrf.mxu1  ;;  %v5715_v60 = vpop.f32.mrf.mxu0  ;;  %v9061_v44 = vcombine.high %v2542_v36, %v2546_v38 }
 0x388   : > { %5972 = vmatmul.mubr.bf16.vlgmr.msra.gmra.mxu0 %v11436_v15  ;;  %v5673_v63 = vadd.f32 %v5672_v25, %v3041_v43  ;;  %5983 = vmatpush1.bf16.msra.mxu1 %v9100_v42  ;;  %v9068_v42 = vcombine.low %v2550_v31, %v2554_v32  ;;  %v9060_v25 = vcombine.low %v2542_v36, %v2546_v38  ;;  %v2642_v31 = vld [vmem:[#allocation10 + $0x3b0] sm:$0xff] }
 0x389   : > { %6014 = vmatprep.mubr.bf16.mxu1 %v11382_v56  ;;  %6026 = vmatpush1.bf16.msra.mxu0 %v9228_v50  ;;  %v11453_v2 = vpop.f32.mrf.mxu1  ;;  %v11455_v3 = vpop.f32.mrf.mxu0  ;;  %v2534_v50 = vld [vmem:[#allocation10 + $0x50] sm:$0xff] }
 0x38a   : > { %v11457_v9 = vadd.f32 %v5715_v60, %v5673_v63  ;;  %6057 = vmatprep.mubr.bf16.mxu0 %v11384_v57  ;;  %5984 = vmatprep.subr.bf16.mxu1 %v9093_v53  ;;  %v2538_v53 = vld [vmem:[#allocation10 + $0x70] sm:$0xff]  ;;  %v9188_v60 = vcombine.low %v2670_v39, %v2674_v41 }
 0x38b   : > { %6027 = vmatprep.subr.bf16.mxu0 %v9221_v61  ;;  %v5676_v17 = vpop.f32.mrf.mxu1  ;;  %v5719_v49 = vpop.f32.mrf.mxu0  ;;  %v9053_v61 = vcombine.high %v2534_v50, %v2538_v53  ;;  %v2530_v63 = vld [vmem:[#allocation10 + $0x30] sm:$0xff] }
 0x38c   : > { %v5677_v46 = vadd.f32 %v5676_v17, %v3041_v43  ;;  %5985 = vmatpush1.bf16.msra.mxu1 %v9092_v0  ;;  %v9196_v43 = vcombine.low %v2678_v33, %v2682_v34  ;;  %v2654_v0 = vld [vmem:[#allocation10 + $0x410] sm:$0xff]  ;;  %v9045_v40 = vcombine.high %v2526_v1, %v2530_v63 }
 0x38d   : > { %6028 = vmatpush1.bf16.msra.mxu0 %v9220_v4  ;;  %5986 = vmatprep.subr.bf16.mxu1 %v9085_v5  ;;  %v2658_v4 = vld [vmem:[#allocation10 + $0x430] sm:$0xff]  ;;  %v9052_v5 = vcombine.low %v2534_v50, %v2538_v53 }
 0x38e   : > { %v11460_v27 = vadd.f32 %v5719_v49, %v5677_v46  ;;  %6029 = vmatprep.subr.bf16.mxu0 %v9213_v13  ;;  %v9180_v13 = vcombine.low %v2662_v54, %v2666_v55  ;;  %v9173_v16 = vcombine.high %v2654_v0, %v2658_v4  ;;  %v2646_v17 = vld [vmem:[#allocation10 + $0x3d0] sm:$0xff]  ;;  %v9172_v49 = vcombine.low %v2654_v0, %v2658_v4 }
 0x38f   : > { %v2778_v46 = vld [vmem:[#allocation10 + $0x7f0] sm:$0xff]  ;;  %v9164_v34 = vcombine.low %v2646_v17, %v2650_v26 }
 0x390   : > { %5987 = vmatpush1.bf16.msra.mxu1 %v9084_v47  ;;  %v9044_v47 = vcombine.low %v2526_v1, %v2530_v63  ;;  %v2766_v32 = vld [vmem:[#allocation10 + $0x790] sm:$0xff] }
 0x391   : > { %6030 = vmatpush1.bf16.msra.mxu0 %v9212_v51  ;;  %5988 = vmatprep.subr.bf16.mxu1 %v9077_v52  ;;  %v9165_v51 = vcombine.high %v2646_v17, %v2650_v26  ;;  %v9293_v52 = vcombine.high %v2774_v45, %v2778_v46  ;;  %v2770_v33 = vld [vmem:[#allocation10 + $0x7b0] sm:$0xff] }
 0x392   : > { %6031 = vmatprep.subr.bf16.mxu0 %v9205_v28  ;;  %v2638_v28 = vld [vmem:[#allocation10 + $0x390] sm:$0xff] }
 0x393   : > { %v2634_v36 = vld [vmem:[#allocation10 + $0x370] sm:$0xff]  ;;  %v9156_v41 = vcombine.low %v2638_v28, %v2642_v31 }
 0x394   : > { %5989 = vmatpush1.bf16.msra.mxu1 %v9076_v7  ;;  %v9292_v7 = vcombine.low %v2774_v45, %v2778_v46  ;;  %v2758_v38 = vld [vmem:[#allocation10 + $0x750] sm:$0xff] }
 0x395   : > { %6032 = vmatpush1.bf16.msra.mxu0 %v9204_v8  ;;  %5990 = vmatprep.subr.bf16.mxu1 %v9069_v10  ;;  %v9157_v8 = vcombine.high %v2638_v28, %v2642_v31  ;;  %v9285_v10 = vcombine.high %v2766_v32, %v2770_v33  ;;  %v2762_v39 = vld [vmem:[#allocation10 + $0x770] sm:$0xff] }
 0x396   : > { %6033 = vmatprep.subr.bf16.mxu0 %v9197_v12  ;;  %v2630_v12 = vld [vmem:[#allocation10 + $0x350] sm:$0xff] }
 0x397   : > { %v2626_v50 = vld [vmem:[#allocation10 + $0x330] sm:$0xff]  ;;  %v9148_v55 = vcombine.low %v2630_v12, %v2634_v36 }
 0x398   : > { %5991 = vmatpush1.bf16.msra.mxu1 %v9068_v42  ;;  %v9284_v42 = vcombine.low %v2766_v32, %v2770_v33  ;;  %v2750_v53 = vld [vmem:[#allocation10 + $0x710] sm:$0xff] }
 0x399   : > { %6034 = vmatpush1.bf16.msra.mxu0 %v9196_v43  ;;  %5992 = vmatprep.subr.bf16.mxu1 %v9061_v44  ;;  %v9149_v43 = vcombine.high %v2630_v12, %v2634_v36  ;;  %v9277_v44 = vcombine.high %v2758_v38, %v2762_v39  ;;  %v2754_v54 = vld [vmem:[#allocation10 + $0x730] sm:$0xff] }
 0x39a   : > { %6035 = vmatprep.subr.bf16.mxu0 %v9189_v48  ;;  %v2622_v48 = vld [vmem:[#allocation10 + $0x310] sm:$0xff] }
 0x39b   : > { %v2618_v1 = vld [vmem:[#allocation10 + $0x2f0] sm:$0xff]  ;;  %v9140_v4 = vcombine.low %v2622_v48, %v2626_v50 }
 0x39c   : > { %5993 = vmatpush1.bf16.msra.mxu1 %v9060_v25  ;;  %v9276_v25 = vcombine.low %v2758_v38, %v2762_v39  ;;  %v2742_v63 = vld [vmem:[#allocation10 + $0x6d0] sm:$0xff] }
 0x39d   : > { %6036 = vmatpush1.bf16.msra.mxu0 %v9188_v60  ;;  %5994 = vmatprep.subr.bf16.mxu1 %v9053_v61  ;;  %v9141_v60 = vcombine.high %v2622_v48, %v2626_v50  ;;  %v9269_v61 = vcombine.high %v2750_v53, %v2754_v54  ;;  %v2746_v0 = vld [vmem:[#allocation10 + $0x6f0] sm:$0xff] }
 0x39e   : > { %6037 = vmatprep.subr.bf16.mxu0 %v9181_v62  ;;  %v2614_v62 = vld [vmem:[#allocation10 + $0x2d0] sm:$0xff] }
 0x39f   : > { %v2610_v17 = vld [vmem:[#allocation10 + $0x2b0] sm:$0xff]  ;;  %v9132_v46 = vcombine.low %v2614_v62, %v2618_v1 }
 0x3a0   : > { %5995 = vmatpush1.bf16.msra.mxu1 %v9052_v5  ;;  %v9268_v5 = vcombine.low %v2750_v53, %v2754_v54  ;;  %v2734_v26 = vld [vmem:[#allocation10 + $0x690] sm:$0xff] }
 0x3a1   : > { %6038 = vmatpush1.bf16.msra.mxu0 %v9180_v13  ;;  %5996 = vmatprep.subr.bf16.mxu1 %v9045_v40  ;;  %v9133_v13 = vcombine.high %v2614_v62, %v2618_v1  ;;  %v9261_v40 = vcombine.high %v2742_v63, %v2746_v0  ;;  %v2738_v45 = vld [vmem:[#allocation10 + $0x6b0] sm:$0xff] }
 0x3a2   : > { %6039 = vmatprep.subr.bf16.mxu0 %v9173_v16  ;;  %v2606_v16 = vld [vmem:[#allocation10 + $0x290] sm:$0xff] }
 0x3a3   : > { %v2602_v28 = vld [vmem:[#allocation10 + $0x270] sm:$0xff]  ;;  %v9124_v33 = vcombine.low %v2606_v16, %v2610_v17 }
 0x3a4   : > { %5997 = vmatpush1.bf16.msra.mxu1 %v9044_v47  ;;  %v9260_v47 = vcombine.low %v2742_v63, %v2746_v0  ;;  %v2726_v31 = vld [vmem:[#allocation10 + $0x650] sm:$0xff] }
 0x3a5   : > { %6040 = vmatpush1.bf16.msra.mxu0 %v9172_v49  ;;  %5998 = vmatprep.subr.bf16.mxu1 %v9165_v51  ;;  %v9125_v49 = vcombine.high %v2606_v16, %v2610_v17  ;;  %v9253_v51 = vcombine.high %v2734_v26, %v2738_v45  ;;  %v2730_v32 = vld [vmem:[#allocation10 + $0x670] sm:$0xff] }
 0x3a6   : > { %6041 = vmatprep.subr.bf16.mxu0 %v9293_v52  ;;  %v2598_v52 = vld [vmem:[#allocation10 + $0x250] sm:$0xff] }
 0x3a7   : > { %v2594_v12 = vld [vmem:[#allocation10 + $0x230] sm:$0xff]  ;;  %v9116_v39 = vcombine.low %v2598_v52, %v2602_v28 }
 0x3a8   : > { %5999 = vmatpush2.bf16.msra.mxu1 %v9164_v34  ;;  %v9252_v34 = vcombine.low %v2734_v26, %v2738_v45  ;;  %v2718_v36 = vld [vmem:[#allocation10 + $0x610] sm:$0xff] }
 0x3a9   : > { %6042 = vmatpush2.bf16.msra.mxu0 %v9292_v7  ;;  %6000 = vmatprep.subr.bf16.mxu1 %v9157_v8  ;;  %v9117_v7 = vcombine.high %v2598_v52, %v2602_v28  ;;  %v9245_v8 = vcombine.high %v2726_v31, %v2730_v32  ;;  %v2722_v38 = vld [vmem:[#allocation10 + $0x630] sm:$0xff] }
 0x3aa   : > { %6043 = vmatprep.subr.bf16.mxu0 %v9285_v10  ;;  %v2590_v10 = vld [vmem:[#allocation10 + $0x210] sm:$0xff] }
 0x3ab   : > { %v2842_v48 = vld [vmem:[#allocation10 + $0x9f0] sm:$0xff]  ;;  %v9108_v54 = vcombine.low %v2590_v10, %v2594_v12 }
 0x3ac   : > { %6001 = vmatpush2.bf16.msra.mxu1 %v9156_v41  ;;  %v9244_v41 = vcombine.low %v2726_v31, %v2730_v32  ;;  %v2966_v50 = vld [vmem:[#allocation10 + $0xdd0] sm:$0xff] }
 0x3ad   : > { %6044 = vmatpush2.bf16.msra.mxu0 %v9284_v42  ;;  %6002 = vmatprep.subr.bf16.mxu1 %v9149_v43  ;;  %v9109_v42 = vcombine.high %v2590_v10, %v2594_v12  ;;  %v9237_v43 = vcombine.high %v2718_v36, %v2722_v38  ;;  %v2970_v53 = vld [vmem:[#allocation10 + $0xdf0] sm:$0xff] }
 0x3ae   : > { %6045 = vmatprep.subr.bf16.mxu0 %v9277_v44  ;;  %v2838_v44 = vld [vmem:[#allocation10 + $0x9d0] sm:$0xff] }
 0x3af   : > { %v2834_v62 = vld [vmem:[#allocation10 + $0x9b0] sm:$0xff]  ;;  %v9356_v1 = vcombine.low %v2838_v44, %v2842_v48 }
 0x3b0   : > { %6003 = vmatpush2.bf16.msra.mxu1 %v9148_v55  ;;  %v9236_v55 = vcombine.low %v2718_v36, %v2722_v38  ;;  %v2958_v63 = vld [vmem:[#allocation10 + $0xd90] sm:$0xff] }
 0x3b1   : > { %6046 = vmatpush2.bf16.msra.mxu0 %v9276_v25  ;;  %6004 = vmatprep.subr.bf16.mxu1 %v9141_v60  ;;  %v9357_v25 = vcombine.high %v2838_v44, %v2842_v48  ;;  %v9485_v60 = vcombine.high %v2966_v50, %v2970_v53  ;;  %v2962_v0 = vld [vmem:[#allocation10 + $0xdb0] sm:$0xff] }
 0x3b2   : > { %6047 = vmatprep.subr.bf16.mxu0 %v9269_v61  ;;  %v2830_v61 = vld [vmem:[#allocation10 + $0x990] sm:$0xff]  ;;  %v9476_v32 = vcombine.low %v2958_v63, %v2962_v0 }
 0x3b3   : > { %v2822_v16 = vld [vmem:[#allocation10 + $0x950] sm:$0xff]  ;;  %v9348_v52 = vcombine.low %v2830_v61, %v2834_v62 }
 0x3b4   : > { %6005 = vmatpush2.bf16.msra.mxu1 %v9140_v4  ;;  %v11462_v4 = vpop.f32.mrf.mxu1  ;;  %v2826_v17 = vld [vmem:[#allocation10 + $0x970] sm:$0xff] }
 0x3b5   : > { %6048 = vmatpush2.bf16.msra.mxu0 %v9268_v5  ;;  %6006 = vmatprep.subr.bf16.mxu1 %v9133_v13  ;;  %v11464_v5 = vpop.f32.mrf.mxu0  ;;  %v9484_v13 = vcombine.low %v2966_v50, %v2970_v53  ;;  %v2942_v12 = vld [vmem:[#allocation10 + $0xd10] sm:$0xff] }
 0x3b6   : > { %6049 = vmatprep.subr.bf16.mxu0 %v9261_v40  ;;  %v9349_v40 = vcombine.high %v2830_v61, %v2834_v62  ;;  %v2946_v36 = vld [vmem:[#allocation10 + $0xd30] sm:$0xff] }
 0x3b7   : > { %v9461_v48 = vcombine.high %v2942_v12, %v2946_v36  ;;  %v2806_v50 = vld [vmem:[#allocation10 + $0x8d0] sm:$0xff] }
 0x3b8   : > { %6007 = vmatpush2.bf16.msra.mxu1 %v9132_v46  ;;  %v9477_v46 = vcombine.high %v2958_v63, %v2962_v0  ;;  %v2810_v53 = vld [vmem:[#allocation10 + $0x8f0] sm:$0xff] }
 0x3b9   : > { %6050 = vmatpush2.bf16.msra.mxu0 %v9260_v47  ;;  %6008 = vmatprep.subr.bf16.mxu1 %v9125_v49  ;;  %v2950_v47 = vld [vmem:[#allocation10 + $0xd50] sm:$0xff]  ;;  %v9325_v62 = vcombine.high %v2806_v50, %v2810_v53 }
 0x3ba   : > { %6051 = vmatprep.subr.bf16.mxu0 %v9253_v51  ;;  %v2954_v49 = vld [vmem:[#allocation10 + $0xd70] sm:$0xff] }
 0x3bb   : > { %v2798_v0 = vld [vmem:[#allocation10 + $0x890] sm:$0xff] }
 0x3bc   : > { %6009 = vmatpush2.bf16.msra.mxu1 %v9124_v33  ;;  %v9341_v33 = vcombine.high %v2822_v16, %v2826_v17 }
 0x3bd   : > { %6052 = vmatpush2.bf16.msra.mxu0 %v9252_v34  ;;  %6010 = vmatprep.subr.bf16.mxu1 %v9117_v7  ;;  %v9469_v7 = vcombine.high %v2950_v47, %v2954_v49 }
 0x3be   : > { %6053 = vmatprep.subr.bf16.mxu0 %v9245_v8  ;;  %v2814_v8 = vld [vmem:[#allocation10 + $0x910] sm:$0xff] }
 0x3c0   : > { %6011 = vmatpush2.bf16.msra.mxu1 %v9116_v39  ;;  %v9340_v39 = vcombine.low %v2822_v16, %v2826_v17  ;;  %v2930_v16 = vld [vmem:[#allocation10 + $0xcb0] sm:$0xff]  ;;  %v9324_v17 = vcombine.low %v2806_v50, %v2810_v53 }
 0x3c1   : > { %6054 = vmatpush2.bf16.msra.mxu0 %v9244_v41  ;;  %6012 = vmatprep.subr.bf16.mxu1 %v9109_v42  ;;  %v9468_v42 = vcombine.low %v2950_v47, %v2954_v49  ;;  %v2790_v47 = vld [vmem:[#allocation10 + $0x850] sm:$0xff] }
 0x3c2   : > { %6055 = vmatprep.subr.bf16.mxu0 %v9237_v43  ;;  %v2794_v49 = vld [vmem:[#allocation10 + $0x870] sm:$0xff] }
 0x3c4   : > { %6013 = vmatpush2.bf16.msra.mxu1 %v9108_v54  ;;  %v2934_v54 = vld [vmem:[#allocation10 + $0xcd0] sm:$0xff] }
 0x3c5   : > { %6056 = vmatpush2.bf16.msra.mxu0 %v9236_v55  ;;  %6068 = vmatprep.subr.bf16.mxu1 %v9357_v25  ;;  %v2938_v55 = vld [vmem:[#allocation10 + $0xcf0] sm:$0xff] }
 0x3c6   : > { %6111 = vmatprep.subr.bf16.mxu0 %v9485_v60  ;;  %v9453_v63 = vcombine.high %v2934_v54, %v2938_v55 }
 0x3c7   : > { %v5758_v26 = vpop.f32.mrf.mxu1  ;;  %v5801_v45 = vpop.f32.mrf.mxu0  ;;  %6015 = vmatmul.mubr.bf16.vlgmr.msra.gmra.mxu1 %v11386_v58 }
 0x3c8   : > { %v5759_v51 = vadd.f32 %v5758_v26, %v11457_v9  ;;  %6058 = vmatmul.mubr.bf16.vlgmr.msra.gmra.mxu0 %v11388_v59  ;;  %6069 = vmatpush1.bf16.msra.mxu1 %v9356_v1  ;;  %v2818_v9 = vld [vmem:[#allocation10 + $0x930] sm:$0xff]  ;;  %v9452_v26 = vcombine.low %v2934_v54, %v2938_v55 }
 0x3c9   : > { %6100 = vmatprep.mubr.bf16.mxu1 %v11416_v35  ;;  %6112 = vmatpush1.bf16.msra.mxu0 %v9484_v13  ;;  %v11470_v28 = vpop.f32.mrf.mxu1  ;;  %v11472_v31 = vpop.f32.mrf.mxu0  ;;  %v9333_v43 = vcombine.high %v2814_v8, %v2818_v9  ;;  %v9332_v61 = vcombine.low %v2814_v8, %v2818_v9  ;;  %v2802_v13 = vld [vmem:[#allocation10 + $0x8b0] sm:$0xff] }
 0x3ca   : > { %v5802_v34 = vadd.f32 %v5801_v45, %v5759_v51  ;;  %6143 = vmatprep.mubr.bf16.mxu0 %v11418_v6  ;;  %6070 = vmatprep.subr.bf16.mxu1 %v9349_v40  ;;  %v2926_v40 = vld [vmem:[#allocation10 + $0xc90] sm:$0xff]  ;;  %v9317_v45 = vcombine.high %v2798_v0, %v2802_v13 }
 0x3cb   : > { %v5762_v10 = vpop.f32.mrf.mxu1  ;;  %6113 = vmatprep.subr.bf16.mxu0 %v9477_v46  ;;  %v5805_v41 = vpop.f32.mrf.mxu0  ;;  %v9445_v46 = vcombine.high %v2926_v40, %v2930_v16  ;;  %v2918_v51 = vld [vmem:[#allocation10 + $0xc50] sm:$0xff] }
 0x3cc   : > { %v5763_v38 = vadd.f32 %v5762_v10, %v11460_v27  ;;  %6071 = vmatpush1.bf16.msra.mxu1 %v9348_v52  ;;  %v6326_v25 = vmax.f32 %v5802_v34, 0.0  ;;  %v9460_v27 = vcombine.low %v2942_v12, %v2946_v36  ;;  %v2922_v52 = vld [vmem:[#allocation10 + $0xc70] sm:$0xff]  ;;  %v9309_v34 = vcombine.high %v2790_v47, %v2794_v49 }
 0x3cd   : > { %6114 = vmatpush1.bf16.msra.mxu0 %v9476_v32  ;;  %6072 = vmatprep.subr.bf16.mxu1 %v9341_v33  ;;  %v9316_v32 = vcombine.low %v2798_v0, %v2802_v13  ;;  %v9444_v33 = vcombine.low %v2926_v40, %v2930_v16  ;;  %v2782_v8 = vld [vmem:[#allocation10 + $0x810] sm:$0xff]  ;;  %v9308_v36 = vcombine.low %v2790_v47, %v2794_v49 }
 0x3ce   : > { %v5806_v44 = vadd.f32 %v5805_v41, %v5763_v38  ;;  %6115 = vmatprep.subr.bf16.mxu0 %v9469_v7  ;;  %v9437_v7 = vcombine.high %v2918_v51, %v2922_v52  ;;  %v2786_v9 = vld [vmem:[#allocation10 + $0x830] sm:$0xff]  ;;  %v9436_v38 = vcombine.low %v2918_v51, %v2922_v52 }
 0x3cf   : > { %v2910_v10 = vld [vmem:[#allocation10 + $0xc10] sm:$0xff]  ;;  %v9300_v50 = vcombine.low %v2782_v8, %v2786_v9 }
 0x3d0   : > { %v6334_v60 = vmax.f32 %v5806_v44, 0.0  ;;  %6073 = vmatpush1.bf16.msra.mxu1 %v9340_v39  ;;  %v2914_v12 = vld [vmem:[#allocation10 + $0xc30] sm:$0xff]  ;;  %v9301_v39 = vcombine.high %v2782_v8, %v2786_v9 }
 0x3d1   : > { %6116 = vmatpush1.bf16.msra.mxu0 %v9468_v42  ;;  %6074 = vmatprep.subr.bf16.mxu1 %v9333_v43  ;;  %v9429_v41 = vcombine.high %v2910_v10, %v2914_v12  ;;  %v2902_v42 = vld [vmem:[#allocation10 + $0xbd0] sm:$0xff]  ;;  %v9428_v53 = vcombine.low %v2910_v10, %v2914_v12 }
 0x3d2   : > { %v11476_v1 = vpack.c.bf16 %v6334_v60, %v6326_v25  ;;  %6117 = vmatprep.subr.bf16.mxu0 %v9461_v48  ;;  %v2906_v43 = vld [vmem:[#allocation10 + $0xbf0] sm:$0xff] }
 0x3d3   : > { %v3030_v44 = vld [vmem:[#allocation10 + $0xfd0] sm:$0xff]  ;;  %v9421_v54 = vcombine.high %v2902_v42, %v2906_v43 }
 0x3d4   : > { %6075 = vmatpush1.bf16.msra.mxu1 %v9332_v61  ;;  %v3034_v48 = vld [vmem:[#allocation10 + $0xff0] sm:$0xff] }
 0x3d5   : > { %6118 = vmatpush1.bf16.msra.mxu0 %v9460_v27  ;;  %6076 = vmatprep.subr.bf16.mxu1 %v9325_v62  ;;  %v9549_v55 = vcombine.high %v3030_v44, %v3034_v48  ;;  %v2894_v25 = vld [vmem:[#allocation10 + $0xb90] sm:$0xff]  ;;  %v9420_v62 = vcombine.low %v2902_v42, %v2906_v43 }
 0x3d6   : > { %6119 = vmatprep.subr.bf16.mxu0 %v9453_v63  ;;  %v2898_v60 = vld [vmem:[#allocation10 + $0xbb0] sm:$0xff]  ;;  %v9548_v63 = vcombine.low %v3030_v44, %v3034_v48 }
 0x3d7   : > { %v3022_v61 = vld [vmem:[#allocation10 + $0xf90] sm:$0xff]  ;;  %v9413_v0 = vcombine.high %v2894_v25, %v2898_v60 }
 0x3d8   : > { %6077 = vmatpush1.bf16.msra.mxu1 %v9324_v17  ;;  %v3026_v27 = vld [vmem:[#allocation10 + $0xfb0] sm:$0xff] }
 0x3d9   : > { %6120 = vmatpush1.bf16.msra.mxu0 %v9452_v26  ;;  %6078 = vmatprep.subr.bf16.mxu1 %v9317_v45  ;;  %v9541_v13 = vcombine.high %v3022_v61, %v3026_v27  ;;  %v2886_v40 = vld [vmem:[#allocation10 + $0xb50] sm:$0xff]  ;;  %v9412_v45 = vcombine.low %v2894_v25, %v2898_v60 }
 0x3da   : > { %6121 = vmatprep.subr.bf16.mxu0 %v9445_v46  ;;  %v2890_v16 = vld [vmem:[#allocation10 + $0xb70] sm:$0xff]  ;;  %v9540_v46 = vcombine.low %v3022_v61, %v3026_v27 }
 0x3db   : > { %v3014_v17 = vld [vmem:[#allocation10 + $0xf50] sm:$0xff]  ;;  %v9405_v47 = vcombine.high %v2886_v40, %v2890_v16 }
 0x3dc   : > { %6079 = vmatpush1.bf16.msra.mxu1 %v9316_v32  ;;  %v3018_v26 = vld [vmem:[#allocation10 + $0xf70] sm:$0xff] }
 0x3dd   : > { %6122 = vmatpush1.bf16.msra.mxu0 %v9444_v33  ;;  %6080 = vmatprep.subr.bf16.mxu1 %v9309_v34  ;;  %v9533_v49 = vcombine.high %v3014_v17, %v3018_v26  ;;  %v2878_v51 = vld [vmem:[#allocation10 + $0xb10] sm:$0xff]  ;;  %v9404_v34 = vcombine.low %v2886_v40, %v2890_v16 }
 0x3de   : > { %6123 = vmatprep.subr.bf16.mxu0 %v9437_v7  ;;  %v2882_v52 = vld [vmem:[#allocation10 + $0xb30] sm:$0xff]  ;;  %v9532_v7 = vcombine.low %v3014_v17, %v3018_v26 }
 0x3df   : > { %v3006_v32 = vld [vmem:[#allocation10 + $0xf10] sm:$0xff]  ;;  %v9397_v8 = vcombine.high %v2878_v51, %v2882_v52 }
 0x3e0   : > { %6081 = vmatpush1.bf16.msra.mxu1 %v9308_v36  ;;  %v3010_v33 = vld [vmem:[#allocation10 + $0xf30] sm:$0xff] }
 0x3e1   : > { %6124 = vmatpush1.bf16.msra.mxu0 %v9436_v38  ;;  %6082 = vmatprep.subr.bf16.mxu1 %v9301_v39  ;;  %v9525_v9 = vcombine.high %v3006_v32, %v3010_v33  ;;  %v2870_v10 = vld [vmem:[#allocation10 + $0xad0] sm:$0xff]  ;;  %v9396_v39 = vcombine.low %v2878_v51, %v2882_v52 }
 0x3e2   : > { %6125 = vmatprep.subr.bf16.mxu0 %v9429_v41  ;;  %v2874_v12 = vld [vmem:[#allocation10 + $0xaf0] sm:$0xff]  ;;  %v9524_v41 = vcombine.low %v3006_v32, %v3010_v33  ;;  %v2583_v32 = vld [vmem:[#allocation10 + $0x1d8] sm:$0xff] }
 0x3e3   : > { %v2998_v36 = vld [vmem:[#allocation10 + $0xed0] sm:$0xff]  ;;  %v9389_v42 = vcombine.high %v2870_v10, %v2874_v12  ;;  %v2587_v33 = vld [vmem:[#allocation10 + $0x1f8] sm:$0xff] }
 0x3e4   : > { %6083 = vmatpush1.bf16.msra.mxu1 %v9300_v50  ;;  %v3002_v38 = vld [vmem:[#allocation10 + $0xef0] sm:$0xff] }
 0x3e5   : > { %6126 = vmatpush1.bf16.msra.mxu0 %v9428_v53  ;;  %6084 = vmatprep.subr.bf16.mxu1 %v9421_v54  ;;  %v9517_v43 = vcombine.high %v2998_v36, %v3002_v38  ;;  %v2862_v44 = vld [vmem:[#allocation10 + $0xa90] sm:$0xff]  ;;  %v9388_v54 = vcombine.low %v2870_v10, %v2874_v12  ;;  %v9103_v10 = vcombine.high %v2583_v32, %v2587_v33 }
 0x3e6   : > { %6127 = vmatprep.subr.bf16.mxu0 %v9549_v55  ;;  %v2866_v48 = vld [vmem:[#allocation10 + $0xab0] sm:$0xff]  ;;  %v9516_v55 = vcombine.low %v2998_v36, %v3002_v38  ;;  %v2575_v36 = vld [vmem:[#allocation10 + $0x198] sm:$0xff] }
 0x3e7   : > { %v2990_v50 = vld [vmem:[#allocation10 + $0xe90] sm:$0xff]  ;;  %v9381_v25 = vcombine.high %v2862_v44, %v2866_v48  ;;  %v2579_v38 = vld [vmem:[#allocation10 + $0x1b8] sm:$0xff] }
 0x3e8   : > { %6085 = vmatpush2.bf16.msra.mxu1 %v9420_v62  ;;  %v2994_v53 = vld [vmem:[#allocation10 + $0xeb0] sm:$0xff] }
 0x3e9   : > { %6128 = vmatpush2.bf16.msra.mxu0 %v9548_v63  ;;  %6086 = vmatprep.subr.bf16.mxu1 %v9413_v0  ;;  %v9509_v60 = vcombine.high %v2990_v50, %v2994_v53  ;;  %v2854_v61 = vld [vmem:[#allocation10 + $0xa50] sm:$0xff]  ;;  %v9380_v0 = vcombine.low %v2862_v44, %v2866_v48  ;;  %v11480_v44 = vpop.f32.mrf.mxu1 }
 0x3ea   : > { %6129 = vmatprep.subr.bf16.mxu0 %v9541_v13  ;;  %v2858_v27 = vld [vmem:[#allocation10 + $0xa70] sm:$0xff]  ;;  %v9508_v13 = vcombine.low %v2990_v50, %v2994_v53  ;;  %v11482_v50 = vpop.f32.mrf.mxu0  ;;  %v9095_v53 = vcombine.high %v2575_v36, %v2579_v38 }
 0x3eb   : > { %v2982_v62 = vld [vmem:[#allocation10 + $0xe50] sm:$0xff]  ;;  %v9373_v40 = vcombine.high %v2854_v61, %v2858_v27 }
 0x3ec   : > { %6087 = vmatpush2.bf16.msra.mxu1 %v9412_v45  ;;  %v2986_v63 = vld [vmem:[#allocation10 + $0xe70] sm:$0xff] }
 0x3ed   : > { %6130 = vmatpush2.bf16.msra.mxu0 %v9540_v46  ;;  %6088 = vmatprep.subr.bf16.mxu1 %v9405_v47  ;;  %v9501_v16 = vcombine.high %v2982_v62, %v2986_v63  ;;  %v2846_v17 = vld [vmem:[#allocation10 + $0xa10] sm:$0xff]  ;;  %v9372_v47 = vcombine.low %v2854_v61, %v2858_v27  ;;  %v2695_v61 = vld [vmem:[#allocation10 + $0x558] sm:$0xff] }
 0x3ee   : > { %6131 = vmatprep.subr.bf16.mxu0 %v9533_v49  ;;  %v2850_v26 = vld [vmem:[#allocation10 + $0xa30] sm:$0xff]  ;;  %v9500_v49 = vcombine.low %v2982_v62, %v2986_v63  ;;  %v9094_v63 = vcombine.low %v2575_v36, %v2579_v38 }
 0x3ef   : > { %v2974_v45 = vld [vmem:[#allocation10 + $0xe10] sm:$0xff]  ;;  %v9365_v51 = vcombine.high %v2846_v17, %v2850_v26 }
 0x3f0   : > { %6089 = vmatpush2.bf16.msra.mxu1 %v9404_v34  ;;  %v2978_v46 = vld [vmem:[#allocation10 + $0xe30] sm:$0xff]  ;;  %v2711_v34 = vld [vmem:[#allocation10 + $0x5d8] sm:$0xff] }
 0x3f1   : > { %6132 = vmatpush2.bf16.msra.mxu0 %v9532_v7  ;;  %6090 = vmatprep.subr.bf16.mxu1 %v9397_v8  ;;  %v9493_v52 = vcombine.high %v2974_v45, %v2978_v46  ;;  %v2715_v7 = vld [vmem:[#allocation10 + $0x5f8] sm:$0xff]  ;;  %v9364_v8 = vcombine.low %v2846_v17, %v2850_v26 }
 0x3f2   : > { %6133 = vmatprep.subr.bf16.mxu0 %v9525_v9  ;;  %v9492_v9 = vcombine.low %v2974_v45, %v2978_v46  ;;  %v9231_v12 = vcombine.high %v2711_v34, %v2715_v7  ;;  %v9230_v48 = vcombine.low %v2711_v34, %v2715_v7  ;;  %v2559_v45 = vld [vmem:[#allocation10 + $0x118] sm:$0xff] }
 0x3f3   : > { %v2563_v46 = vld [vmem:[#allocation10 + $0x138] sm:$0xff] }
 0x3f4   : > { %6091 = vmatpush2.bf16.msra.mxu1 %v9396_v39  ;;  %v3049_v39 = vrot.slane %v11446_v37, %v11370_v24  ;;  %v2699_v37 = vld [vmem:[#allocation10 + $0x578] sm:$0xff]  ;;  %v9079_v34 = vcombine.high %v2559_v45, %v2563_v46  ;;  %v9078_v36 = vcombine.low %v2559_v45, %v2563_v46 }
 0x3f5   : > { %6134 = vmatpush2.bf16.msra.mxu0 %v9524_v41  ;;  %6092 = vmatprep.subr.bf16.mxu1 %v9389_v42  ;;  %v9102_v41 = vcombine.low %v2583_v32, %v2587_v33  ;;  %v2703_v42 = vld [vmem:[#allocation10 + $0x598] sm:$0xff]  ;;  %v9215_v26 = vcombine.high %v2695_v61, %v2699_v37  ;;  %v9214_v33 = vcombine.low %v2695_v61, %v2699_v37 }
 0x3f6   : > { %6135 = vmatprep.subr.bf16.mxu0 %v9517_v43  ;;  %v2707_v43 = vld [vmem:[#allocation10 + $0x5b8] sm:$0xff] }
 0x3f7   : > { %v2535_v61 = vld [vmem:[#allocation10 + $0x58] sm:$0xff] }
 0x3f8   : > { %6093 = vmatpush2.bf16.msra.mxu1 %v9388_v54  ;;  %v2567_v54 = vld [vmem:[#allocation10 + $0x158] sm:$0xff] }
 0x3f9   : > { %6136 = vmatpush2.bf16.msra.mxu0 %v9516_v55  ;;  %6094 = vmatprep.subr.bf16.mxu1 %v9381_v25  ;;  %v2571_v55 = vld [vmem:[#allocation10 + $0x178] sm:$0xff] }
 0x3fa   : > { %6137 = vmatprep.subr.bf16.mxu0 %v9509_v60  ;;  %v9223_v60 = vcombine.high %v2703_v42, %v2707_v43  ;;  %v2539_v37 = vld [vmem:[#allocation10 + $0x78] sm:$0xff] }
 0x3fb   : > { %v2527_v45 = vld [vmem:[#allocation10 + $0x18] sm:$0xff] }
 0x3fc   : > { %6095 = vmatpush2.bf16.msra.mxu1 %v9380_v0  ;;  %v2531_v46 = vld [vmem:[#allocation10 + $0x38] sm:$0xff] }
 0x3fd   : > { %6138 = vmatpush2.bf16.msra.mxu0 %v9508_v13  ;;  %6096 = vmatprep.subr.bf16.mxu1 %v9373_v40  ;;  %v9222_v13 = vcombine.low %v2703_v42, %v2707_v43  ;;  %v9087_v40 = vcombine.high %v2567_v54, %v2571_v55  ;;  %v2543_v42 = vld [vmem:[#allocation10 + $0x98] sm:$0xff] }
 0x3fe   : > { %6139 = vmatprep.subr.bf16.mxu0 %v9501_v16  ;;  %v2547_v43 = vld [vmem:[#allocation10 + $0xb8] sm:$0xff] }
 0x400   : > { %6097 = vmatpush2.bf16.msra.mxu1 %v9372_v47 }
 0x401   : > { %6140 = vmatpush2.bf16.msra.mxu0 %v9500_v49  ;;  %6098 = vmatprep.subr.bf16.mxu1 %v9365_v51  ;;  %v2687_v49 = vld [vmem:[#allocation10 + $0x518] sm:$0xff] }
 0x402   : > { %6141 = vmatprep.subr.bf16.mxu0 %v9493_v52  ;;  %v2691_v51 = vld [vmem:[#allocation10 + $0x538] sm:$0xff]  ;;  %v9086_v52 = vcombine.low %v2567_v54, %v2571_v55 }
 0x403   : > { %v9206_v38 = vcombine.low %v2687_v49, %v2691_v51 }
 0x404   : > { %6099 = vmatpush2.bf16.msra.mxu1 %v9364_v8  ;;  %v2551_v8 = vld [vmem:[#allocation10 + $0xd8] sm:$0xff] }
 0x405   : > { %6142 = vmatpush2.bf16.msra.mxu0 %v9492_v9  ;;  %6154 = vmatprep.subr.bf16.mxu1 %v9103_v10  ;;  %v2555_v9 = vld [vmem:[#allocation10 + $0xf8] sm:$0xff] }
 0x406   : > { %6197 = vmatprep.subr.bf16.mxu0 %v9231_v12  ;;  %v2679_v10 = vld [vmem:[#allocation10 + $0x4d8] sm:$0xff]  ;;  %v9070_v54 = vcombine.low %v2551_v8, %v2555_v9 }
 0x407   : > { %v5844_v25 = vpop.f32.mrf.mxu1  ;;  %6101 = vmatmul.mubr.bf16.vlgmr.msra.gmra.mxu1 %v11434_v14  ;;  %v2683_v12 = vld [vmem:[#allocation10 + $0x4f8] sm:$0xff] }
 0x408   : > { %v5845_v27 = vadd.f32 %v5844_v25, %v3049_v39  ;;  %v5887_v62 = vpop.f32.mrf.mxu0  ;;  %6144 = vmatmul.mubr.bf16.vlgmr.msra.gmra.mxu0 %v11436_v15  ;;  %6155 = vmatpush1.bf16.msra.mxu1 %v9102_v41  ;;  %v9199_v41 = vcombine.high %v2679_v10, %v2683_v12  ;;  %v9198_v55 = vcombine.low %v2679_v10, %v2683_v12 }
 0x409   : > { %6186 = vmatprep.mubr.bf16.mxu1 %v11382_v56  ;;  %6198 = vmatpush1.bf16.msra.mxu0 %v9230_v48  ;;  %v11487_v0 = vpop.f32.mrf.mxu1  ;;  %v2671_v48 = vld [vmem:[#allocation10 + $0x498] sm:$0xff]  ;;  %v9063_v25 = vcombine.high %v2543_v42, %v2547_v43 }
 0x40a   : > { %v11489_v16 = vadd.f32 %v5887_v62, %v5845_v27  ;;  %6229 = vmatprep.mubr.bf16.mxu0 %v11384_v57  ;;  %v11492_v17 = vpop.f32.mrf.mxu0  ;;  %6156 = vmatprep.subr.bf16.mxu1 %v9095_v53  ;;  %v9207_v57 = vcombine.high %v2687_v49, %v2691_v51  ;;  %v2675_v53 = vld [vmem:[#allocation10 + $0x4b8] sm:$0xff]  ;;  %v9054_v51 = vcombine.low %v2535_v61, %v2539_v37 }
 0x40b   : > { %v5848_v47 = vpop.f32.mrf.mxu1  ;;  %6199 = vmatprep.subr.bf16.mxu0 %v9223_v60  ;;  %v9191_v60 = vcombine.high %v2671_v48, %v2675_v53  ;;  %v2663_v27 = vld [vmem:[#allocation10 + $0x458] sm:$0xff] }
 0x40c   : > { %v5849_v56 = vadd.f32 %v5848_v47, %v3049_v39  ;;  %6157 = vmatpush1.bf16.msra.mxu1 %v9094_v63  ;;  %v5891_v32 = vpop.f32.mrf.mxu0  ;;  %v9071_v39 = vcombine.high %v2551_v8, %v2555_v9  ;;  %v2667_v62 = vld [vmem:[#allocation10 + $0x478] sm:$0xff]  ;;  %v9062_v63 = vcombine.low %v2543_v42, %v2547_v43  ;;  %v9046_v9 = vcombine.low %v2527_v45, %v2531_v46 }
 0x40d   : > { %6200 = vmatpush1.bf16.msra.mxu0 %v9222_v13  ;;  %6158 = vmatprep.subr.bf16.mxu1 %v9087_v40  ;;  %v9190_v13 = vcombine.low %v2671_v48, %v2675_v53  ;;  %v9055_v40 = vcombine.high %v2535_v61, %v2539_v37  ;;  %v2655_v47 = vld [vmem:[#allocation10 + $0x418] sm:$0xff] }
 0x40e   : > { %v11494_v7 = vadd.f32 %v5891_v32, %v5849_v56  ;;  %6201 = vmatprep.subr.bf16.mxu0 %v9215_v26  ;;  %v9183_v26 = vcombine.high %v2663_v27, %v2667_v62  ;;  %v2659_v49 = vld [vmem:[#allocation10 + $0x438] sm:$0xff]  ;;  %v9182_v56 = vcombine.low %v2663_v27, %v2667_v62 }
 0x40f   : > { %v9175_v32 = vcombine.high %v2655_v47, %v2659_v49  ;;  %v2779_v8 = vld [vmem:[#allocation10 + $0x7f8] sm:$0xff]  ;;  %v9174_v10 = vcombine.low %v2655_v47, %v2659_v49 }
 0x410   : > { %6159 = vmatpush1.bf16.msra.mxu1 %v9086_v52  ;;  %v9047_v52 = vcombine.high %v2527_v45, %v2531_v46  ;;  %v2771_v42 = vld [vmem:[#allocation10 + $0x7b8] sm:$0xff] }
 0x411   : > { %6202 = vmatpush1.bf16.msra.mxu0 %v9214_v33  ;;  %6160 = vmatprep.subr.bf16.mxu1 %v9079_v34  ;;  %v2647_v33 = vld [vmem:[#allocation10 + $0x3d8] sm:$0xff] }
 0x412   : > { %6203 = vmatprep.subr.bf16.mxu0 %v9207_v57  ;;  %v2651_v34 = vld [vmem:[#allocation10 + $0x3f8] sm:$0xff] }
 0x413   : > { %v2775_v57 = vld [vmem:[#allocation10 + $0x7d8] sm:$0xff]  ;;  %v9167_v12 = vcombine.high %v2647_v33, %v2651_v34  ;;  %v9166_v43 = vcombine.low %v2647_v33, %v2651_v34 }
 0x414   : > { %6161 = vmatpush1.bf16.msra.mxu1 %v9078_v36  ;;  %v9295_v36 = vcombine.high %v2775_v57, %v2779_v8  ;;  %v9294_v48 = vcombine.low %v2775_v57, %v2779_v8  ;;  %v2763_v61 = vld [vmem:[#allocation10 + $0x778] sm:$0xff] }
 0x415   : > { %6204 = vmatpush1.bf16.msra.mxu0 %v9206_v38  ;;  %6162 = vmatprep.subr.bf16.mxu1 %v9071_v39  ;;  %v2639_v38 = vld [vmem:[#allocation10 + $0x398] sm:$0xff] }
 0x416   : > { %6205 = vmatprep.subr.bf16.mxu0 %v9199_v41  ;;  %v2643_v39 = vld [vmem:[#allocation10 + $0x3b8] sm:$0xff] }
 0x417   : > { %v2767_v41 = vld [vmem:[#allocation10 + $0x798] sm:$0xff]  ;;  %v9159_v53 = vcombine.high %v2639_v38, %v2643_v39  ;;  %v9158_v37 = vcombine.low %v2639_v38, %v2643_v39 }
 0x418   : > { %6163 = vmatpush1.bf16.msra.mxu1 %v9070_v54  ;;  %v9287_v54 = vcombine.high %v2767_v41, %v2771_v42  ;;  %v9286_v27 = vcombine.low %v2767_v41, %v2771_v42  ;;  %v2755_v45 = vld [vmem:[#allocation10 + $0x738] sm:$0xff] }
 0x419   : > { %6206 = vmatpush1.bf16.msra.mxu0 %v9198_v55  ;;  %6164 = vmatprep.subr.bf16.mxu1 %v9063_v25  ;;  %v2631_v55 = vld [vmem:[#allocation10 + $0x358] sm:$0xff] }
 0x41a   : > { %6207 = vmatprep.subr.bf16.mxu0 %v9191_v60  ;;  %v2635_v25 = vld [vmem:[#allocation10 + $0x378] sm:$0xff] }
 0x41b   : > { %v2759_v60 = vld [vmem:[#allocation10 + $0x758] sm:$0xff]  ;;  %v9151_v62 = vcombine.high %v2631_v55, %v2635_v25  ;;  %v9150_v46 = vcombine.low %v2631_v55, %v2635_v25 }
 0x41c   : > { %6165 = vmatpush1.bf16.msra.mxu1 %v9062_v63  ;;  %v9279_v63 = vcombine.high %v2759_v60, %v2763_v61  ;;  %v9278_v47 = vcombine.low %v2759_v60, %v2763_v61  ;;  %v2747_v33 = vld [vmem:[#allocation10 + $0x6f8] sm:$0xff] }
 0x41d   : > { %6208 = vmatpush1.bf16.msra.mxu0 %v9190_v13  ;;  %6166 = vmatprep.subr.bf16.mxu1 %v9055_v40  ;;  %v2623_v13 = vld [vmem:[#allocation10 + $0x318] sm:$0xff] }
 0x41e   : > { %6209 = vmatprep.subr.bf16.mxu0 %v9183_v26  ;;  %v2627_v40 = vld [vmem:[#allocation10 + $0x338] sm:$0xff] }
 0x41f   : > { %v2751_v26 = vld [vmem:[#allocation10 + $0x718] sm:$0xff]  ;;  %v9143_v49 = vcombine.high %v2623_v13, %v2627_v40  ;;  %v9142_v34 = vcombine.low %v2623_v13, %v2627_v40 }
 0x420   : > { %6167 = vmatpush1.bf16.msra.mxu1 %v9054_v51  ;;  %v9271_v51 = vcombine.high %v2751_v26, %v2755_v45  ;;  %v9270_v57 = vcombine.low %v2751_v26, %v2755_v45  ;;  %v2739_v38 = vld [vmem:[#allocation10 + $0x6b8] sm:$0xff] }
 0x421   : > { %6210 = vmatpush1.bf16.msra.mxu0 %v9182_v56  ;;  %6168 = vmatprep.subr.bf16.mxu1 %v9047_v52  ;;  %v2615_v56 = vld [vmem:[#allocation10 + $0x2d8] sm:$0xff] }
 0x422   : > { %6211 = vmatprep.subr.bf16.mxu0 %v9175_v32  ;;  %v2619_v52 = vld [vmem:[#allocation10 + $0x2f8] sm:$0xff] }
 0x423   : > { %v2743_v32 = vld [vmem:[#allocation10 + $0x6d8] sm:$0xff]  ;;  %v9135_v8 = vcombine.high %v2615_v56, %v2619_v52  ;;  %v9134_v39 = vcombine.low %v2615_v56, %v2619_v52 }
 0x424   : > { %6169 = vmatpush1.bf16.msra.mxu1 %v9046_v9  ;;  %v9263_v9 = vcombine.high %v2743_v32, %v2747_v33  ;;  %v9262_v41 = vcombine.low %v2743_v32, %v2747_v33  ;;  %v2731_v55 = vld [vmem:[#allocation10 + $0x678] sm:$0xff] }
 0x425   : > { %6212 = vmatpush1.bf16.msra.mxu0 %v9174_v10  ;;  %6170 = vmatprep.subr.bf16.mxu1 %v9167_v12  ;;  %v2607_v10 = vld [vmem:[#allocation10 + $0x298] sm:$0xff] }
 0x426   : > { %6213 = vmatprep.subr.bf16.mxu0 %v9295_v36  ;;  %v2611_v12 = vld [vmem:[#allocation10 + $0x2b8] sm:$0xff] }
 0x427   : > { %v2735_v36 = vld [vmem:[#allocation10 + $0x698] sm:$0xff]  ;;  %v9127_v42 = vcombine.high %v2607_v10, %v2611_v12  ;;  %v9126_v25 = vcombine.low %v2607_v10, %v2611_v12 }
 0x428   : > { %6171 = vmatpush2.bf16.msra.mxu1 %v9166_v43  ;;  %v9255_v43 = vcombine.high %v2735_v36, %v2739_v38  ;;  %v9254_v60 = vcombine.low %v2735_v36, %v2739_v38  ;;  %v2723_v13 = vld [vmem:[#allocation10 + $0x638] sm:$0xff]  ;;  %v11496_v36 = vpop.f32.mrf.mxu1 }
 0x429   : > { %6214 = vmatpush2.bf16.msra.mxu0 %v9294_v48  ;;  %6172 = vmatprep.subr.bf16.mxu1 %v9159_v53  ;;  %v2599_v48 = vld [vmem:[#allocation10 + $0x258] sm:$0xff] }
 0x42a   : > { %6215 = vmatprep.subr.bf16.mxu0 %v9287_v54  ;;  %v2603_v53 = vld [vmem:[#allocation10 + $0x278] sm:$0xff] }
 0x42b   : > { %v2727_v54 = vld [vmem:[#allocation10 + $0x658] sm:$0xff]  ;;  %v9119_v61 = vcombine.high %v2599_v48, %v2603_v53  ;;  %v9118_v40 = vcombine.low %v2599_v48, %v2603_v53 }
 0x42c   : > { %6173 = vmatpush2.bf16.msra.mxu1 %v9158_v37  ;;  %v9247_v37 = vcombine.high %v2727_v54, %v2731_v55  ;;  %v9246_v26 = vcombine.low %v2727_v54, %v2731_v55  ;;  %v2971_v56 = vld [vmem:[#allocation10 + $0xdf8] sm:$0xff] }
 0x42d   : > { %6216 = vmatpush2.bf16.msra.mxu0 %v9286_v27  ;;  %6174 = vmatprep.subr.bf16.mxu1 %v9151_v62  ;;  %v2591_v27 = vld [vmem:[#allocation10 + $0x218] sm:$0xff] }
 0x42e   : > { %6217 = vmatprep.subr.bf16.mxu0 %v9279_v63  ;;  %v2595_v62 = vld [vmem:[#allocation10 + $0x238] sm:$0xff] }
 0x42f   : > { %v2719_v63 = vld [vmem:[#allocation10 + $0x618] sm:$0xff]  ;;  %v9111_v45 = vcombine.high %v2591_v27, %v2595_v62  ;;  %v9110_v52 = vcombine.low %v2591_v27, %v2595_v62 }
 0x430   : > { %6175 = vmatpush2.bf16.msra.mxu1 %v9150_v46  ;;  %v9239_v46 = vcombine.high %v2719_v63, %v2723_v13  ;;  %v9238_v32 = vcombine.low %v2719_v63, %v2723_v13  ;;  %v2959_v10 = vld [vmem:[#allocation10 + $0xd98] sm:$0xff] }
 0x431   : > { %6218 = vmatpush2.bf16.msra.mxu0 %v9278_v47  ;;  %6176 = vmatprep.subr.bf16.mxu1 %v9143_v49  ;;  %v2839_v47 = vld [vmem:[#allocation10 + $0x9d8] sm:$0xff] }
 0x432   : > { %6219 = vmatprep.subr.bf16.mxu0 %v9271_v51  ;;  %v2843_v49 = vld [vmem:[#allocation10 + $0x9f8] sm:$0xff] }
 0x433   : > { %v2967_v51 = vld [vmem:[#allocation10 + $0xdd8] sm:$0xff]  ;;  %v9359_v33 = vcombine.high %v2839_v47, %v2843_v49 }
 0x434   : > { %6177 = vmatpush2.bf16.msra.mxu1 %v9142_v34  ;;  %v9487_v34 = vcombine.high %v2967_v51, %v2971_v56  ;;  %v2963_v12 = vld [vmem:[#allocation10 + $0xdb8] sm:$0xff]  ;;  %v9486_v38 = vcombine.low %v2967_v51, %v2971_v56 }
 0x435   : > { %6220 = vmatpush2.bf16.msra.mxu0 %v9270_v57  ;;  %6178 = vmatprep.subr.bf16.mxu1 %v9135_v8  ;;  %v2831_v57 = vld [vmem:[#allocation10 + $0x998] sm:$0xff]  ;;  %v9479_v53 = vcombine.high %v2959_v10, %v2963_v12  ;;  %v9478_v27 = vcombine.low %v2959_v10, %v2963_v12 }
 0x436   : > { %6221 = vmatprep.subr.bf16.mxu0 %v9263_v9  ;;  %v2835_v8 = vld [vmem:[#allocation10 + $0x9b8] sm:$0xff]  ;;  %v9358_v9 = vcombine.low %v2839_v47, %v2843_v49 }
 0x437   : > { %v2951_v54 = vld [vmem:[#allocation10 + $0xd58] sm:$0xff] }
 0x438   : > { %6179 = vmatpush2.bf16.msra.mxu1 %v9134_v39  ;;  %v11498_v39 = vpop.f32.mrf.mxu0  ;;  %v2955_v55 = vld [vmem:[#allocation10 + $0xd78] sm:$0xff] }
 0x439   : > { %6222 = vmatpush2.bf16.msra.mxu0 %v9262_v41  ;;  %6180 = vmatprep.subr.bf16.mxu1 %v9127_v42  ;;  %v9351_v41 = vcombine.high %v2831_v57, %v2835_v8  ;;  %v2823_v42 = vld [vmem:[#allocation10 + $0x958] sm:$0xff]  ;;  %v9471_v13 = vcombine.high %v2951_v54, %v2955_v55  ;;  %v9470_v49 = vcombine.low %v2951_v54, %v2955_v55 }
 0x43a   : > { %6223 = vmatprep.subr.bf16.mxu0 %v9255_v43  ;;  %v2827_v43 = vld [vmem:[#allocation10 + $0x978] sm:$0xff] }
 0x43b   : > { %v9343_v62 = vcombine.high %v2823_v42, %v2827_v43 }
 0x43c   : > { %6181 = vmatpush2.bf16.msra.mxu1 %v9126_v25 }
 0x43d   : > { %6224 = vmatpush2.bf16.msra.mxu0 %v9254_v60  ;;  %6182 = vmatprep.subr.bf16.mxu1 %v9119_v61  ;;  %v9350_v61 = vcombine.low %v2831_v57, %v2835_v8 }
 0x43e   : > { %6225 = vmatprep.subr.bf16.mxu0 %v9247_v37 }
 0x440   : > { %6183 = vmatpush2.bf16.msra.mxu1 %v9118_v40  ;;  %v2819_v40 = vld [vmem:[#allocation10 + $0x938] sm:$0xff] }
 0x441   : > { %6226 = vmatpush2.bf16.msra.mxu0 %v9246_v26  ;;  %6184 = vmatprep.subr.bf16.mxu1 %v9111_v45  ;;  %v2947_v45 = vld [vmem:[#allocation10 + $0xd38] sm:$0xff] }
 0x442   : > { %6227 = vmatprep.subr.bf16.mxu0 %v9239_v46  ;;  %v9342_v46 = vcombine.low %v2823_v42, %v2827_v43  ;;  %v2803_v42 = vld [vmem:[#allocation10 + $0x8b8] sm:$0xff] }
 0x443   : > { %v2927_v43 = vld [vmem:[#allocation10 + $0xc98] sm:$0xff] }
 0x444   : > { %6185 = vmatpush2.bf16.msra.mxu1 %v9110_v52  ;;  %v2807_v52 = vld [vmem:[#allocation10 + $0x8d8] sm:$0xff] }
 0x445   : > { %6228 = vmatpush2.bf16.msra.mxu0 %v9238_v32  ;;  %6240 = vmatprep.subr.bf16.mxu1 %v9359_v33  ;;  %v2811_v32 = vld [vmem:[#allocation10 + $0x8f8] sm:$0xff] }
 0x446   : > { %6283 = vmatprep.subr.bf16.mxu0 %v9487_v34  ;;  %v2935_v33 = vld [vmem:[#allocation10 + $0xcd8] sm:$0xff]  ;;  %v9327_v10 = vcombine.high %v2807_v52, %v2811_v32 }
 0x447   : > { %v5930_v48 = vpop.f32.mrf.mxu1  ;;  %6187 = vmatmul.mubr.bf16.vlgmr.msra.gmra.mxu1 %v11386_v58  ;;  %v2939_v34 = vld [vmem:[#allocation10 + $0xcf8] sm:$0xff] }
 0x448   : > { %v5931_v25 = vadd.f32 %v5930_v48, %v11489_v16  ;;  %v5973_v60 = vpop.f32.mrf.mxu0  ;;  %6230 = vmatmul.mubr.bf16.vlgmr.msra.gmra.mxu0 %v11388_v59  ;;  %6241 = vmatpush1.bf16.msra.mxu1 %v9358_v9  ;;  %v2815_v16 = vld [vmem:[#allocation10 + $0x918] sm:$0xff]  ;;  %v9454_v54 = vcombine.low %v2935_v33, %v2939_v34 }
 0x449   : > { %6272 = vmatprep.mubr.bf16.mxu1 %v11416_v35  ;;  %6284 = vmatpush1.bf16.msra.mxu0 %v9486_v38  ;;  %v11504_v37 = vpop.f32.mrf.mxu1  ;;  %v2943_v59 = vld [vmem:[#allocation10 + $0xd18] sm:$0xff]  ;;  %v9335_v51 = vcombine.high %v2815_v16, %v2819_v40  ;;  %v9334_v9 = vcombine.low %v2815_v16, %v2819_v40  ;;  %v9455_v38 = vcombine.high %v2935_v33, %v2939_v34 }
 0x44a   : > { %v5974_v63 = vadd.f32 %v5973_v60, %v5931_v25  ;;  %6315 = vmatprep.mubr.bf16.mxu0 %v11418_v6  ;;  %v11507_v58 = vpop.f32.mrf.mxu0  ;;  %6242 = vmatprep.subr.bf16.mxu1 %v9351_v41  ;;  %v9463_v56 = vcombine.high %v2943_v59, %v2947_v45  ;;  %v2799_v41 = vld [vmem:[#allocation10 + $0x898] sm:$0xff] }
 0x44b   : > { %v5934_v26 = vpop.f32.mrf.mxu1  ;;  %6285 = vmatprep.subr.bf16.mxu0 %v9479_v53  ;;  %v2931_v48 = vld [vmem:[#allocation10 + $0xcb8] sm:$0xff]  ;;  %v9326_v53 = vcombine.low %v2807_v52, %v2811_v32  ;;  %v9319_v55 = vcombine.high %v2799_v41, %v2803_v42 }
 0x44c   : > { %v5935_v35 = vadd.f32 %v5934_v26, %v11494_v7  ;;  %6243 = vmatpush1.bf16.msra.mxu1 %v9350_v61  ;;  %v5977_v47 = vpop.f32.mrf.mxu0  ;;  %v6328_v57 = vmax.f32 %v5974_v63, 0.0  ;;  %v9462_v7 = vcombine.low %v2943_v59, %v2947_v45  ;;  %v9447_v25 = vcombine.high %v2927_v43, %v2931_v48  ;;  %v2791_v60 = vld [vmem:[#allocation10 + $0x858] sm:$0xff] }
 0x44d   : > { %6286 = vmatpush1.bf16.msra.mxu0 %v9478_v27  ;;  %6244 = vmatprep.subr.bf16.mxu1 %v9343_v62  ;;  %v2795_v61 = vld [vmem:[#allocation10 + $0x878] sm:$0xff]  ;;  %v9318_v63 = vcombine.low %v2799_v41, %v2803_v42 }
 0x44e   : > { %v5978_v6 = vadd.f32 %v5977_v47, %v5935_v35  ;;  %6287 = vmatprep.subr.bf16.mxu0 %v9471_v13  ;;  %v2919_v27 = vld [vmem:[#allocation10 + $0xc58] sm:$0xff]  ;;  %v9446_v13 = vcombine.low %v2927_v43, %v2931_v48  ;;  %v9311_v16 = vcombine.high %v2791_v60, %v2795_v61 }
 0x44f   : > { %v2923_v62 = vld [vmem:[#allocation10 + $0xc78] sm:$0xff] }
 0x450   : > { %v6336_v8 = vmax.f32 %v5978_v6, 0.0  ;;  %6245 = vmatpush1.bf16.msra.mxu1 %v9342_v46  ;;  %v9439_v40 = vcombine.high %v2919_v27, %v2923_v62  ;;  %v2783_v26 = vld [vmem:[#allocation10 + $0x818] sm:$0xff]  ;;  %v9310_v46 = vcombine.low %v2791_v60, %v2795_v61  ;;  %v9438_v47 = vcombine.low %v2919_v27, %v2923_v62 }
 0x451   : > { %6288 = vmatpush1.bf16.msra.mxu0 %v9470_v49  ;;  %6246 = vmatprep.subr.bf16.mxu1 %v9335_v51  ;;  %v2787_v59 = vld [vmem:[#allocation10 + $0x838] sm:$0xff] }
 0x452   : > { %v11510_v12 = vpack.c.bf16 %v6336_v8, %v6328_v57  ;;  %6289 = vmatprep.subr.bf16.mxu0 %v9463_v56  ;;  %v2911_v45 = vld [vmem:[#allocation10 + $0xc18] sm:$0xff]  ;;  %v9303_v49 = vcombine.high %v2783_v26, %v2787_v59  ;;  %v9302_v33 = vcombine.low %v2783_v26, %v2787_v59 }
 0x453   : > { %v2915_v35 = vld [vmem:[#allocation10 + $0xc38] sm:$0xff] }
 0x454   : > { %6247 = vmatpush1.bf16.msra.mxu1 %v9334_v9  ;;  %v9431_v51 = vcombine.high %v2911_v45, %v2915_v35  ;;  %v2903_v6 = vld [vmem:[#allocation10 + $0xbd8] sm:$0xff]  ;;  %v9430_v34 = vcombine.low %v2911_v45, %v2915_v35 }
 0x455   : > { %6290 = vmatpush1.bf16.msra.mxu0 %v9462_v7  ;;  %6248 = vmatprep.subr.bf16.mxu1 %v9327_v10  ;;  %v2907_v56 = vld [vmem:[#allocation10 + $0xbf8] sm:$0xff] }
 0x456   : > { %6291 = vmatprep.subr.bf16.mxu0 %v9455_v38  ;;  %v3031_v52 = vld [vmem:[#allocation10 + $0xfd8] sm:$0xff]  ;;  %v9423_v57 = vcombine.high %v2903_v6, %v2907_v56  ;;  %v9422_v41 = vcombine.low %v2903_v6, %v2907_v56 }
 0x457   : > { %v3035_v32 = vld [vmem:[#allocation10 + $0xff8] sm:$0xff] }
 0x458   : > { %6249 = vmatpush1.bf16.msra.mxu1 %v9326_v53  ;;  %v9551_v8 = vcombine.high %v3031_v52, %v3035_v32  ;;  %v2895_v9 = vld [vmem:[#allocation10 + $0xb98] sm:$0xff]  ;;  %v9550_v42 = vcombine.low %v3031_v52, %v3035_v32 }
 0x459   : > { %6292 = vmatpush1.bf16.msra.mxu0 %v9454_v54  ;;  %6250 = vmatprep.subr.bf16.mxu1 %v9319_v55  ;;  %v2899_v7 = vld [vmem:[#allocation10 + $0xbb8] sm:$0xff] }
 0x45a   : > { %6293 = vmatprep.subr.bf16.mxu0 %v9447_v25  ;;  %v3023_v10 = vld [vmem:[#allocation10 + $0xf98] sm:$0xff]  ;;  %v9415_v43 = vcombine.high %v2895_v9, %v2899_v7  ;;  %v9414_v60 = vcombine.low %v2895_v9, %v2899_v7 }
 0x45b   : > { %v3027_v38 = vld [vmem:[#allocation10 + $0xfb8] sm:$0xff] }
 0x45c   : > { %6251 = vmatpush1.bf16.msra.mxu1 %v9318_v63  ;;  %v9543_v48 = vcombine.high %v3023_v10, %v3027_v38  ;;  %v2887_v53 = vld [vmem:[#allocation10 + $0xb58] sm:$0xff]  ;;  %v9542_v61 = vcombine.low %v3023_v10, %v3027_v38 }
 0x45d   : > { %6294 = vmatpush1.bf16.msra.mxu0 %v9446_v13  ;;  %6252 = vmatprep.subr.bf16.mxu1 %v9311_v16  ;;  %v2891_v54 = vld [vmem:[#allocation10 + $0xb78] sm:$0xff] }
 0x45e   : > { %6295 = vmatprep.subr.bf16.mxu0 %v9439_v40  ;;  %v3015_v55 = vld [vmem:[#allocation10 + $0xf58] sm:$0xff]  ;;  %v9407_v27 = vcombine.high %v2887_v53, %v2891_v54  ;;  %v9406_v26 = vcombine.low %v2887_v53, %v2891_v54 }
 0x45f   : > { %v3019_v25 = vld [vmem:[#allocation10 + $0xf78] sm:$0xff] }
 0x460   : > { %6253 = vmatpush1.bf16.msra.mxu1 %v9310_v46  ;;  %v9535_v62 = vcombine.high %v3015_v55, %v3019_v25  ;;  %v2879_v63 = vld [vmem:[#allocation10 + $0xb18] sm:$0xff]  ;;  %v9534_v59 = vcombine.low %v3015_v55, %v3019_v25 }
 0x461   : > { %6296 = vmatpush1.bf16.msra.mxu0 %v9438_v47  ;;  %6254 = vmatprep.subr.bf16.mxu1 %v9303_v49  ;;  %v2883_v13 = vld [vmem:[#allocation10 + $0xb38] sm:$0xff] }
 0x462   : > { %6297 = vmatprep.subr.bf16.mxu0 %v9431_v51  ;;  %v3007_v16 = vld [vmem:[#allocation10 + $0xf18] sm:$0xff]  ;;  %v9399_v45 = vcombine.high %v2879_v63, %v2883_v13  ;;  %v9398_v6 = vcombine.low %v2879_v63, %v2883_v13  ;;  %v5936_v63 = vpop.f32.mrf.mxu1 }
 0x463   : > { %v3011_v40 = vld [vmem:[#allocation10 + $0xf38] sm:$0xff] }
 0x464   : > { %6255 = vmatpush1.bf16.msra.mxu1 %v9302_v33  ;;  %v9527_v35 = vcombine.high %v3007_v16, %v3011_v40  ;;  %v2871_v46 = vld [vmem:[#allocation10 + $0xad8] sm:$0xff]  ;;  %v9526_v56 = vcombine.low %v3007_v16, %v3011_v40 }
 0x465   : > { %6298 = vmatpush1.bf16.msra.mxu0 %v9430_v34  ;;  %6256 = vmatprep.subr.bf16.mxu1 %v9423_v57  ;;  %v2875_v47 = vld [vmem:[#allocation10 + $0xaf8] sm:$0xff]  ;;  %v11512_v57 = vld [vmem:[#allocation12] sm:$0xff] }
 0x466   : > { %6299 = vmatprep.subr.bf16.mxu0 %v9551_v8  ;;  %v2999_v49 = vld [vmem:[#allocation10 + $0xed8] sm:$0xff]  ;;  %v9391_v52 = vcombine.high %v2871_v46, %v2875_v47  ;;  %v3045_v8 = vrot.slane %v11512_v57, %v11361_v20  ;;  %v3053_v10 = vrot.slane %v11512_v57, %v11364_v22  ;;  %v9390_v38 = vcombine.low %v2871_v46, %v2875_v47 }
 0x467   : > { %v3003_v51 = vld [vmem:[#allocation10 + $0xef8] sm:$0xff] }
 0x468   : > { %6257 = vmatpush2.bf16.msra.mxu1 %v9422_v41  ;;  %v9519_v32 = vcombine.high %v2999_v49, %v3003_v51  ;;  %v2863_v33 = vld [vmem:[#allocation10 + $0xa98] sm:$0xff]  ;;  %v5679_v41 = vadd.f32 %v11462_v4, %v3045_v8  ;;  %v5675_v25 = vadd.f32 %v11453_v2, %v3045_v8 }
 0x469   : > { %6300 = vmatpush2.bf16.msra.mxu0 %v9550_v42  ;;  %6258 = vmatprep.subr.bf16.mxu1 %v9415_v43  ;;  %v2867_v34 = vld [vmem:[#allocation10 + $0xab8] sm:$0xff]  ;;  %v9518_v42 = vcombine.low %v2999_v49, %v3003_v51 }
 0x46a   : > { %6301 = vmatprep.subr.bf16.mxu0 %v9543_v48  ;;  %v2991_v9 = vld [vmem:[#allocation10 + $0xe98] sm:$0xff]  ;;  %v9383_v43 = vcombine.high %v2863_v33, %v2867_v34  ;;  %v5851_v48 = vadd.f32 %v11496_v36, %v3053_v10  ;;  %v5722_v4 = vadd.f32 %v11464_v5, %v5679_v41  ;;  %v5718_v2 = vadd.f32 %v11455_v3, %v5675_v25 }
 0x46b   : > { %v2995_v7 = vld [vmem:[#allocation10 + $0xeb8] sm:$0xff] }
 0x46c   : > { %6259 = vmatpush2.bf16.msra.mxu1 %v9414_v60  ;;  %v9511_v53 = vcombine.high %v2991_v9, %v2995_v7  ;;  %v2855_v54 = vld [vmem:[#allocation10 + $0xa58] sm:$0xff]  ;;  %v9510_v13 = vcombine.low %v2991_v9, %v2995_v7  ;;  %v5894_v36 = vadd.f32 %v11498_v39, %v5851_v48  ;;  %v5761_v49 = vadd.f32 %v11470_v28, %v5718_v2 }
 0x46d   : > { %6302 = vmatpush2.bf16.msra.mxu0 %v9542_v61  ;;  %6260 = vmatprep.subr.bf16.mxu1 %v9407_v27  ;;  %v2859_v55 = vld [vmem:[#allocation10 + $0xa78] sm:$0xff]  ;;  %v5847_v27 = vadd.f32 %v11487_v0, %v3053_v10 }
 0x46e   : > { %6303 = vmatprep.subr.bf16.mxu0 %v9535_v62  ;;  %v2983_v60 = vld [vmem:[#allocation10 + $0xe58] sm:$0xff]  ;;  %v9382_v62 = vcombine.low %v2863_v33, %v2867_v34  ;;  %v9375_v16 = vcombine.high %v2855_v54, %v2859_v55  ;;  %v5937_v5 = vadd.f32 %v5936_v63, %v5894_v36  ;;  %v9374_v47 = vcombine.low %v2855_v54, %v2859_v55 }
 0x46f   : > { %v2987_v61 = vld [vmem:[#allocation10 + $0xe78] sm:$0xff]  ;;  %v5890_v46 = vadd.f32 %v11492_v17, %v5847_v27  ;;  %v5804_v17 = vadd.f32 %v11472_v31, %v5761_v49 }
 0x470   : > { %6261 = vmatpush2.bf16.msra.mxu1 %v9406_v26  ;;  %v9503_v40 = vcombine.high %v2983_v60, %v2987_v61  ;;  %v2847_v26 = vld [vmem:[#allocation10 + $0xa18] sm:$0xff]  ;;  %v9502_v39 = vcombine.low %v2983_v60, %v2987_v61 }
 0x471   : > { %6304 = vmatpush2.bf16.msra.mxu0 %v9534_v59  ;;  %6262 = vmatprep.subr.bf16.mxu1 %v9399_v45  ;;  %v2851_v59 = vld [vmem:[#allocation10 + $0xa38] sm:$0xff]  ;;  %v5765_v45 = vadd.f32 %v11480_v44, %v5722_v4  ;;  %v5979_v44 = vpop.f32.mrf.mxu0  ;;  %v6327_v10 = vmax.f32 %v5804_v17, 0.0 }
 0x472   : > { %6305 = vmatprep.subr.bf16.mxu0 %v9527_v35  ;;  %v2975_v0 = vld [vmem:[#allocation10 + $0xe18] sm:$0xff]  ;;  %v9367_v51 = vcombine.high %v2847_v26, %v2851_v59 }
 0x473   : > { %v2979_v35 = vld [vmem:[#allocation10 + $0xe38] sm:$0xff]  ;;  %v5808_v3 = vadd.f32 %v11482_v50, %v5765_v45 }
 0x474   : > { %6263 = vmatpush2.bf16.msra.mxu1 %v9398_v6  ;;  %v5933_v6 = vadd.f32 %v11504_v37, %v5890_v46  ;;  %v9494_v33 = vcombine.low %v2975_v0, %v2979_v35  ;;  %v10295_v28 = vld [vmem:[#allocation13 + $0xe4] ss:$16 sps:$4 sm:$0xff]   ;;  %v10293_v7 = vld [vmem:[#allocation13 + $0xe0] ss:$16 sps:$4 sm:$0xff]  }
 0x475   : > { %6306 = vmatpush2.bf16.msra.mxu0 %v9526_v56  ;;  %6264 = vmatprep.subr.bf16.mxu1 %v9391_v52  ;;  %v9495_v56 = vcombine.high %v2975_v0, %v2979_v35  ;;  %v5980_v52 = vadd.f32 %v5979_v44, %v5937_v5  ;;  %v10298_v8 = vld [vmem:[#allocation13 + $0x2e4] ss:$16 sps:$4 sm:$0xff]   ;;  %v6335_v9 = vmax.f32 %v5808_v3, 0.0  ;;  %v10296_v50 = vld [vmem:[#allocation13 + $0x2e0] ss:$16 sps:$4 sm:$0xff]  }
 0x476   : > { %6307 = vmatprep.subr.bf16.mxu0 %v9519_v32  ;;  %v9366_v32 = vcombine.low %v2847_v26, %v2851_v59  ;;  %v5976_v34 = vadd.f32 %v11507_v58, %v5933_v6  ;;  %v10301_v41 = vld [vmem:[#allocation13 + $0xc4] ss:$16 sps:$4 sm:$0xff]   ;;  %v10299_v58 = vld [vmem:[#allocation13 + $0xc0] ss:$16 sps:$4 sm:$0xff]  }
 0x477   : > { %v6337_v37 = vmax.f32 %v5980_v52, 0.0  ;;  %v11532_v31 = vpack.c.bf16 %v6335_v9, %v6327_v10  ;;  %v10302_v48 = vld [vmem:[#allocation13 + $0x2c0] ss:$16 sps:$4 sm:$0xff]   ;;  %v10310_v54 = vld [vmem:[#allocation13 + $0x2a4] ss:$16 sps:$4 sm:$0xff]  }
 0x478   : > { %6265 = vmatpush2.bf16.msra.mxu1 %v9390_v38  ;;  %v6329_v38 = vmax.f32 %v5976_v34, 0.0  ;;  %v10305_v55 = vld [vmem:[#allocation13 + $0xa0] ss:$16 sps:$4 sm:$0xff]   ;;  %v10313_v25 = vld [vmem:[#allocation13 + $0x84] ss:$16 sps:$4 sm:$0xff]  }
 0x479   : > { %6308 = vmatpush2.bf16.msra.mxu0 %v9518_v42  ;;  %6266 = vmatprep.subr.bf16.mxu1 %v9383_v43  ;;  %v10304_v42 = vld [vmem:[#allocation13 + $0x2c4] ss:$16 sps:$4 sm:$0xff]   ;;  %v10311_v60 = vld [vmem:[#allocation13 + $0x80] ss:$16 sps:$4 sm:$0xff]  }
 0x47a   : > { %6309 = vmatprep.subr.bf16.mxu0 %v9511_v53  ;;  %v11535_v43 = vpack.c.bf16 %v6337_v37, %v6329_v38  ;;  %v10307_v53 = vld [vmem:[#allocation13 + $0xa4] ss:$16 sps:$4 sm:$0xff]   ;;  %v10314_v61 = vld [vmem:[#allocation13 + $0x280] ss:$16 sps:$4 sm:$0xff]  }
 0x47b   : > { %v10319_v27 = vld [vmem:[#allocation13 + $0x64] ss:$16 sps:$4 sm:$0xff]   ;;  %v10317_v4 = vld [vmem:[#allocation13 + $0x60] ss:$16 sps:$4 sm:$0xff]  }
 0x47c   : > { %6267 = vmatpush2.bf16.msra.mxu1 %v9382_v62  ;;  %v10322_v62 = vld [vmem:[#allocation13 + $0x264] ss:$16 sps:$4 sm:$0xff]   ;;  %v10320_v63 = vld [vmem:[#allocation13 + $0x260] ss:$16 sps:$4 sm:$0xff]  }
 0x47d   : > { %6310 = vmatpush2.bf16.msra.mxu0 %v9510_v13  ;;  %6268 = vmatprep.subr.bf16.mxu1 %v9375_v16  ;;  %v10325_v13 = vld [vmem:[#allocation13 + $0x44] ss:$16 sps:$4 sm:$0xff]   ;;  %v10323_v36 = vld [vmem:[#allocation13 + $0x40] ss:$16 sps:$4 sm:$0xff]  }
 0x47e   : > { %6311 = vmatprep.subr.bf16.mxu0 %v9503_v40  ;;  %v10328_v16 = vld [vmem:[#allocation13 + $0x244] ss:$16 sps:$4 sm:$0xff]   ;;  %v10326_v40 = vld [vmem:[#allocation13 + $0x240] ss:$16 sps:$4 sm:$0xff]  }
 0x47f   : > { %v10331_v26 = vld [vmem:[#allocation13 + $0x24] ss:$16 sps:$4 sm:$0xff]   ;;  %v10329_v2 = vld [vmem:[#allocation13 + $0x20] ss:$16 sps:$4 sm:$0xff]  }
 0x480   : > { %6269 = vmatpush2.bf16.msra.mxu1 %v9374_v47  ;;  %v10334_v59 = vld [vmem:[#allocation13 + $0x224] ss:$16 sps:$4 sm:$0xff]   ;;  %v10332_v45 = vld [vmem:[#allocation13 + $0x220] ss:$16 sps:$4 sm:$0xff]  }
 0x481   : > { %6312 = vmatpush2.bf16.msra.mxu0 %v9502_v39  ;;  %6270 = vmatprep.subr.bf16.mxu1 %v9367_v51  ;;  %v10337_v0 = vld [vmem:[#allocation13 + $0x4] ss:$16 sps:$4 sm:$0xff]   ;;  %v10335_v46 = vld [vmem:[#allocation13] ss:$16 sps:$4 sm:$0xff]  }
 0x482   : > { %6313 = vmatprep.subr.bf16.mxu0 %v9495_v56  ;;  %v10340_v35 = vld [vmem:[#allocation13 + $0x204] ss:$16 sps:$4 sm:$0xff]   ;;  %v10338_v5 = vld [vmem:[#allocation13 + $0x200] ss:$16 sps:$4 sm:$0xff]  }
 0x483   : > { %v10343_v47 = vld [vmem:[#allocation13 + $0x1e4] ss:$16 sps:$4 sm:$0xff]   ;;  %v10341_v39 = vld [vmem:[#allocation13 + $0x1e0] ss:$16 sps:$4 sm:$0xff]  }
 0x484   : > { %6271 = vmatpush2.bf16.msra.mxu1 %v9366_v32  ;;  %v10346_v49 = vld [vmem:[#allocation13 + $0x3e4] ss:$16 sps:$4 sm:$0xff]   ;;  %v10344_v51 = vld [vmem:[#allocation13 + $0x3e0] ss:$16 sps:$4 sm:$0xff]  }
 0x485   : > { %6314 = vmatpush2.bf16.msra.mxu0 %v9494_v33  ;;  %7908 = vmatprep.subr.bf16.mxu1 %v10295_v28  ;;  %v10349_v6 = vld [vmem:[#allocation13 + $0x1c4] ss:$16 sps:$4 sm:$0xff]   ;;  %v10347_v3 = vld [vmem:[#allocation13 + $0x1c0] ss:$16 sps:$4 sm:$0xff]  }
 0x486   : > { %7951 = vmatprep.subr.bf16.mxu0 %v10298_v8  ;;  %v10352_v56 = vld [vmem:[#allocation13 + $0x3c4] ss:$16 sps:$4 sm:$0xff]   ;;  %v10350_v44 = vld [vmem:[#allocation13 + $0x3c0] ss:$16 sps:$4 sm:$0xff]  }
 0x487   : > { %6273 = vmatmul.mubr.bf16.vlgmr.msra.gmra.mxu1 %v11434_v14  ;;  %v10308_v14 = vld [vmem:[#allocation13 + $0x2a0] ss:$16 sps:$4 sm:$0xff]   ;;  %v10355_v52 = vld [vmem:[#allocation13 + $0x1a4] ss:$16 sps:$4 sm:$0xff]  }
 0x488   : > { %6316 = vmatmul.mubr.bf16.vlgmr.msra.gmra.mxu0 %v11436_v15  ;;  %7909 = vmatpush1.bf16.msra.mxu1 %v10293_v7  ;;  %v10316_v15 = vld [vmem:[#allocation13 + $0x284] ss:$16 sps:$4 sm:$0xff]   ;;  %v10353_v17 = vld [vmem:[#allocation13 + $0x1a0] ss:$16 sps:$4 sm:$0xff]  }
 0x489   : > { %7940 = vmatprep.mubr.bf16.mxu1 %v11532_v31  ;;  %7952 = vmatpush1.bf16.msra.mxu0 %v10296_v50  ;;  %v10358_v32 = vld [vmem:[#allocation13 + $0x3a4] ss:$16 sps:$4 sm:$0xff]   ;;  %v10356_v33 = vld [vmem:[#allocation13 + $0x3a0] ss:$16 sps:$4 sm:$0xff]  }
 0x48a   : > { %7983 = vmatprep.mubr.bf16.mxu0 %v11535_v43  ;;  %7910 = vmatprep.subr.bf16.mxu1 %v10301_v41  ;;  %v10361_v28 = vld [vmem:[#allocation13 + $0x184] ss:$16 sps:$4 sm:$0xff]   ;;  %v10359_v8 = vld [vmem:[#allocation13 + $0x180] ss:$16 sps:$4 sm:$0xff]  }
 0x48b   : > { %7953 = vmatprep.subr.bf16.mxu0 %v10304_v42  ;;  %v10364_v34 = vld [vmem:[#allocation13 + $0x384] ss:$16 sps:$4 sm:$0xff]   ;;  %v10362_v9 = vld [vmem:[#allocation13 + $0x380] ss:$16 sps:$4 sm:$0xff]  }
 0x48c   : > { %7911 = vmatpush1.bf16.msra.mxu1 %v10299_v58  ;;  %v10367_v37 = vld [vmem:[#allocation13 + $0x164] ss:$16 sps:$4 sm:$0xff]   ;;  %v10365_v10 = vld [vmem:[#allocation13 + $0x160] ss:$16 sps:$4 sm:$0xff]   ;;  %v11540_v58 = vpop.f32.mrf.mxu1 }
 0x48d   : > { %7954 = vmatpush1.bf16.msra.mxu0 %v10302_v48  ;;  %7912 = vmatprep.subr.bf16.mxu1 %v10307_v53  ;;  %v10370_v7 = vld [vmem:[#allocation13 + $0x364] ss:$16 sps:$4 sm:$0xff]   ;;  %v10368_v50 = vld [vmem:[#allocation13 + $0x360] ss:$16 sps:$4 sm:$0xff]  }
 0x48e   : > { %7955 = vmatprep.subr.bf16.mxu0 %v10310_v54  ;;  %v10373_v38 = vld [vmem:[#allocation13 + $0x144] ss:$16 sps:$4 sm:$0xff]   ;;  %v10371_v42 = vld [vmem:[#allocation13 + $0x140] ss:$16 sps:$4 sm:$0xff]   ;;  %v11542_v54 = vpop.f32.mrf.mxu0 }
 0x48f   : > { %v10376_v41 = vld [vmem:[#allocation13 + $0x344] ss:$16 sps:$4 sm:$0xff]   ;;  %v10374_v48 = vld [vmem:[#allocation13 + $0x340] ss:$16 sps:$4 sm:$0xff]  }
 0x490   : > { %7913 = vmatpush1.bf16.msra.mxu1 %v10305_v55  ;;  %v10379_v53 = vld [vmem:[#allocation13 + $0x124] ss:$16 sps:$4 sm:$0xff]  }
 0x491   : > { %7956 = vmatpush1.bf16.msra.mxu0 %v10308_v14  ;;  %7914 = vmatprep.subr.bf16.mxu1 %v10313_v25  ;;  %v10382_v55 = vld [vmem:[#allocation13 + $0x324] ss:$16 sps:$4 sm:$0xff]   ;;  %v10377_v14 = vld [vmem:[#allocation13 + $0x120] ss:$16 sps:$4 sm:$0xff]   ;;  %v6018_v25 = vpop.f32.mrf.mxu1 }
 0x492   : > { %7957 = vmatprep.subr.bf16.mxu0 %v10316_v15  ;;  %v10380_v15 = vld [vmem:[#allocation13 + $0x320] ss:$16 sps:$4 sm:$0xff]  }
 0x494   : > { %7915 = vmatpush1.bf16.msra.mxu1 %v10311_v60  ;;  %v10385_v60 = vld [vmem:[#allocation13 + $0x104] ss:$16 sps:$4 sm:$0xff]  }
 0x495   : > { %7958 = vmatpush1.bf16.msra.mxu0 %v10314_v61  ;;  %7916 = vmatprep.subr.bf16.mxu1 %v10319_v27  ;;  %v6061_v61 = vpop.f32.mrf.mxu0  ;;  %v10388_v27 = vld [vmem:[#allocation13 + $0x304] ss:$16 sps:$4 sm:$0xff]  }
 0x496   : > { %7959 = vmatprep.subr.bf16.mxu0 %v10322_v62  ;;  %v3061_v62 = vrot.slane %v11512_v57, %v1990_v21  ;;  %v10449_v21 = vld [vmem:[#allocation13 + $0x6e0] ss:$16 sps:$4 sm:$0xff]  }
 0x498   : > { %7917 = vmatpush1.bf16.msra.mxu1 %v10317_v4  ;;  %v10383_v4 = vld [vmem:[#allocation13 + $0x100] ss:$16 sps:$4 sm:$0xff]  }
 0x499   : > { %7960 = vmatpush1.bf16.msra.mxu0 %v10320_v63  ;;  %7918 = vmatprep.subr.bf16.mxu1 %v10325_v13  ;;  %v11547_v63 = vpop.f32.mrf.mxu1  ;;  %v10386_v13 = vld [vmem:[#allocation13 + $0x300] ss:$16 sps:$4 sm:$0xff]  }
 0x49a   : > { %7961 = vmatprep.subr.bf16.mxu0 %v10328_v16  ;;  %v10391_v16 = vld [vmem:[#allocation13 + $0x4e4] ss:$16 sps:$4 sm:$0xff]  }
 0x49c   : > { %7919 = vmatpush1.bf16.msra.mxu1 %v10323_v36  ;;  %v11549_v36 = vpop.f32.mrf.mxu0 }
 0x49d   : > { %7962 = vmatpush1.bf16.msra.mxu0 %v10326_v40  ;;  %7920 = vmatprep.subr.bf16.mxu1 %v10331_v26  ;;  %v10451_v40 = vld [vmem:[#allocation13 + $0x6e4] ss:$16 sps:$4 sm:$0xff]   ;;  %v6019_v26 = vadd.f32 %v6018_v25, %v3061_v62 }
 0x49e   : > { %7963 = vmatprep.subr.bf16.mxu0 %v10334_v59  ;;  %v10389_v59 = vld [vmem:[#allocation13 + $0x4e0] ss:$16 sps:$4 sm:$0xff]  }
 0x4a0   : > { %7921 = vmatpush1.bf16.msra.mxu1 %v10329_v2  ;;  %v6022_v2 = vpop.f32.mrf.mxu1 }
 0x4a1   : > { %7964 = vmatpush1.bf16.msra.mxu0 %v10332_v45  ;;  %7922 = vmatprep.subr.bf16.mxu1 %v10337_v0  ;;  %v10394_v45 = vld [vmem:[#allocation13 + $0x4c4] ss:$16 sps:$4 sm:$0xff]   ;;  %v6065_v0 = vpop.f32.mrf.mxu0 }
 0x4a2   : > { %7965 = vmatprep.subr.bf16.mxu0 %v10340_v35  ;;  %v10457_v35 = vld [vmem:[#allocation13 + $0x6c4] ss:$16 sps:$4 sm:$0xff]  }
 0x4a4   : > { %7923 = vmatpush1.bf16.msra.mxu1 %v10335_v46 }
 0x4a5   : > { %7966 = vmatpush1.bf16.msra.mxu0 %v10338_v5  ;;  %7924 = vmatprep.subr.bf16.mxu1 %v10343_v47  ;;  %v6062_v5 = vadd.f32 %v6061_v61, %v6019_v26  ;;  %v6023_v47 = vadd.f32 %v6022_v2, %v3061_v62  ;;  %v10473_v61 = vld [vmem:[#allocation13 + $0x660] ss:$16 sps:$4 sm:$0xff]   ;;  %v10412_v26 = vld [vmem:[#allocation13 + $0x404] ss:$16 sps:$4 sm:$0xff]  }
 0x4a6   : > { %7967 = vmatprep.subr.bf16.mxu0 %v10346_v49  ;;  %v10404_v62 = vld [vmem:[#allocation13 + $0x440] ss:$16 sps:$4 sm:$0xff]   ;;  %v10493_v2 = vld [vmem:[#allocation13 + $0x604] ss:$16 sps:$4 sm:$0xff]  }
 0x4a8   : > { %7925 = vmatpush2.bf16.msra.mxu1 %v10341_v39  ;;  %v10392_v39 = vld [vmem:[#allocation13 + $0x4c0] ss:$16 sps:$4 sm:$0xff]  }
 0x4a9   : > { %7968 = vmatpush2.bf16.msra.mxu0 %v10344_v51  ;;  %7926 = vmatprep.subr.bf16.mxu1 %v10349_v6  ;;  %v10397_v6 = vld [vmem:[#allocation13 + $0x4a4] ss:$16 sps:$4 sm:$0xff]  }
 0x4aa   : > { %7969 = vmatprep.subr.bf16.mxu0 %v10352_v56  ;;  %v10455_v56 = vld [vmem:[#allocation13 + $0x6c0] ss:$16 sps:$4 sm:$0xff]  }
 0x4ac   : > { %7927 = vmatpush2.bf16.msra.mxu1 %v10347_v3 }
 0x4ad   : > { %7970 = vmatpush2.bf16.msra.mxu0 %v10350_v44  ;;  %7928 = vmatprep.subr.bf16.mxu1 %v10355_v52  ;;  %v10463_v52 = vld [vmem:[#allocation13 + $0x6a4] ss:$16 sps:$4 sm:$0xff]  }
 0x4ae   : > { %7971 = vmatprep.subr.bf16.mxu0 %v10358_v32 }
 0x4b0   : > { %7929 = vmatpush2.bf16.msra.mxu1 %v10353_v17  ;;  %v6066_v17 = vadd.f32 %v6065_v0, %v6023_v47  ;;  %v10491_v0 = vld [vmem:[#allocation13 + $0x600] ss:$16 sps:$4 sm:$0xff]   ;;  %v10418_v47 = vld [vmem:[#allocation13 + $0x5c4] ss:$16 sps:$4 sm:$0xff]  }
 0x4b1   : > { %7972 = vmatpush2.bf16.msra.mxu0 %v10356_v33  ;;  %7930 = vmatprep.subr.bf16.mxu1 %v10361_v28  ;;  %v10395_v28 = vld [vmem:[#allocation13 + $0x4a0] ss:$16 sps:$4 sm:$0xff]  }
 0x4b2   : > { %7973 = vmatprep.subr.bf16.mxu0 %v10364_v34 }
 0x4b4   : > { %7931 = vmatpush2.bf16.msra.mxu1 %v10359_v8  ;;  %v10400_v8 = vld [vmem:[#allocation13 + $0x484] ss:$16 sps:$4 sm:$0xff]  }
 0x4b5   : > { %7974 = vmatpush2.bf16.msra.mxu0 %v10362_v9  ;;  %7932 = vmatprep.subr.bf16.mxu1 %v10367_v37  ;;  %v10461_v9 = vld [vmem:[#allocation13 + $0x6a0] ss:$16 sps:$4 sm:$0xff]  }
 0x4b6   : > { %7975 = vmatprep.subr.bf16.mxu0 %v10370_v7 }
 0x4b8   : > { %7933 = vmatpush2.bf16.msra.mxu1 %v10365_v10  ;;  %v10469_v10 = vld [vmem:[#allocation13 + $0x684] ss:$16 sps:$4 sm:$0xff]  }
 0x4b9   : > { %7976 = vmatpush2.bf16.msra.mxu0 %v10368_v50  ;;  %7934 = vmatprep.subr.bf16.mxu1 %v10373_v38 }
 0x4ba   : > { %7977 = vmatprep.subr.bf16.mxu0 %v10376_v41  ;;  %v10398_v41 = vld [vmem:[#allocation13 + $0x480] ss:$16 sps:$4 sm:$0xff]  }
 0x4bc   : > { %7935 = vmatpush2.bf16.msra.mxu1 %v10371_v42  ;;  %v10403_v42 = vld [vmem:[#allocation13 + $0x464] ss:$16 sps:$4 sm:$0xff]  }
 0x4bd   : > { %7978 = vmatpush2.bf16.msra.mxu0 %v10374_v48  ;;  %7936 = vmatprep.subr.bf16.mxu1 %v10379_v53  ;;  %v10467_v48 = vld [vmem:[#allocation13 + $0x680] ss:$16 sps:$4 sm:$0xff]  }
 0x4be   : > { %7979 = vmatprep.subr.bf16.mxu0 %v10382_v55 }
 0x4c0   : > { %7937 = vmatpush2.bf16.msra.mxu1 %v10377_v14  ;;  %v10475_v14 = vld [vmem:[#allocation13 + $0x664] ss:$16 sps:$4 sm:$0xff]  }
 0x4c1   : > { %7980 = vmatpush2.bf16.msra.mxu0 %v10380_v15  ;;  %7938 = vmatprep.subr.bf16.mxu1 %v10385_v60  ;;  %v10401_v15 = vld [vmem:[#allocation13 + $0x460] ss:$16 sps:$4 sm:$0xff]   ;;  %v10406_v60 = vld [vmem:[#allocation13 + $0x444] ss:$16 sps:$4 sm:$0xff]  }
 0x4c2   : > { %7981 = vmatprep.subr.bf16.mxu0 %v10388_v27  ;;  %v10481_v27 = vld [vmem:[#allocation13 + $0x644] ss:$16 sps:$4 sm:$0xff]  }
 0x4c4   : > { %7939 = vmatpush2.bf16.msra.mxu1 %v10383_v4  ;;  %v10409_v4 = vld [vmem:[#allocation13 + $0x424] ss:$16 sps:$4 sm:$0xff]  }
 0x4c5   : > { %7982 = vmatpush2.bf16.msra.mxu0 %v10386_v13  ;;  %7994 = vmatprep.subr.bf16.mxu1 %v10391_v16  ;;  %v10479_v13 = vld [vmem:[#allocation13 + $0x640] ss:$16 sps:$4 sm:$0xff]   ;;  %v10487_v16 = vld [vmem:[#allocation13 + $0x624] ss:$16 sps:$4 sm:$0xff]  }
 0x4c6   : > { %8037 = vmatprep.subr.bf16.mxu0 %v10451_v40  ;;  %v10407_v40 = vld [vmem:[#allocation13 + $0x420] ss:$16 sps:$4 sm:$0xff]  }
 0x4c7   : > { %v11551_v46 = vpop.f32.mrf.mxu1  ;;  %7941 = vmatmul.mubr.bf16.vlgmr.msra.gmra.mxu1 %v11476_v1 }
 0x4c8   : > { %v11554_v49 = vpop.f32.mrf.mxu0  ;;  %7984 = vmatmul.mubr.bf16.vlgmr.msra.gmra.mxu0 %v11510_v12  ;;  %7995 = vmatpush1.bf16.msra.mxu1 %v10389_v59  ;;  %v10485_v59 = vld [vmem:[#allocation13 + $0x620] ss:$16 sps:$4 sm:$0xff]  }
 0x4c9   : > { %v6104_v51 = vpop.f32.mrf.mxu1  ;;  %7996 = vmatprep.subr.bf16.mxu1 %v10394_v45  ;;  %8038 = vmatpush1.bf16.msra.mxu0 %v10449_v21  ;;  %v10410_v45 = vld [vmem:[#allocation13 + $0x400] ss:$16 sps:$4 sm:$0xff]   ;;  %v10415_v21 = vld [vmem:[#allocation13 + $0x5e4] ss:$16 sps:$4 sm:$0xff]  }
 0x4ca   : > { %v6105_v3 = vadd.f32 %v6104_v51, %v6062_v5  ;;  %v6147_v44 = vpop.f32.mrf.mxu0  ;;  %8039 = vmatprep.subr.bf16.mxu0 %v10457_v35  ;;  %v10499_v35 = vld [vmem:[#allocation13 + $0x7e4] ss:$16 sps:$4 sm:$0xff]   ;;  %v10413_v5 = vld [vmem:[#allocation13 + $0x5e0] ss:$16 sps:$4 sm:$0xff]  }
 0x4cb   : > { %v11557_v32 = vpop.f32.mrf.mxu1  ;;  %v10505_v51 = vld [vmem:[#allocation13 + $0x7c4] ss:$16 sps:$4 sm:$0xff]  }
 0x4cc   : > { %v11559_v33 = vpop.f32.mrf.mxu0  ;;  %7997 = vmatpush1.bf16.msra.mxu1 %v10392_v39  ;;  %v6148_v37 = vadd.f32 %v6147_v44, %v6105_v3  ;;  %v10497_v39 = vld [vmem:[#allocation13 + $0x7e0] ss:$16 sps:$4 sm:$0xff]   ;;  %v10511_v44 = vld [vmem:[#allocation13 + $0x7a4] ss:$16 sps:$4 sm:$0xff]  }
 0x4cd   : > { %v6108_v34 = vpop.f32.mrf.mxu1  ;;  %7998 = vmatprep.subr.bf16.mxu1 %v10397_v6  ;;  %8040 = vmatpush1.bf16.msra.mxu0 %v10455_v56  ;;  %v10416_v6 = vld [vmem:[#allocation13 + $0x5c0] ss:$16 sps:$4 sm:$0xff]   ;;  %v10421_v56 = vld [vmem:[#allocation13 + $0x5a4] ss:$16 sps:$4 sm:$0xff]  }
 0x4ce   : > { %v6109_v7 = vadd.f32 %v6108_v34, %v6066_v17  ;;  %8041 = vmatprep.subr.bf16.mxu0 %v10463_v52  ;;  %v6151_v50 = vpop.f32.mrf.mxu0  ;;  %v6331_v53 = vmax.f32 %v6148_v37, 0.0  ;;  %v10503_v3 = vld [vmem:[#allocation13 + $0x7c0] ss:$16 sps:$4 sm:$0xff]   ;;  %v10424_v17 = vld [vmem:[#allocation13 + $0x584] ss:$16 sps:$4 sm:$0xff]  }
 0x4cf   : > { %v10419_v52 = vld [vmem:[#allocation13 + $0x5a0] ss:$16 sps:$4 sm:$0xff]   ;;  %v10517_v34 = vld [vmem:[#allocation13 + $0x784] ss:$16 sps:$4 sm:$0xff]  }
 0x4d0   : > { %v6152_v38 = vadd.f32 %v6151_v50, %v6109_v7  ;;  %7999 = vmatpush1.bf16.msra.mxu1 %v10395_v28  ;;  %v10509_v28 = vld [vmem:[#allocation13 + $0x7a0] ss:$16 sps:$4 sm:$0xff]   ;;  %v10427_v37 = vld [vmem:[#allocation13 + $0x564] ss:$16 sps:$4 sm:$0xff]  }
 0x4d1   : > { %8000 = vmatprep.subr.bf16.mxu1 %v10400_v8  ;;  %8042 = vmatpush1.bf16.msra.mxu0 %v10461_v9  ;;  %v10422_v8 = vld [vmem:[#allocation13 + $0x580] ss:$16 sps:$4 sm:$0xff]   ;;  %v3057_v9 = vrot.slane %v11512_v57, %v1986_v29 }
 0x4d2   : > { %v6339_v55 = vmax.f32 %v6152_v38, 0.0  ;;  %8043 = vmatprep.subr.bf16.mxu0 %v10469_v10  ;;  %v10515_v7 = vld [vmem:[#allocation13 + $0x780] ss:$16 sps:$4 sm:$0xff]   ;;  %v10523_v10 = vld [vmem:[#allocation13 + $0x764] ss:$16 sps:$4 sm:$0xff]  }
 0x4d3   : > { %v6021_v50 = vadd.f32 %v11547_v63, %v3057_v9  ;;  %v10425_v38 = vld [vmem:[#allocation13 + $0x560] ss:$16 sps:$4 sm:$0xff]   ;;  %v10433_v63 = vld [vmem:[#allocation13 + $0x524] ss:$16 sps:$4 sm:$0xff]  }
 0x4d4   : > { %v11561_v25 = vpack.c.bf16 %v6339_v55, %v6331_v53  ;;  %8001 = vmatpush1.bf16.msra.mxu1 %v10398_v41  ;;  %v6017_v41 = vadd.f32 %v11540_v58, %v3057_v9  ;;  %v10529_v53 = vld [vmem:[#allocation13 + $0x744] ss:$16 sps:$4 sm:$0xff]   ;;  %v10428_v55 = vld [vmem:[#allocation13 + $0x540] ss:$16 sps:$4 sm:$0xff]   ;;  %v10488_v9 = vld [vmem:[#allocation13 + $0x1a8] ss:$16 sps:$4 sm:$0xff]  }
 0x4d5   : > { %8002 = vmatprep.subr.bf16.mxu1 %v10403_v42  ;;  %8044 = vmatpush1.bf16.msra.mxu0 %v10467_v48  ;;  %v10430_v42 = vld [vmem:[#allocation13 + $0x544] ss:$16 sps:$4 sm:$0xff]   ;;  %v10521_v48 = vld [vmem:[#allocation13 + $0x760] ss:$16 sps:$4 sm:$0xff]   ;;  %v6064_v29 = vadd.f32 %v11549_v36, %v6021_v50  ;;  %v10500_v50 = vld [vmem:[#allocation13 + $0x168] ss:$16 sps:$4 sm:$0xff]  }
 0x4d6   : > { %8026 = vmatprep.mubr.bf16.mxu1 %v11561_v25  ;;  %8045 = vmatprep.subr.bf16.mxu0 %v10475_v14  ;;  %v6060_v14 = vadd.f32 %v11542_v54, %v6017_v41  ;;  %v10535_v58 = vld [vmem:[#allocation13 + $0x724] ss:$16 sps:$4 sm:$0xff]   ;;  %v10506_v41 = vld [vmem:[#allocation13 + $0x148] ss:$16 sps:$4 sm:$0xff]  }
 0x4d7   : > { %v10436_v36 = vld [vmem:[#allocation13 + $0x504] ss:$16 sps:$4 sm:$0xff]  }
 0x4d8   : > { %8003 = vmatpush1.bf16.msra.mxu1 %v10401_v15  ;;  %v6107_v15 = vadd.f32 %v11557_v32, %v6064_v29  ;;  %v10541_v54 = vld [vmem:[#allocation13 + $0x704] ss:$16 sps:$4 sm:$0xff]   ;;  %v10512_v29 = vld [vmem:[#allocation13 + $0x128] ss:$16 sps:$4 sm:$0xff]  }
 0x4d9   : > { %8004 = vmatprep.subr.bf16.mxu1 %v10406_v60  ;;  %8046 = vmatpush1.bf16.msra.mxu0 %v10473_v61  ;;  %v10527_v60 = vld [vmem:[#allocation13 + $0x740] ss:$16 sps:$4 sm:$0xff]   ;;  %v6103_v61 = vadd.f32 %v11551_v46, %v6060_v14  ;;  %v10547_v46 = vld [vmem:[#allocation13 + $0x2ec] ss:$16 sps:$4 sm:$0xff]  }
 0x4da   : > { %8047 = vmatprep.subr.bf16.mxu0 %v10481_v27  ;;  %v10431_v27 = vld [vmem:[#allocation13 + $0x520] ss:$16 sps:$4 sm:$0xff]   ;;  %v10520_v14 = vld [vmem:[#allocation13 + $0x10c] ss:$16 sps:$4 sm:$0xff]  }
 0x4db   : > { %v6146_v32 = vadd.f32 %v11554_v49, %v6103_v61  ;;  %v10440_v49 = vld [vmem:[#allocation13 + $0xc8] ss:$16 sps:$4 sm:$0xff]  }
 0x4dc   : > { %8005 = vmatpush1.bf16.msra.mxu1 %v10404_v62  ;;  %v6150_v62 = vadd.f32 %v11559_v33, %v6107_v15  ;;  %v10437_v33 = vld [vmem:[#allocation13 + $0xe8] ss:$16 sps:$4 sm:$0xff]  }
 0x4dd   : > { %8006 = vmatprep.subr.bf16.mxu1 %v10409_v4  ;;  %8048 = vmatpush1.bf16.msra.mxu0 %v10479_v13  ;;  %v10533_v4 = vld [vmem:[#allocation13 + $0x720] ss:$16 sps:$4 sm:$0xff]  }
 0x4de   : > { %8049 = vmatprep.subr.bf16.mxu0 %v10487_v16  ;;  %v10434_v13 = vld [vmem:[#allocation13 + $0x500] ss:$16 sps:$4 sm:$0xff]   ;;  %v6338_v16 = vmax.f32 %v6150_v62, 0.0 }
 0x4e0   : > { %8007 = vmatpush1.bf16.msra.mxu1 %v10407_v40  ;;  %v10439_v40 = vld [vmem:[#allocation13 + $0xec] ss:$16 sps:$4 sm:$0xff]  }
 0x4e1   : > { %8008 = vmatprep.subr.bf16.mxu1 %v10412_v26  ;;  %8050 = vmatpush1.bf16.msra.mxu0 %v10485_v59  ;;  %v10539_v26 = vld [vmem:[#allocation13 + $0x700] ss:$16 sps:$4 sm:$0xff]   ;;  %v6330_v59 = vmax.f32 %v6146_v32, 0.0 }
 0x4e2   : > { %8051 = vmatprep.subr.bf16.mxu0 %v10493_v2 }
 0x4e3   : > { %v11575_v2 = vpack.c.bf16 %v6338_v16, %v6330_v59 }
 0x4e4   : > { %8009 = vmatpush1.bf16.msra.mxu1 %v10410_v45  ;;  %v10442_v45 = vld [vmem:[#allocation13 + $0xcc] ss:$16 sps:$4 sm:$0xff]  }
 0x4e5   : > { %8010 = vmatprep.subr.bf16.mxu1 %v10415_v21  ;;  %8052 = vmatpush1.bf16.msra.mxu0 %v10491_v0  ;;  %v10445_v21 = vld [vmem:[#allocation13 + $0xac] ss:$16 sps:$4 sm:$0xff]   ;;  %v10443_v0 = vld [vmem:[#allocation13 + $0xa8] ss:$16 sps:$4 sm:$0xff]  }
 0x4e6   : > { %8053 = vmatprep.subr.bf16.mxu0 %v10499_v35  ;;  %v10448_v35 = vld [vmem:[#allocation13 + $0x8c] ss:$16 sps:$4 sm:$0xff]  }
 0x4e8   : > { %8011 = vmatpush2.bf16.msra.mxu1 %v10413_v5  ;;  %v10446_v5 = vld [vmem:[#allocation13 + $0x88] ss:$16 sps:$4 sm:$0xff]  }
 0x4e9   : > { %8012 = vmatprep.subr.bf16.mxu1 %v10418_v47  ;;  %8054 = vmatpush2.bf16.msra.mxu0 %v10497_v39  ;;  %v10454_v47 = vld [vmem:[#allocation13 + $0x6c] ss:$16 sps:$4 sm:$0xff]   ;;  %v10452_v39 = vld [vmem:[#allocation13 + $0x68] ss:$16 sps:$4 sm:$0xff]  }
 0x4ea   : > { %8055 = vmatprep.subr.bf16.mxu0 %v10505_v51  ;;  %v10460_v51 = vld [vmem:[#allocation13 + $0x4c] ss:$16 sps:$4 sm:$0xff]  }
 0x4ec   : > { %8013 = vmatpush2.bf16.msra.mxu1 %v10416_v6  ;;  %v10458_v6 = vld [vmem:[#allocation13 + $0x48] ss:$16 sps:$4 sm:$0xff]  }
 0x4ed   : > { %8014 = vmatprep.subr.bf16.mxu1 %v10421_v56  ;;  %8056 = vmatpush2.bf16.msra.mxu0 %v10503_v3  ;;  %v10466_v56 = vld [vmem:[#allocation13 + $0x2c] ss:$16 sps:$4 sm:$0xff]  }
 0x4ee   : > { %8057 = vmatprep.subr.bf16.mxu0 %v10511_v44  ;;  %v10472_v3 = vld [vmem:[#allocation13 + $0xc] ss:$16 sps:$4 sm:$0xff]   ;;  %v10470_v44 = vld [vmem:[#allocation13 + $0x8] ss:$16 sps:$4 sm:$0xff]  }
 0x4f0   : > { %8015 = vmatpush2.bf16.msra.mxu1 %v10419_v52  ;;  %v10478_v52 = vld [vmem:[#allocation13 + $0x1ec] ss:$16 sps:$4 sm:$0xff]  }
 0x4f1   : > { %8016 = vmatprep.subr.bf16.mxu1 %v10424_v17  ;;  %8058 = vmatpush2.bf16.msra.mxu0 %v10509_v28  ;;  %v10476_v17 = vld [vmem:[#allocation13 + $0x1e8] ss:$16 sps:$4 sm:$0xff]   ;;  %v10484_v28 = vld [vmem:[#allocation13 + $0x1cc] ss:$16 sps:$4 sm:$0xff]  }
 0x4f2   : > { %8059 = vmatprep.subr.bf16.mxu0 %v10517_v34  ;;  %v10482_v34 = vld [vmem:[#allocation13 + $0x1c8] ss:$16 sps:$4 sm:$0xff]  }
 0x4f4   : > { %8017 = vmatpush2.bf16.msra.mxu1 %v10422_v8  ;;  %v10490_v8 = vld [vmem:[#allocation13 + $0x1ac] ss:$16 sps:$4 sm:$0xff]  }
 0x4f5   : > { %8018 = vmatprep.subr.bf16.mxu1 %v10427_v37  ;;  %8060 = vmatpush2.bf16.msra.mxu0 %v10515_v7  ;;  %v10496_v37 = vld [vmem:[#allocation13 + $0x18c] ss:$16 sps:$4 sm:$0xff]   ;;  %v10494_v7 = vld [vmem:[#allocation13 + $0x188] ss:$16 sps:$4 sm:$0xff]  }
 0x4f6   : > { %8061 = vmatprep.subr.bf16.mxu0 %v10523_v10  ;;  %v10502_v10 = vld [vmem:[#allocation13 + $0x16c] ss:$16 sps:$4 sm:$0xff]  }
 0x4f8   : > { %8019 = vmatpush2.bf16.msra.mxu1 %v10425_v38  ;;  %v10508_v38 = vld [vmem:[#allocation13 + $0x14c] ss:$16 sps:$4 sm:$0xff]  }
 0x4f9   : > { %8020 = vmatprep.subr.bf16.mxu1 %v10430_v42  ;;  %8062 = vmatpush2.bf16.msra.mxu0 %v10521_v48  ;;  %v10514_v48 = vld [vmem:[#allocation13 + $0x12c] ss:$16 sps:$4 sm:$0xff]  }
 0x4fa   : > { %8063 = vmatprep.subr.bf16.mxu0 %v10529_v53 }
 0x4fc   : > { %8021 = vmatpush2.bf16.msra.mxu1 %v10428_v55 }
 0x4fd   : > { %8022 = vmatprep.subr.bf16.mxu1 %v10433_v63  ;;  %8064 = vmatpush2.bf16.msra.mxu0 %v10527_v60  ;;  %v3069_v63 = vrot.slane %v11512_v57, %v1998_v11  ;;  %v10518_v60 = vld [vmem:[#allocation13 + $0x108] ss:$16 sps:$4 sm:$0xff]  }
 0x4fe   : > { %8065 = vmatprep.subr.bf16.mxu0 %v10535_v58  ;;  %v3065_v58 = vrot.slane %v11512_v57, %v1994_v30  ;;  %v10530_v30 = vld [vmem:[#allocation13 + $0x4c8] ss:$16 sps:$4 sm:$0xff]  }
 0x500   : > { %8023 = vmatpush2.bf16.msra.mxu1 %v10431_v27  ;;  %v10526_v27 = vld [vmem:[#allocation13 + $0x4ec] ss:$16 sps:$4 sm:$0xff]  }
 0x501   : > { %8024 = vmatprep.subr.bf16.mxu1 %v10436_v36  ;;  %8066 = vmatpush2.bf16.msra.mxu0 %v10533_v4  ;;  %v10524_v4 = vld [vmem:[#allocation13 + $0x4e8] ss:$16 sps:$4 sm:$0xff]  }
 0x502   : > { %8067 = vmatprep.subr.bf16.mxu0 %v10541_v54 }
 0x504   : > { %8025 = vmatpush2.bf16.msra.mxu1 %v10434_v13  ;;  %v10532_v13 = vld [vmem:[#allocation13 + $0x4cc] ss:$16 sps:$4 sm:$0xff]  }
 0x505   : > { %8080 = vmatprep.subr.bf16.mxu1 %v10439_v40  ;;  %8068 = vmatpush2.bf16.msra.mxu0 %v10539_v26 }
 0x506   : > { %8123 = vmatprep.subr.bf16.mxu0 %v10547_v46 }
 0x507   : > { %8027 = vmatmul.mubr.bf16.vlgmr.msra.gmra.mxu1 %v11575_v2  ;;  %v6188_v42 = vpop.f32.mrf.mxu1 }
 0x508   : > { %8081 = vmatpush1.bf16.msra.mxu1 %v10437_v33  ;;  %8112 = vmatprep.mubr.bf16.mxu1 %v11532_v31  ;;  %v10464_v31 = vld [vmem:[#allocation13 + $0x28] ss:$16 sps:$4 sm:$0xff]   ;;  %v6231_v53 = vpop.f32.mrf.mxu0  ;;  %v6189_v54 = vadd.f32 %v6188_v42, %v3065_v58  ;;  %v10538_v33 = vld [vmem:[#allocation13 + $0x4ac] ss:$16 sps:$4 sm:$0xff]  }
 0x509   : > { %8082 = vmatprep.subr.bf16.mxu1 %v10442_v45  ;;  %v6190_v55 = vpop.f32.mrf.mxu1  ;;  %v10556_v42 = vld [vmem:[#allocation13 + $0x44c] ss:$16 sps:$4 sm:$0xff]  }
 0x50a   : > { %v6233_v15 = vpop.f32.mrf.mxu0  ;;  %v6191_v36 = vadd.f32 %v6190_v55, %v3069_v63  ;;  %v6232_v57 = vadd.f32 %v6231_v53, %v6189_v54  ;;  %v10554_v53 = vld [vmem:[#allocation13 + $0x448] ss:$16 sps:$4 sm:$0xff]   ;;  %v10562_v55 = vld [vmem:[#allocation13 + $0x42c] ss:$16 sps:$4 sm:$0xff]  }
 0x50b   : > { %v6192_v61 = vpop.f32.mrf.mxu1  ;;  %v10580_v54 = vld [vmem:[#allocation13 + $0x5cc] ss:$16 sps:$4 sm:$0xff]  }
 0x50c   : > { %8083 = vmatpush1.bf16.msra.mxu1 %v10440_v49  ;;  %v6235_v62 = vpop.f32.mrf.mxu0  ;;  %v6193_v16 = vadd.f32 %v6192_v61, %v3065_v58  ;;  %v6234_v26 = vadd.f32 %v6233_v15, %v6191_v36  ;;  %v10560_v15 = vld [vmem:[#allocation13 + $0x428] ss:$16 sps:$4 sm:$0xff]   ;;  %v10571_v61 = vld [vmem:[#allocation13 + $0x26c] ss:$16 sps:$4 sm:$0xff]  }
 0x50d   : > { %8084 = vmatprep.subr.bf16.mxu1 %v10445_v21  ;;  %v6194_v32 = vpop.f32.mrf.mxu1  ;;  %v10563_v58 = vld [vmem:[#allocation13 + $0x288] ss:$16 sps:$4 sm:$0xff]  }
 0x50e   : > { %v6237_v40 = vpop.f32.mrf.mxu0  ;;  %v6195_v19 = vadd.f32 %v6194_v32, %v3069_v63  ;;  %v6236_v45 = vadd.f32 %v6235_v62, %v6193_v16  ;;  %v10565_v63 = vld [vmem:[#allocation13 + $0x28c] ss:$16 sps:$4 sm:$0xff]   ;;  %v10569_v62 = vld [vmem:[#allocation13 + $0x268] ss:$16 sps:$4 sm:$0xff]  }
 0x50f   : > { %v10572_v36 = vld [vmem:[#allocation13 + $0x5e8] ss:$16 sps:$4 sm:$0xff]   ;;  %v10583_v16 = vld [vmem:[#allocation13 + $0x22c] ss:$16 sps:$4 sm:$0xff]  }
 0x510   : > { %8085 = vmatpush1.bf16.msra.mxu1 %v10443_v0  ;;  %v10575_v32 = vld [vmem:[#allocation13 + $0x248] ss:$16 sps:$4 sm:$0xff]  }
 0x511   : > { %8086 = vmatprep.subr.bf16.mxu1 %v10448_v35 }
 0x514   : > { %8087 = vmatpush1.bf16.msra.mxu1 %v10446_v5  ;;  %v6238_v5 = vadd.f32 %v6237_v40, %v6195_v19  ;;  %v10586_v40 = vld [vmem:[#allocation13 + $0x5ac] ss:$16 sps:$4 sm:$0xff]  }
 0x515   : > { %8088 = vmatprep.subr.bf16.mxu1 %v10454_v47  ;;  %v10589_v19 = vld [vmem:[#allocation13 + $0x20c] ss:$16 sps:$4 sm:$0xff]  }
 0x518   : > { %8089 = vmatpush1.bf16.msra.mxu1 %v10452_v39 }
 0x519   : > { %8090 = vmatprep.subr.bf16.mxu1 %v10460_v51 }
 0x51c   : > { %8091 = vmatpush1.bf16.msra.mxu1 %v10458_v6  ;;  %v10544_v6 = vld [vmem:[#allocation13 + $0x48c] ss:$16 sps:$4 sm:$0xff]  }
 0x51d   : > { %8092 = vmatprep.subr.bf16.mxu1 %v10466_v56 }
 0x520   : > { %8093 = vmatpush1.bf16.msra.mxu1 %v10464_v31 }
 0x521   : > { %8094 = vmatprep.subr.bf16.mxu1 %v10472_v3 }
 0x524   : > { %8095 = vmatpush1.bf16.msra.mxu1 %v10470_v44 }
 0x525   : > { %8096 = vmatprep.subr.bf16.mxu1 %v10478_v52 }
 0x528   : > { %8097 = vmatpush2.bf16.msra.mxu1 %v10476_v17  ;;  %v10542_v17 = vld [vmem:[#allocation13 + $0x488] ss:$16 sps:$4 sm:$0xff]  }
 0x529   : > { %8098 = vmatprep.subr.bf16.mxu1 %v10484_v28 }
 0x52c   : > { %8099 = vmatpush2.bf16.msra.mxu1 %v10482_v34  ;;  %v10550_v34 = vld [vmem:[#allocation13 + $0x46c] ss:$16 sps:$4 sm:$0xff]  }
 0x52d   : > { %8100 = vmatprep.subr.bf16.mxu1 %v10490_v8 }
 0x530   : > { %8101 = vmatpush2.bf16.msra.mxu1 %v10488_v9 }
 0x531   : > { %8102 = vmatprep.subr.bf16.mxu1 %v10496_v37 }
 0x534   : > { %8103 = vmatpush2.bf16.msra.mxu1 %v10494_v7 }
 0x535   : > { %8104 = vmatprep.subr.bf16.mxu1 %v10502_v10  ;;  %v10545_v10 = vld [vmem:[#allocation13 + $0x2e8] ss:$16 sps:$4 sm:$0xff]  }
 0x538   : > { %8105 = vmatpush2.bf16.msra.mxu1 %v10500_v50 }
 0x539   : > { %8106 = vmatprep.subr.bf16.mxu1 %v10508_v38  ;;  %v10548_v38 = vld [vmem:[#allocation13 + $0x468] ss:$16 sps:$4 sm:$0xff]  }
 0x53c   : > { %8107 = vmatpush2.bf16.msra.mxu1 %v10506_v41  ;;  %v10553_v41 = vld [vmem:[#allocation13 + $0x2cc] ss:$16 sps:$4 sm:$0xff]  }
 0x53d   : > { %8108 = vmatprep.subr.bf16.mxu1 %v10514_v48  ;;  %v10551_v48 = vld [vmem:[#allocation13 + $0x2c8] ss:$16 sps:$4 sm:$0xff]  }
 0x540   : > { %8109 = vmatpush2.bf16.msra.mxu1 %v10512_v29  ;;  %v10559_v29 = vld [vmem:[#allocation13 + $0x2ac] ss:$16 sps:$4 sm:$0xff]  }
 0x541   : > { %8110 = vmatprep.subr.bf16.mxu1 %v10520_v14  ;;  %v10557_v14 = vld [vmem:[#allocation13 + $0x2a8] ss:$16 sps:$4 sm:$0xff]  }
 0x544   : > { %8111 = vmatpush2.bf16.msra.mxu1 %v10518_v60  ;;  %v10568_v60 = vld [vmem:[#allocation13 + $0x40c] ss:$16 sps:$4 sm:$0xff]  }
 0x545   : > { %8166 = vmatprep.subr.bf16.mxu1 %v10526_v27  ;;  %v10574_v27 = vld [vmem:[#allocation13 + $0x5ec] ss:$16 sps:$4 sm:$0xff]  }
 0x547   : > { %v6274_v11 = vpop.f32.mrf.mxu1  ;;  %8113 = vmatmul.mubr.bf16.vlgmr.msra.gmra.mxu1 %v11476_v1  ;;  %v10536_v1 = vld [vmem:[#allocation13 + $0x4a8] ss:$16 sps:$4 sm:$0xff]  }
 0x548   : > { %v6317_v46 = vpop.f32.mrf.mxu0  ;;  %8167 = vmatpush1.bf16.msra.mxu1 %v10524_v4  ;;  %8198 = vmatprep.mubr.bf16.mxu1 %v11561_v25  ;;  %v6275_v0 = vadd.f32 %v6274_v11, %v6232_v57  ;;  %v10577_v4 = vld [vmem:[#allocation13 + $0x24c] ss:$16 sps:$4 sm:$0xff]   ;;  %v10581_v11 = vld [vmem:[#allocation13 + $0x228] ss:$16 sps:$4 sm:$0xff]  }
 0x549   : > { %v6276_v59 = vpop.f32.mrf.mxu1  ;;  %8168 = vmatprep.subr.bf16.mxu1 %v10532_v13  ;;  %v10578_v13 = vld [vmem:[#allocation13 + $0x5c8] ss:$16 sps:$4 sm:$0xff]  }
 0x54a   : > { %v6277_v49 = vadd.f32 %v6276_v59, %v6234_v26  ;;  %v6319_v21 = vpop.f32.mrf.mxu0  ;;  %v6318_v3 = vadd.f32 %v6317_v46, %v6275_v0  ;;  %v10584_v26 = vld [vmem:[#allocation13 + $0x5a8] ss:$16 sps:$4 sm:$0xff]   ;;  %v10592_v46 = vld [vmem:[#allocation13 + $0x58c] ss:$16 sps:$4 sm:$0xff]  }
 0x54b   : > { %v6278_v35 = vpop.f32.mrf.mxu1  ;;  %v10590_v57 = vld [vmem:[#allocation13 + $0x588] ss:$16 sps:$4 sm:$0xff]   ;;  %v10595_v59 = vld [vmem:[#allocation13 + $0x3ec] ss:$16 sps:$4 sm:$0xff]  }
 0x54c   : > { %v6279_v47 = vadd.f32 %v6278_v35, %v6236_v45  ;;  %v6321_v39 = vpop.f32.mrf.mxu0  ;;  %8169 = vmatpush1.bf16.msra.mxu1 %v10530_v30  ;;  %v6320_v56 = vadd.f32 %v6319_v21, %v6277_v49  ;;  %v6332_v37 = vmax.f32 %v6318_v3, 0.0  ;;  %v10587_v30 = vld [vmem:[#allocation13 + $0x208] ss:$16 sps:$4 sm:$0xff]   ;;  %v10601_v21 = vld [vmem:[#allocation13 + $0x3cc] ss:$16 sps:$4 sm:$0xff]  }
 0x54d   : > { %v6280_v51 = vpop.f32.mrf.mxu1  ;;  %8170 = vmatprep.subr.bf16.mxu1 %v10538_v33  ;;  %v10598_v33 = vld [vmem:[#allocation13 + $0x56c] ss:$16 sps:$4 sm:$0xff]   ;;  %v10593_v45 = vld [vmem:[#allocation13 + $0x3e8] ss:$16 sps:$4 sm:$0xff]  }
 0x54e   : > { %v6322_v25 = vadd.f32 %v6321_v39, %v6279_v47  ;;  %v6281_v31 = vadd.f32 %v6280_v51, %v6238_v5  ;;  %v6323_v44 = vpop.f32.mrf.mxu0  ;;  %v6333_v8 = vmax.f32 %v6320_v56, 0.0  ;;  %v10596_v49 = vld [vmem:[#allocation13 + $0x568] ss:$16 sps:$4 sm:$0xff]   ;;  %v10604_v0 = vld [vmem:[#allocation13 + $0x54c] ss:$16 sps:$4 sm:$0xff]  }
 0x54f   : > { %v10599_v35 = vld [vmem:[#allocation13 + $0x3c8] ss:$16 sps:$4 sm:$0xff]   ;;  %v10607_v47 = vld [vmem:[#allocation13 + $0x3ac] ss:$16 sps:$4 sm:$0xff]  }
 0x550   : > { %v6324_v52 = vadd.f32 %v6323_v44, %v6281_v31  ;;  %8171 = vmatpush1.bf16.msra.mxu1 %v10536_v1  ;;  %v6340_v28 = vmax.f32 %v6322_v25, 0.0  ;;  %v10602_v5 = vld [vmem:[#allocation13 + $0x548] ss:$16 sps:$4 sm:$0xff]   ;;  %v10610_v39 = vld [vmem:[#allocation13 + $0x52c] ss:$16 sps:$4 sm:$0xff]  }
 0x551   : > { %8172 = vmatprep.subr.bf16.mxu1 %v10544_v6  ;;  %v10605_v1 = vld [vmem:[#allocation13 + $0x3a8] ss:$16 sps:$4 sm:$0xff]   ;;  %v10613_v6 = vld [vmem:[#allocation13 + $0x38c] ss:$16 sps:$4 sm:$0xff]  }
 0x552   : > { %v6341_v9 = vmax.f32 %v6324_v52, 0.0  ;;  %v11589_v50 = vpack.c.bf16 %v6340_v28, %v6332_v37  ;;  %v10608_v51 = vld [vmem:[#allocation13 + $0x528] ss:$16 sps:$4 sm:$0xff]   ;;  %v10616_v56 = vld [vmem:[#allocation13 + $0x50c] ss:$16 sps:$4 sm:$0xff]  }
 0x553   : > { %v10611_v25 = vld [vmem:[#allocation13 + $0x388] ss:$16 sps:$4 sm:$0xff]   ;;  %v10619_v3 = vld [vmem:[#allocation13 + $0x36c] ss:$16 sps:$4 sm:$0xff]  }
 0x554   : > { %v11587_v7 = vpack.c.bf16 %v6341_v9, %v6333_v8  ;;  %8173 = vmatpush1.bf16.msra.mxu1 %v10542_v17  ;;  %v10614_v31 = vld [vmem:[#allocation13 + $0x508] ss:$16 sps:$4 sm:$0xff]   ;;  %v10677_v44 = vld [vmem:[#allocation16 + $0x78] sm:$0xff]  }
 0x555   : > { %8174 = vmatprep.subr.bf16.mxu1 %v10550_v34  ;;  %v10617_v52 = vld [vmem:[#allocation13 + $0x368] ss:$16 sps:$4 sm:$0xff]   ;;  %v10622_v17 = vld [vmem:[#allocation13 + $0x34c] ss:$16 sps:$4 sm:$0xff]  }
 0x556   : > { %8069 = vmatprep.mubr.bf16.mxu0 %v11587_v7  ;;  %v10678_v28 = vld [vmem:[#allocation16 + $0x38] sm:$0xff]   ;;  %v10620_v34 = vld [vmem:[#allocation13 + $0x348] ss:$16 sps:$4 sm:$0xff]  }
 0x557   : > { %8070 = vmatmul.mubr.bf16.vlgmr.msra.gmra.mxu0 %v11589_v50  ;;  %v10625_v8 = vld [vmem:[#allocation13 + $0x32c] ss:$16 sps:$4 sm:$0xff]   ;;  %v10679_v9 = vld [vmem:[#allocation16 + $0x70] sm:$0xff]  }
 0x558   : > { %8124 = vmatpush1.bf16.msra.mxu0 %v10545_v10  ;;  %8155 = vmatprep.mubr.bf16.mxu0 %v11535_v43  ;;  %v10566_v43 = vld [vmem:[#allocation13 + $0x408] ss:$16 sps:$4 sm:$0xff]  }
 0x559   : > { %8175 = vmatpush1.bf16.msra.mxu1 %v10548_v38  ;;  %8125 = vmatprep.subr.bf16.mxu0 %v10553_v41  ;;  %v10680_v37 = vld [vmem:[#allocation16 + $0x30] sm:$0xff]   ;;  %v10628_v38 = vld [vmem:[#allocation13 + $0x30c] ss:$16 sps:$4 sm:$0xff]  }
 0x55a   : > { %8176 = vmatprep.subr.bf16.mxu1 %v10556_v42  ;;  %v10623_v10 = vld [vmem:[#allocation13 + $0x328] ss:$16 sps:$4 sm:$0xff]   ;;  %v10681_v41 = vld [vmem:[#allocation16 + $0x68] sm:$0xff]  }
 0x55b   : > { %v10682_v42 = vld [vmem:[#allocation16 + $0x28] sm:$0xff]  }
 0x55c   : > { %8126 = vmatpush1.bf16.msra.mxu0 %v10551_v48  ;;  %v10683_v48 = vld [vmem:[#allocation16 + $0x60] sm:$0xff]  }
 0x55d   : > { %8177 = vmatpush1.bf16.msra.mxu1 %v10554_v53  ;;  %8127 = vmatprep.subr.bf16.mxu0 %v10559_v29  ;;  %v10626_v53 = vld [vmem:[#allocation13 + $0x308] ss:$16 sps:$4 sm:$0xff]  }
 0x55e   : > { %8178 = vmatprep.subr.bf16.mxu1 %v10562_v55  ;;  %v10684_v29 = vld [vmem:[#allocation16 + $0x20] sm:$0xff]   ;;  %v10685_v55 = vld [vmem:[#allocation16 + $0x58] sm:$0xff]  }
 0x560   : > { %8128 = vmatpush1.bf16.msra.mxu0 %v10557_v14  ;;  %v10629_v14 = vld [vmem:[#allocation13 + $0x6e8] ss:$16 sps:$4 sm:$0xff]  }
 0x561   : > { %8179 = vmatpush1.bf16.msra.mxu1 %v10560_v15  ;;  %8129 = vmatprep.subr.bf16.mxu0 %v10565_v63  ;;  %v10634_v15 = vld [vmem:[#allocation13 + $0x6cc] ss:$16 sps:$4 sm:$0xff]  }
 0x562   : > { %8180 = vmatprep.subr.bf16.mxu1 %v10568_v60  ;;  %v10686_v63 = vld [vmem:[#allocation16 + $0x18] sm:$0xff]   ;;  %v10632_v60 = vld [vmem:[#allocation13 + $0x6c8] ss:$16 sps:$4 sm:$0xff]  }
 0x564   : > { %8130 = vmatpush1.bf16.msra.mxu0 %v10563_v58  ;;  %v10637_v58 = vld [vmem:[#allocation13 + $0x6ac] ss:$16 sps:$4 sm:$0xff]  }
 0x565   : > { %8181 = vmatpush1.bf16.msra.mxu1 %v10566_v43  ;;  %8131 = vmatprep.subr.bf16.mxu0 %v10571_v61  ;;  %v10687_v43 = vld [vmem:[#allocation16 + $0x50] sm:$0xff]  }
 0x566   : > { %8182 = vmatprep.subr.bf16.mxu1 %v10574_v27  ;;  %v10688_v61 = vld [vmem:[#allocation16 + $0x10] sm:$0xff]  }
 0x567   : > { %v10635_v27 = vld [vmem:[#allocation13 + $0x6a8] ss:$16 sps:$4 sm:$0xff]  }
 0x568   : > { %8132 = vmatpush1.bf16.msra.mxu0 %v10569_v62  ;;  %v10640_v62 = vld [vmem:[#allocation13 + $0x68c] ss:$16 sps:$4 sm:$0xff]  }
 0x569   : > { %8183 = vmatpush2.bf16.msra.mxu1 %v10572_v36  ;;  %8133 = vmatprep.subr.bf16.mxu0 %v10577_v4  ;;  %v10689_v36 = vld [vmem:[#allocation16 + $0x48] sm:$0xff]  }
 0x56a   : > { %8184 = vmatprep.subr.bf16.mxu1 %v10580_v54  ;;  %v10690_v4 = vld [vmem:[#allocation16 + $0x8] sm:$0xff]  }
 0x56b   : > { %v10643_v54 = vld [vmem:[#allocation13 + $0x66c] ss:$16 sps:$4 sm:$0xff]  }
 0x56c   : > { %8134 = vmatpush1.bf16.msra.mxu0 %v10575_v32  ;;  %v10692_v32 = vld [vmem:[#allocation16] sm:$0xff]  }
 0x56d   : > { %8185 = vmatpush2.bf16.msra.mxu1 %v10578_v13  ;;  %8135 = vmatprep.subr.bf16.mxu0 %v10583_v16  ;;  %v10641_v13 = vld [vmem:[#allocation13 + $0x668] ss:$16 sps:$4 sm:$0xff]   ;;  %v10646_v16 = vld [vmem:[#allocation13 + $0x64c] ss:$16 sps:$4 sm:$0xff]  }
 0x56e   : > { %8186 = vmatprep.subr.bf16.mxu1 %v10586_v40  ;;  %v10644_v40 = vld [vmem:[#allocation13 + $0x648] ss:$16 sps:$4 sm:$0xff]  }
 0x570   : > { %8136 = vmatpush1.bf16.msra.mxu0 %v10581_v11  ;;  %v10649_v11 = vld [vmem:[#allocation13 + $0x62c] ss:$16 sps:$4 sm:$0xff]  }
 0x571   : > { %8187 = vmatpush2.bf16.msra.mxu1 %v10584_v26  ;;  %8137 = vmatprep.subr.bf16.mxu0 %v10589_v19  ;;  %v10647_v26 = vld [vmem:[#allocation13 + $0x628] ss:$16 sps:$4 sm:$0xff]   ;;  %v10652_v19 = vld [vmem:[#allocation13 + $0x60c] ss:$16 sps:$4 sm:$0xff]  }
 0x572   : > { %8188 = vmatprep.subr.bf16.mxu1 %v10592_v46  ;;  %v10650_v46 = vld [vmem:[#allocation13 + $0x608] ss:$16 sps:$4 sm:$0xff]  }
 0x574   : > { %8138 = vmatpush1.bf16.msra.mxu0 %v10587_v30  ;;  %v10655_v30 = vld [vmem:[#allocation13 + $0x7ec] ss:$16 sps:$4 sm:$0xff]  }
 0x575   : > { %8189 = vmatpush2.bf16.msra.mxu1 %v10590_v57  ;;  %8139 = vmatprep.subr.bf16.mxu0 %v10595_v59  ;;  %v10653_v57 = vld [vmem:[#allocation13 + $0x7e8] ss:$16 sps:$4 sm:$0xff]   ;;  %v10658_v59 = vld [vmem:[#allocation13 + $0x7cc] ss:$16 sps:$4 sm:$0xff]  }
 0x576   : > { %8190 = vmatprep.subr.bf16.mxu1 %v10598_v33  ;;  %v10656_v33 = vld [vmem:[#allocation13 + $0x7c8] ss:$16 sps:$4 sm:$0xff]  }
 0x578   : > { %8140 = vmatpush2.bf16.msra.mxu0 %v10593_v45  ;;  %v10661_v45 = vld [vmem:[#allocation13 + $0x7ac] ss:$16 sps:$4 sm:$0xff]  }
 0x579   : > { %8191 = vmatpush2.bf16.msra.mxu1 %v10596_v49  ;;  %8141 = vmatprep.subr.bf16.mxu0 %v10601_v21  ;;  %v10659_v49 = vld [vmem:[#allocation13 + $0x7a8] ss:$16 sps:$4 sm:$0xff]   ;;  %v10664_v21 = vld [vmem:[#allocation13 + $0x78c] ss:$16 sps:$4 sm:$0xff]  }
 0x57a   : > { %8192 = vmatprep.subr.bf16.mxu1 %v10604_v0  ;;  %v10662_v0 = vld [vmem:[#allocation13 + $0x788] ss:$16 sps:$4 sm:$0xff]  }
 0x57c   : > { %8142 = vmatpush2.bf16.msra.mxu0 %v10599_v35  ;;  %v10667_v35 = vld [vmem:[#allocation13 + $0x76c] ss:$16 sps:$4 sm:$0xff]  }
 0x57d   : > { %8193 = vmatpush2.bf16.msra.mxu1 %v10602_v5  ;;  %8143 = vmatprep.subr.bf16.mxu0 %v10607_v47  ;;  %v10665_v5 = vld [vmem:[#allocation13 + $0x768] ss:$16 sps:$4 sm:$0xff]   ;;  %v10670_v47 = vld [vmem:[#allocation13 + $0x74c] ss:$16 sps:$4 sm:$0xff]  }
 0x57e   : > { %8194 = vmatprep.subr.bf16.mxu1 %v10610_v39  ;;  %v10668_v39 = vld [vmem:[#allocation13 + $0x748] ss:$16 sps:$4 sm:$0xff]  }
 0x580   : > { %8144 = vmatpush2.bf16.msra.mxu0 %v10605_v1  ;;  %v10673_v1 = vld [vmem:[#allocation13 + $0x72c] ss:$16 sps:$4 sm:$0xff]  }
 0x581   : > { %8195 = vmatpush2.bf16.msra.mxu1 %v10608_v51  ;;  %8145 = vmatprep.subr.bf16.mxu0 %v10613_v6  ;;  %v10671_v51 = vld [vmem:[#allocation13 + $0x728] ss:$16 sps:$4 sm:$0xff]   ;;  %v10676_v6 = vld [vmem:[#allocation13 + $0x70c] ss:$16 sps:$4 sm:$0xff]  }
 0x582   : > { %8196 = vmatprep.subr.bf16.mxu1 %v10616_v56  ;;  %v10674_v56 = vld [vmem:[#allocation13 + $0x708] ss:$16 sps:$4 sm:$0xff]  }
 0x584   : > { %8146 = vmatpush2.bf16.msra.mxu0 %v10611_v25  ;;  %v10693_v25 = vld [vmem:[#allocation16 + $0xf8] sm:$0xff]  }
 0x585   : > { %8197 = vmatpush2.bf16.msra.mxu1 %v10614_v31  ;;  %8147 = vmatprep.subr.bf16.mxu0 %v10619_v3  ;;  %v10694_v31 = vld [vmem:[#allocation16 + $0xb8] sm:$0xff]   ;;  %v10695_v3 = vld [vmem:[#allocation16 + $0xf0] sm:$0xff]  }
 0x586   : > { %10000 = vmatprep.subr.bf16.mxu1 %v10677_v44  ;;  %v10696_v44 = vld [vmem:[#allocation16 + $0xb0] sm:$0xff]  }
 0x588   : > { %8148 = vmatpush2.bf16.msra.mxu0 %v10617_v52  ;;  %8199 = vmatmul.mubr.bf16.vlgmr.msra.gmra.mxu1 %v11575_v2  ;;  %v10631_v2 = vld [vmem:[#allocation13 + $0x6ec] ss:$16 sps:$4 sm:$0xff]  }
 0x589   : > { %8149 = vmatprep.subr.bf16.mxu0 %v10622_v17  ;;  %10001 = vmatpush3.bf16.msra.mxu1 %v10678_v28  ;;  %v10697_v52 = vld [vmem:[#allocation16 + $0xe8] sm:$0xff]   ;;  %v10699_v28 = vld [vmem:[#allocation16 + $0xe0] sm:$0xff]  }
 0x58a   : > { %10002 = vmatprep.subr.bf16.mxu1 %v10679_v9  ;;  %v10698_v17 = vld [vmem:[#allocation16 + $0xa8] sm:$0xff]   ;;  %v10702_v9 = vld [vmem:[#allocation16 + $0x98] sm:$0xff]  }
 0x58c   : > { %8150 = vmatpush2.bf16.msra.mxu0 %v10620_v34  ;;  %v10700_v34 = vld [vmem:[#allocation16 + $0xa0] sm:$0xff]  }
 0x58d   : > { %8151 = vmatprep.subr.bf16.mxu0 %v10625_v8  ;;  %10003 = vmatpush3.bf16.msra.mxu1 %v10680_v37  ;;  %v10701_v8 = vld [vmem:[#allocation16 + $0xd8] sm:$0xff]  }
 0x58e   : > { %10004 = vmatprep.subr.bf16.mxu1 %v10681_v41 }
 0x590   : > { %8152 = vmatpush2.bf16.msra.mxu0 %v10623_v10 }
 0x591   : > { %8153 = vmatprep.subr.bf16.mxu0 %v10628_v38  ;;  %10005 = vmatpush3.bf16.msra.mxu1 %v10682_v42  ;;  %v7985_v38 = vpop.f32.mrf.mxu0 }
 0x592   : > { %10006 = vmatprep.subr.bf16.mxu1 %v10683_v48 }
 0x593   : > { %v7987_v42 = vpop.f32.mrf.mxu0 }
 0x594   : > { %8154 = vmatpush2.bf16.msra.mxu0 %v10626_v53  ;;  %v6606_v53 = vld [vmem:[#allocation15] sm:$0xf] }
 0x595   : > { %8209 = vmatprep.subr.bf16.mxu0 %v10631_v2  ;;  %10007 = vmatpush3.bf16.msra.mxu1 %v10684_v29  ;;  %v6615_v2 = vrot.slane %v6606_v53, %v11361_v20  ;;  %v6611_v29 = vrot.slane %v6606_v53, %v11367_v23 }
 0x596   : > { %10008 = vmatprep.subr.bf16.mxu1 %v10685_v55  ;;  %v7989_v55 = vpop.f32.mrf.mxu0 }
 0x597   : > { %8156 = vmatmul.mubr.bf16.vlgmr.msra.gmra.mxu0 %v11510_v12  ;;  %v10638_v12 = vld [vmem:[#allocation13 + $0x688] ss:$16 sps:$4 sm:$0xff]  }
 0x598   : > { %8210 = vmatpush1.bf16.msra.mxu0 %v10629_v14  ;;  %8241 = vmatprep.mubr.bf16.mxu0 %v11587_v7  ;;  %v10691_v7 = vld [vmem:[#allocation16 + $0x40] sm:$0xff]  }
 0x599   : > { %8211 = vmatprep.subr.bf16.mxu0 %v10634_v15  ;;  %10009 = vmatpush3.bf16.msra.mxu1 %v10686_v63 }
 0x59a   : > { %10010 = vmatprep.subr.bf16.mxu1 %v10687_v43 }
 0x59c   : > { %8212 = vmatpush1.bf16.msra.mxu0 %v10632_v60 }
 0x59d   : > { %8213 = vmatprep.subr.bf16.mxu0 %v10637_v58  ;;  %10011 = vmatpush3.bf16.msra.mxu1 %v10688_v61  ;;  %v7991_v58 = vpop.f32.mrf.mxu0 }
 0x59e   : > { %10012 = vmatprep.subr.bf16.mxu1 %v10689_v36 }
 0x5a0   : > { %8214 = vmatpush1.bf16.msra.mxu0 %v10635_v27 }
 0x5a1   : > { %8215 = vmatprep.subr.bf16.mxu0 %v10640_v62  ;;  %10013 = vmatpush3.bf16.msra.mxu1 %v10690_v4  ;;  %v10703_v4 = vld [vmem:[#allocation16 + $0xd0] sm:$0xff]  }
 0x5a2   : > { %10014 = vmatprep.subr.bf16.mxu1 %v10691_v7 }
 0x5a4   : > { %8216 = vmatpush1.bf16.msra.mxu0 %v10638_v12 }
 0x5a5   : > { %8217 = vmatprep.subr.bf16.mxu0 %v10643_v54  ;;  %10015 = vmatpush3.bf16.msra.mxu1 %v10692_v32  ;;  %v10704_v32 = vld [vmem:[#allocation16 + $0x90] sm:$0xff]  }
 0x5a8   : > { %8218 = vmatpush1.bf16.msra.mxu0 %v10641_v13 }
 0x5a9   : > { %8219 = vmatprep.subr.bf16.mxu0 %v10646_v16 }
 0x5ac   : > { %8220 = vmatpush1.bf16.msra.mxu0 %v10644_v40 }
 0x5ad   : > { %8221 = vmatprep.subr.bf16.mxu0 %v10649_v11 }
 0x5b0   : > { %8222 = vmatpush1.bf16.msra.mxu0 %v10647_v26 }
 0x5b1   : > { %8223 = vmatprep.subr.bf16.mxu0 %v10652_v19 }
 0x5b4   : > { %8224 = vmatpush1.bf16.msra.mxu0 %v10650_v46  ;;  %v10705_v46 = vld [vmem:[#allocation16 + $0xc8] sm:$0xff]  }
 0x5b5   : > { %8225 = vmatprep.subr.bf16.mxu0 %v10655_v30 }
 0x5b8   : > { %8226 = vmatpush2.bf16.msra.mxu0 %v10653_v57 }
 0x5b9   : > { %8227 = vmatprep.subr.bf16.mxu0 %v10658_v59  ;;  %v10706_v59 = vld [vmem:[#allocation16 + $0x88] sm:$0xff]  }
 0x5bc   : > { %8228 = vmatpush2.bf16.msra.mxu0 %v10656_v33 }
 0x5bd   : > { %8229 = vmatprep.subr.bf16.mxu0 %v10661_v45 }
 0x5c0   : > { %8230 = vmatpush2.bf16.msra.mxu0 %v10659_v49 }
 0x5c1   : > { %8231 = vmatprep.subr.bf16.mxu0 %v10664_v21 }
 0x5c4   : > { %8232 = vmatpush2.bf16.msra.mxu0 %v10662_v0  ;;  %v10707_v0 = vld [vmem:[#allocation16 + $0xc0] sm:$0xff]  }
 0x5c5   : > { %8233 = vmatprep.subr.bf16.mxu0 %v10667_v35 }
 0x5c8   : > { %8234 = vmatpush2.bf16.msra.mxu0 %v10665_v5  ;;  %v10708_v5 = vld [vmem:[#allocation16 + $0x80] sm:$0xff]  }
 0x5c9   : > { %8235 = vmatprep.subr.bf16.mxu0 %v10670_v47 }
 0x5cc   : > { %8236 = vmatpush2.bf16.msra.mxu0 %v10668_v39 }
 0x5cd   : > { %8237 = vmatprep.subr.bf16.mxu0 %v10673_v1 }
 0x5d0   : > { %8238 = vmatpush2.bf16.msra.mxu0 %v10671_v51 }
 0x5d1   : > { %8239 = vmatprep.subr.bf16.mxu0 %v10676_v6 }
 0x5d4   : > { %8240 = vmatpush2.bf16.msra.mxu0 %v10674_v56 }
 0x5d5   : > { %10022 = vmatprep.subr.bf16.mxu0 %v10693_v25 }
 0x5d7   : > { %8242 = vmatmul.mubr.bf16.vlgmr.msra.gmra.mxu0 %v11589_v50  ;;  %v7942_v50 = vpop.f32.mrf.mxu1 }
 0x5d8   : > { %10023 = vmatpush3.bf16.msra.mxu0 %v10694_v31  ;;  %v7943_v60 = vadd.f32 %v7942_v50, %v6611_v29 }
 0x5d9   : > { %10024 = vmatprep.subr.bf16.mxu0 %v10695_v3  ;;  %v7944_v37 = vpop.f32.mrf.mxu1 }
 0x5da   : > { %v7945_v15 = vadd.f32 %v7944_v37, %v6615_v2  ;;  %v7986_v12 = vadd.f32 %v7985_v38, %v7943_v60 }
 0x5db   : > { %v7946_v10 = vpop.f32.mrf.mxu1 }
 0x5dc   : > { %10025 = vmatpush3.bf16.msra.mxu0 %v10696_v44  ;;  %v7947_v63 = vadd.f32 %v7946_v10, %v6611_v29  ;;  %v7988_v62 = vadd.f32 %v7987_v42, %v7945_v15  ;;  %v6623_v44 = vrot.slane %v6606_v53, %v11364_v22 }
 0x5dd   : > { %10026 = vmatprep.subr.bf16.mxu0 %v10697_v52  ;;  %v7948_v41 = vpop.f32.mrf.mxu1  ;;  %v6619_v52 = vrot.slane %v6606_v53, %v11370_v24 }
 0x5de   : > { %v7949_v61 = vadd.f32 %v7948_v41, %v6615_v2  ;;  %v7990_v36 = vadd.f32 %v7989_v55, %v7947_v63 }
 0x5df   : > { %v8028_v48 = vpop.f32.mrf.mxu1 }
 0x5e0   : > { %10027 = vmatpush3.bf16.msra.mxu0 %v10698_v17  ;;  %v7992_v13 = vadd.f32 %v7991_v58, %v7949_v61  ;;  %v8029_v23 = vadd.f32 %v8028_v48, %v7986_v12 }
 0x5e1   : > { %10028 = vmatprep.subr.bf16.mxu0 %v10699_v28  ;;  %v8030_v14 = vpop.f32.mrf.mxu1 }
 0x5e2   : > { %v8031_v20 = vadd.f32 %v8030_v14, %v7988_v62 }
 0x5e3   : > { %v8032_v43 = vpop.f32.mrf.mxu1 }
 0x5e4   : > { %10029 = vmatpush3.bf16.msra.mxu0 %v10700_v34  ;;  %v8033_v16 = vadd.f32 %v8032_v43, %v7990_v36 }
 0x5e5   : > { %10030 = vmatprep.subr.bf16.mxu0 %v10701_v8  ;;  %v8034_v54 = vpop.f32.mrf.mxu1 }
 0x5e6   : > { %v8035_v11 = vadd.f32 %v8034_v54, %v7992_v13 }
 0x5e8   : > { %10031 = vmatpush3.bf16.msra.mxu0 %v10702_v9 }
 0x5e9   : > { %10032 = vmatprep.subr.bf16.mxu0 %v10703_v4 }
 0x5ec   : > { %10033 = vmatpush3.bf16.msra.mxu0 %v10704_v32 }
 0x5ed   : > { %10034 = vmatprep.subr.bf16.mxu0 %v10705_v46 }
 0x5f0   : > { %10035 = vmatpush3.bf16.msra.mxu0 %v10706_v59 }
 0x5f1   : > { %10036 = vmatprep.subr.bf16.mxu0 %v10707_v0 }
 0x5f4   : > { %10037 = vmatpush3.bf16.msra.mxu0 %v10708_v5 }
 0x607   : > { %v8114_v1 = vpop.f32.mrf.mxu1 }
 0x608   : > { %v8115_v9 = vadd.f32 %v8114_v1, %v6619_v52 }
 0x609   : > { %v8116_v51 = vpop.f32.mrf.mxu1 }
 0x60a   : > { %v8117_v34 = vadd.f32 %v8116_v51, %v6623_v44 }
 0x60b   : > { %v8118_v6 = vpop.f32.mrf.mxu1 }
 0x60c   : > { %v8119_v8 = vadd.f32 %v8118_v6, %v6619_v52  ;;  %v8610_v6 = vand.u32 127, %v1968_v18 }
 0x60d   : > { %v8120_v25 = vpop.f32.mrf.mxu1 }
 0x60e   : > { %v8121_v37 = vadd.f32 %v8120_v25, %v6623_v44  ;;  %vm8611_vm0 = vcmp.eq.s32.totalorder %v8610_v6, 0 }
 0x617   : > { %v8071_v27 = vpop.f32.mrf.mxu0 }
 0x618   : > { %v8072_v30 = vadd.f32 %v8071_v27, %v8029_v23 }
 0x619   : > { %v8073_v7 = vpop.f32.mrf.mxu0 }
 0x61a   : > { %v8074_v26 = vadd.f32 %v8073_v7, %v8031_v20  ;;  %v8252_v35 = vmax.f32 %v8072_v30, 0.0 }
 0x61b   : > { %v8075_v40 = vpop.f32.mrf.mxu0 }
 0x61c   : > { %v8076_v19 = vadd.f32 %v8075_v40, %v8033_v16  ;;  %v8253_v49 = vmax.f32 %v8074_v26, 0.0  ;;  %v9808_v16 = vld [vmem:[#allocation18] ss:$0 sm:$0xff] }
 0x61d   : > { %v8077_v57 = vpop.f32.mrf.mxu0 }
 0x61e   : > { %v8078_v33 = vadd.f32 %v8077_v57, %v8035_v11  ;;  %v8256_v45 = vmax.f32 %v8076_v19, 0.0 }
 0x620   : > { %v8257_v21 = vmax.f32 %v8078_v33, 0.0  ;;  %v8260_v39 = vpack.c.bf16 %v8256_v45, %v8252_v35 }
 0x622   : > { %v8261_v47 = vpack.c.bf16 %v8257_v21, %v8253_v49 }
 0x624   : > { %8559 = vmatprep.mubr.bf16.mxu1 %v8261_v47 }
 0x625   : > { %8560 = vmatmul.mubr.bf16.vlgmr.msra.gmra.mxu1 %v8260_v39 }
 0x648   : > { %v8200_v3 = vpop.f32.mrf.mxu1 }
 0x64a   : > { %v8202_v28 = vpop.f32.mrf.mxu1 }
 0x64c   : > { %v8204_v41 = vpop.f32.mrf.mxu1 }
 0x64e   : > { %v8206_v15 = vpop.f32.mrf.mxu1 }
 0x657   : > { %v8157_v56 = vpop.f32.mrf.mxu0 }
 0x658   : > { %v8158_v42 = vadd.f32 %v8157_v56, %v8115_v9 }
 0x659   : > { %v8159_v31 = vpop.f32.mrf.mxu0 }
 0x65a   : > { %v8160_v10 = vadd.f32 %v8159_v31, %v8117_v34  ;;  %v8201_v22 = vadd.f32 %v8200_v3, %v8158_v42 }
 0x65b   : > { %v8161_v17 = vpop.f32.mrf.mxu0 }
 0x65c   : > { %v8162_v38 = vadd.f32 %v8161_v17, %v8119_v8  ;;  %v8203_v55 = vadd.f32 %v8202_v28, %v8160_v10 }
 0x65d   : > { %v8163_v50 = vpop.f32.mrf.mxu0 }
 0x65e   : > { %v8164_v2 = vadd.f32 %v8163_v50, %v8121_v37  ;;  %v8205_v14 = vadd.f32 %v8204_v41, %v8162_v38 }
 0x660   : > { %v8207_v60 = vadd.f32 %v8206_v15, %v8164_v2 }
 0x697   : > { %v8243_v48 = vpop.f32.mrf.mxu0 }
 0x698   : > { %v8244_v58 = vadd.f32 %v8243_v48, %v8201_v22 }
 0x699   : > { %v8245_v29 = vpop.f32.mrf.mxu0 }
 0x69a   : > { %v8246_v24 = vadd.f32 %v8245_v29, %v8203_v55  ;;  %v8254_v4 = vmax.f32 %v8244_v58, 0.0 }
 0x69b   : > { %v8247_v63 = vpop.f32.mrf.mxu0 }
 0x69c   : > { %v8248_v53 = vadd.f32 %v8247_v63, %v8205_v14  ;;  %v8255_v62 = vmax.f32 %v8246_v24, 0.0 }
 0x69d   : > { %v8249_v43 = vpop.f32.mrf.mxu0 }
 0x69e   : > { %v8250_v61 = vadd.f32 %v8249_v43, %v8207_v60  ;;  %v8258_v27 = vmax.f32 %v8248_v53, 0.0 }
 0x6a0   : > { %v8259_v36 = vmax.f32 %v8250_v61, 0.0  ;;  %v8262_v54 = vpack.c.bf16 %v8258_v27, %v8254_v4 }
 0x6a2   : > { %v8263_v12 = vpack.c.bf16 %v8259_v36, %v8255_v62 }
 0x6a4   : > { %8600 = vmatprep.mubr.bf16.mxu0 %v8263_v12 }
 0x6a5   : > { %8601 = vmatmul.mubr.bf16.vlgmr.msra.gmra.mxu0 %v8262_v54 }
 0x6e5   : > { %v10016_v7 = vpop.f32.mrf.mxu1 }
 0x6e7   : > { %v10017_v32 = vpop.f32.mrf.mxu1 }
 0x6e8   : > { %v10018_v20 = vadd.f32 %v10017_v32, %v10016_v7 }
 0x6e9   : > { %v10019_v13 = vpop.f32.mrf.mxu1 }
 0x6ea   : > { %v8562_v26 = vadd.f32 %v10018_v20, %v9808_v16 }
 0x6eb   : > { %v10020_v23 = vpop.f32.mrf.mxu1 }
 0x6ec   : > { %v10021_v19 = vadd.f32 %v10020_v23, %v10019_v13 }
 0x6ee   : > { %v8565_v33 = vadd.f32 %v10021_v19, %v9808_v16 }
 0x765   : > { %v10038_v40 = vpop.f32.mrf.mxu0 }
 0x767   : > { %v10039_v11 = vpop.f32.mrf.mxu0 }
 0x768   : > { %v10040_v46 = vadd.f32 %v10039_v11, %v10038_v40 }
 0x769   : > { %v10041_v30 = vpop.f32.mrf.mxu0 }
 0x76a   : > { %v8603_v57 = vadd.f32 %v10040_v46, %v8562_v26 }
 0x76b   : > { %v10042_v59 = vpop.f32.mrf.mxu0 }
 0x76c   : > { %v9841_v45 = vmul.f32 -1.442695, %v8603_v57  ;;  %v10043_v49 = vadd.f32 %v10042_v59, %v10041_v30  ;;  %v8612_v56 = vmax.f32 %v8603_v57, 0.0 }
 0x76e   : > { %10709 = vpow2.f32 %v9841_v45  ;;  %v8606_v21 = vadd.f32 %v10043_v49, %v8565_v33 }
 0x770   : > { %v9842_v0 = vmul.f32 -1.442695, %v8606_v21  ;;  %v8613_v3 = vmax.f32 %v8606_v21, 0.0 }
 0x772   : > { %10711 = vpow2.f32 %v9842_v0 }
 0x77b   : > { %v10710_v35 = vpop.eup %10709 }
 0x77c   : > { %v8620_v5 = vadd.f32 1.0, %v10710_v35 }
 0x77e   : > { %10713 = vrcp.f32 %v8620_v5 }
 0x77f   : > { %v10712_v47 = vpop.eup %10711 }
 0x780   : > { %v8621_v39 = vadd.f32 1.0, %v10712_v47 }
 0x782   : > { %10715 = vrcp.f32 %v8621_v39 }
 0x78b   : > { %v10714_v1 = vpop.eup %10713 }
 0x78c   : > { %8628 = vperm.xlu0 %10171, %v10714_v1  }
 0x78f   : > { %v10716_v51 = vpop.eup %10715 }
 0x790   : > { %8633 = vperm.xlu0 %10171, %v10716_v51  }
 0x807   : > { %v8629_v25 = vpop.permute.xlu0 %8628 }
 0x808   : > { %v8636_v31 = vsel %vm8611_vm0, %v8612_v56, %v8629_v25 }
 0x809   : > { %8638 = vst [vmem:[%s620_s18] sm:$0xff] %v8636_v31 }
 0x80b   : > { %v8634_v44 = vpop.permute.xlu0 %8633 }
 0x80c   : > { %v8637_v52 = vsel %vm8611_vm0, %v8613_v3, %v8634_v44 }
 0x80d   : > { %8639 = vst [vmem:[%s620_s18 + $0x8] sm:$0xff] %v8637_v52 }
 0x80e PF: > { %s29_s25 = sadd.s32 1, %s11034_s25  }
 0x80f   : > { %p26_p6 = scmp.ge.s32.totalorder %s29_s25, 4  }
 0x811   :  { %28 = sbr.rel (!%p26_p6) target bundleno = 6 (0x6), region = 150 }
 0x816   :  { %8662 = vsyncpa [#allocation3], 1 }
 0x817   :  { %8664 = vsyncpa [#allocation3 + $0x1], 1 }
 0x818   :  { %8665 = vsyncpa [#allocation5], 1 }
 0x819   :  { %8666 = vsyncpa [#allocation8], 1 }
 0x81a   :  { %8667 = vsyncpa [#allocation11], 1 }
 0x81b   :  { %8668 = vsyncpa [#allocation14], 1 }
 0x81c   :  { %8669 = vsyncpa [#allocation17], 1 }

</bundles_post_ra>
